<compile_context>
chip_gen: v7x
topology: tpu7x:2x2x1
jax: 0.10.0
libtpu: 0.0.40
codegen_flags: <defaults>
</compile_context>

<pallas_src>
import functools
import math

import jax
import jax.numpy as jnp
from jax.experimental import pallas as pl
from jax.experimental.pallas import tpu as pltpu

LIF_TAU = 2.0
LIF_VTH = 1.0
BN_EPS = 1e-5

_VMEM_LIMIT = None


def _vmem_limit_bytes():
    """40 MiB on 64-MiB-VMEM parts (v7x), 100 MiB on 128-MiB parts (v5e/v6e)."""
    global _VMEM_LIMIT
    if _VMEM_LIMIT is None:
        limit = 40 * 1024 * 1024                 # safe on every generation
        try:
            cap = int(getattr(pltpu.get_tpu_info(), "vmem_capacity_bytes", 0))
            if cap >= 128 * 1024 * 1024:
                limit = 100 * 1024 * 1024        # v5e / v6e: use the headroom
        except Exception:
            pass
        _VMEM_LIMIT = limit
    return _VMEM_LIMIT


def _round_up(x, m):
    return ((x + m - 1) // m) * m


# ----------------------------------------------------------------------------
# LIF neuron (spikingjelly LIFNode defaults: tau=2, v_th=1, v_reset=0,
# decay_input=True, hard reset).  Multi-step ('m') over T inside the kernel.
# ----------------------------------------------------------------------------
def _lif_step(v, x):
    v = v + (x - v) * (1.0 / LIF_TAU)            # charge
    spk = (v >= LIF_VTH).astype(jnp.float32)     # fire
    v = v * (1.0 - spk)                          # hard reset to 0
    return v, spk


# ----------------------------------------------------------------------------
# Kernel A: patch-matmul -> +BN bias -> multi-step LIF
# (used for 7x7 stem, stride-2 3x3 convs, 1x1 downsample convs)
# ----------------------------------------------------------------------------
def matmul_bn_lif_kernel(a_ref, w_ref, b_ref, o_ref):
    """a: [T, tm, K] bf16 patches, w: [K, tn] bf16 (BN scale pre-folded),
    b: [1, tn] f32 bias, o: [T, tm, tn] bf16 spikes."""
    T, tm, K = a_ref.shape
    tn = o_ref.shape[2]
    # One batched MXU call over all T timesteps (conv is not sequential in t).
    y = jnp.dot(a_ref[...].reshape(T * tm, K), w_ref[...],
                preferred_element_type=jnp.float32) + b_ref[...]
    v = jnp.zeros((tm, tn), jnp.float32)
    for t in range(T):                           # LIF is sequential in t
        v, spk = _lif_step(v, y[t * tm:(t + 1) * tm])
        o_ref[t] = spk.astype(o_ref.dtype)


# ----------------------------------------------------------------------------
# Kernel B: direct 3x3/stride-1 conv (9 shifted matmuls, no im2col)
#           -> +BN bias -> multi-step LIF (-> SEW 'ADD')
# Activations arrive as a flat zero-padded spatial slab [T, L, Cin] where
# window (di, dj) is the contiguous row range [di*Wp + dj, di*Wp + dj + Mout).
# ----------------------------------------------------------------------------
def _conv3x3s1_bn_lif_body(a_ref, w_ref, b_ref, id_ref, o_ref, *, wp):
    T, _, cin = a_ref.shape
    mout, tn = o_ref.shape[1], o_ref.shape[2]
    acc = jnp.zeros((T * mout, tn), jnp.float32)
    for di in range(3):
        for dj in range(3):
            s = di * wp + dj
            xs = a_ref[:, s:s + mout, :].reshape(T * mout, cin)   # shifted window
            acc = acc + jnp.dot(xs, w_ref[di, dj],
                                preferred_element_type=jnp.float32)
    acc = acc + b_ref[...]                       # BN bias (scale folded into w)
    v = jnp.zeros((mout, tn), jnp.float32)
    for t in range(T):
        v, spk = _lif_step(v, acc[t * mout:(t + 1) * mout])
        spk = spk.astype(o_ref.dtype)
        if id_ref is not None:
            spk = spk + id_ref[t]                # SEW 'ADD' in bf16 (exact)
        o_ref[t] = spk


def conv3x3s1_bn_lif_kernel(a_ref, w_ref, b_ref, o_ref, *, wp):
    _conv3x3s1_bn_lif_body(a_ref, w_ref, b_ref, None, o_ref, wp=wp)


def conv3x3s1_bn_lif_add_kernel(a_ref, w_ref, b_ref, id_ref, o_ref, *, wp):
    _conv3x3s1_bn_lif_body(a_ref, w_ref, b_ref, id_ref, o_ref, wp=wp)


# ----------------------------------------------------------------------------
# Wrapper glue
# ----------------------------------------------------------------------------
def _fold_bn(w, bn):
    """Fold BN scale into conv weights; return (bf16 weights, [1,cout] f32 bias)."""
    scale = bn['gamma'] / jnp.sqrt(bn['var'] + BN_EPS)
    bias = bn['beta'] - bn['mean'] * scale
    w_f = (w * scale).astype(jnp.bfloat16)       # broadcast over cout (last dim)
    return w_f, bias.reshape(1, -1).astype(jnp.float32)


def conv3x3s1_bn_lif(x, w, bn, identity=None, tn_max=256):
    """Fused 3x3 / stride-1 / pad-1 conv -> BN -> multi-step LIF (-> SEW ADD).

    x: [T, N, H, W, Cin] bf16 spikes, w: [3,3,Cin,cout] f32.  The im2col patch
    matrix never touches HBM: only a 1x-sized zero-padded flat copy does.
    """
    T, N, H, W, Cin = x.shape
    cout = w.shape[-1]
    w_f, bias = _fold_bn(w, bn)

    Hp, Wp = H + 2, W + 2
    Mv = N * Hp * Wp                              # flat padded spatial length
    Mout = _round_up(Mv, 8)                       # compute slab (sublane-aligned)
    halo = Wp + 1
    L = Mout + 2 * halo

    xp = jnp.pad(x, ((0, 0), (0, 0), (1, 1), (1, 1), (0, 0)))
    xp = xp.reshape(T, Mv, Cin)
    xp = jnp.pad(xp, ((0, 0), (halo, halo + Mout - Mv), (0, 0)))   # [T, L, Cin]

    tn = min(tn_max, cout)
    args = [xp, w_f, bias]
    in_specs = [
        pl.BlockSpec((T, L, Cin), lambda j: (0, 0, 0)),
        pl.BlockSpec((3, 3, Cin, tn), lambda j: (0, 0, 0, j)),
        pl.BlockSpec((1, tn), lambda j: (0, j)),
    ]
    if identity is None:
        kernel = functools.partial(conv3x3s1_bn_lif_kernel, wp=Wp)
    else:
        idp = jnp.pad(identity.astype(jnp.bfloat16),
                      ((0, 0), (0, 0), (1, 1), (1, 1), (0, 0)))
        idp = idp.reshape(T, Mv, cout)
        idp = jnp.pad(idp, ((0, 0), (0, Mout - Mv), (0, 0)))        # [T, Mout, cout]
        args.append(idp)
        in_specs.append(pl.BlockSpec((T, Mout, tn), lambda j: (0, 0, j)))
        kernel = functools.partial(conv3x3s1_bn_lif_add_kernel, wp=Wp)

    flops = 2 * T * N * H * W * 9 * Cin * cout
    bytes_accessed = (sum(int(a.size) * a.dtype.itemsize for a in args)
                      + T * Mout * cout * 2)
    out = pl.pallas_call(
        kernel,
        out_shape=jax.ShapeDtypeStruct((T, Mout, cout), jnp.bfloat16),
        grid=(cout // tn,),
        in_specs=in_specs,
        out_specs=pl.BlockSpec((T, Mout, tn), lambda j: (0, 0, j)),
        compiler_params=pltpu.CompilerParams(
            dimension_semantics=("parallel",),
            vmem_limit_bytes=_vmem_limit_bytes()),
        cost_estimate=pl.CostEstimate(flops=flops, transcendentals=0,
                                      bytes_accessed=bytes_accessed),
    )(*args)
    # Drop the zero-pad border rows (they carry garbage) and un-flatten.
    out = out[:, :Mv, :].reshape(T, N, Hp, Wp, cout)[:, :, 1:-1, 1:-1, :]
    return out


def im2col(x, kh, kw, stride, padding):
    """x: [B, H, W, C] -> ([B*OH*OW, kh*kw*C], OH, OW)."""
    B, H, W, C = x.shape
    OH = (H + 2 * padding - kh) // stride + 1
    OW = (W + 2 * padding - kw) // stride + 1
    xp = jnp.pad(x, ((0, 0), (padding, padding), (padding, padding), (0, 0)))
    cols = []
    for i in range(kh):
        for j in range(kw):
            cols.append(xp[:, i:i + stride * OH:stride,
                           j:j + stride * OW:stride, :])
    col = jnp.stack(cols, axis=3)                 # [B, OH, OW, kh*kw, C]
    return col.reshape(B * OH * OW, kh * kw * C), OH, OW


def conv_matmul_bn_lif(x, w, bn, stride, padding, tm=256, tn_max=256):
    """Fused conv (as a patch matmul) -> BN -> multi-step LIF.

    Used for the 7x7 stem, stride-2 3x3 convs and 1x1 downsample convs; the
    stride-1 3x3 workhorse layers use the im2col-free direct path above.
    """
    T, N, H, W, Cin = x.shape
    kh, kw, _, cout = w.shape
    w_f, bias = _fold_bn(w, bn)

    if kh == 1 and kw == 1 and padding == 0:
        xs = x[:, :, ::stride, ::stride, :] if stride > 1 else x
        OH, OW = xs.shape[2], xs.shape[3]
        A = xs.reshape(T, N * OH * OW, Cin)
    else:
        col, OH, OW = im2col(x.reshape(T * N, H, W, Cin), kh, kw, stride, padding)
        A = col.reshape(T, N * OH * OW, kh * kw * Cin)
    A = A.astype(jnp.bfloat16)
    K = A.shape[-1]
    Wm = w_f.reshape(K, cout)

    M = N * OH * OW
    tm_eff = min(tm, _round_up(M, 8))
    Mp = _round_up(M, tm_eff)
    tn = min(tn_max, cout)
    if Mp != M:
        A = jnp.pad(A, ((0, 0), (0, Mp - M), (0, 0)))

    flops = 2 * T * M * K * cout
    bytes_accessed = (int(A.size) * 2 + int(Wm.size) * 2 + int(bias.size) * 4
                      + T * Mp * cout * 2)
    out = pl.pallas_call(
        matmul_bn_lif_kernel,
        out_shape=jax.ShapeDtypeStruct((T, Mp, cout), jnp.bfloat16),
        grid=(Mp // tm_eff, cout // tn),
        in_specs=[
            pl.BlockSpec((T, tm_eff, K), lambda i, j: (0, i, 0)),
            pl.BlockSpec((K, tn), lambda i, j: (0, j)),
            pl.BlockSpec((1, tn), lambda i, j: (0, j)),
        ],
        out_specs=pl.BlockSpec((T, tm_eff, tn), lambda i, j: (0, i, j)),
        compiler_params=pltpu.CompilerParams(
            dimension_semantics=("parallel", "parallel"),
            vmem_limit_bytes=_vmem_limit_bytes()),
        cost_estimate=pl.CostEstimate(flops=flops, transcendentals=0,
                                      bytes_accessed=bytes_accessed),
    )(A, Wm, bias)
    return out[:, :M, :].reshape(T, N, OH, OW, cout)


def conv_bn_lif(x, w, bn, stride, padding, identity=None):
    """Dispatch: direct shifted-matmul path for 3x3/s1/p1, patch-matmul otherwise."""
    if w.shape[0] == 3 and stride == 1 and padding == 1:
        return conv3x3s1_bn_lif(x, w, bn, identity=identity)
    assert identity is None      # SEW ADD is only ever fused on the 3x3/s1 path
    return conv_matmul_bn_lif(x, w, bn, stride, padding)


def maxpool2d(x, k=3, s=2, p=1):
    """x: [T, N, H, W, C] bf16 spikes.  MaxPool2d(kernel=3, stride=2, padding=1)."""
    T, N, H, W, C = x.shape
    xb = x.reshape(T * N, H, W, C)
    OH = (H + 2 * p - k) // s + 1
    OW = (W + 2 * p - k) // s + 1
    xp = jnp.pad(xb, ((0, 0), (p, p), (p, p), (0, 0)), constant_values=-jnp.inf)
    out = None
    for i in range(k):
        for j in range(k):
            win = xp[:, i:i + s * OH:s, j:j + s * OW:s, :]
            out = win if out is None else jnp.maximum(out, win)
    return out.reshape(T, N, OH, OW, C)


# ----------------------------------------------------------------------------
# Model: parameter init + forward
# ----------------------------------------------------------------------------
def make_bn(c):
    # BN init: weight=1, bias=0; running stats mean=0, var=1 (inference mode).
    return dict(gamma=jnp.ones((c,), jnp.float32),
                beta=jnp.zeros((c,), jnp.float32),
                mean=jnp.zeros((c,), jnp.float32),
                var=jnp.ones((c,), jnp.float32))


def kaiming_conv(key, kh, kw, cin, cout):
    # kaiming_normal_(mode='fan_out', nonlinearity='relu')
    std = math.sqrt(2.0 / (cout * kh * kw))
    return std * jax.random.normal(key, (kh, kw, cin, cout), jnp.float32)


def init_sew_resnet(key, layers=(1, 1, 1, 1), num_classes=10, C=3):
    keys = iter(jax.random.split(key, 64))
    params = {}
    params['conv1'] = kaiming_conv(next(keys), 7, 7, C, 64)
    params['bn1'] = make_bn(64)
    inplanes = 64
    stage_planes = (64, 128, 256, 512)
    stage_strides = (1, 2, 2, 2)
    stages = []
    for planes, blocks, stride in zip(stage_planes, layers, stage_strides):
        blist = []
        for b in range(blocks):
            s = stride if b == 0 else 1
            bp = dict(
                stride=s,
                conv1=kaiming_conv(next(keys), 3, 3, inplanes, planes),
                bn1=make_bn(planes),
                conv2=kaiming_conv(next(keys), 3, 3, planes, planes),
                bn2=make_bn(planes),
            )
            if s != 1 or inplanes != planes:   # downsample: conv1x1 -> bn -> lif
                bp['ds_conv'] = kaiming_conv(next(keys), 1, 1, inplanes, planes)
                bp['ds_bn'] = make_bn(planes)
            inplanes = planes
            blist.append(bp)
        stages.append(blist)
    params['stages'] = stages
    params['fc_w'] = 0.01 * jax.random.normal(next(keys), (512, num_classes),
                                              jnp.float32)
    params['fc_b'] = jnp.zeros((num_classes,), jnp.float32)
    return params


def sew_basic_block(x, p):
    out = conv_bn_lif(x, p['conv1'], p['bn1'], stride=p['stride'], padding=1)
    if 'ds_conv' in p:
        identity = conv_bn_lif(x, p['ds_conv'], p['ds_bn'],
                               stride=p['stride'], padding=0)
    else:
        identity = x
    # Second conv: BN + LIF + SEW 'ADD' residual all fused into the kernel.
    return conv_bn_lif(out, p['conv2'], p['bn2'], stride=1, padding=1,
                       identity=identity)


def sew_resnet_forward(params, x, T=4):
    """x: [N, C, H, W] (NCHW, like the PyTorch module with a 4D input)."""
    # functional.reset_net: membrane potentials start at 0 (done inside kernel).
    x = jnp.transpose(x, (0, 2, 3, 1)).astype(jnp.bfloat16)       # NHWC, bf16
    x = jnp.broadcast_to(x[None], (T,) + x.shape)                 # repeat over T

    x = conv_bn_lif(x, params['conv1'], params['bn1'], stride=2, padding=3)
    x = maxpool2d(x, k=3, s=2, p=1)
    for stage in params['stages']:
        for bp in stage:
            x = sew_basic_block(x, bp)

    # AdaptiveAvgPool2d((1,1)) + flatten(2) + mean over time dim 0 (f32 math)
    feat = x.astype(jnp.float32).mean(axis=(2, 3))     # [T, N, 512]
    feat = feat.mean(axis=0)                           # [N, 512]

    # Final classifier: tiny [N,512]@[512,10] -- left to XLA.
    logits = jnp.dot(feat, params['fc_w']) + params['fc_b']
    feature_transform = 0.0
    return logits, feature_transform


if __name__ == "__main__":
    key = jax.random.PRNGKey(0)
    pkey, xkey = jax.random.split(key)

    # Small shapes consistent with the module: batch=2, C=3, H=W=32, T=4,
    # layers=[1,1,1,1] SEW BasicBlocks, num_classes=10.
    params = init_sew_resnet(pkey, layers=(1, 1, 1, 1), num_classes=10, C=3)
    x = jax.random.normal(xkey, (2, 3, 32, 32), jnp.float32)

    logits, feature_transform = sew_resnet_forward(params, x, T=4)
    logits = jax.block_until_ready(logits)

    assert logits.shape == (2, 10), logits.shape
    assert logits.dtype == jnp.float32
    print("KERNEL_OK")
</pallas_src>

<mosaic_0001>
module attributes {stable_mosaic.version = 11 : i64} {
  func.func @matmul_bn_lif_kernel(%arg0: i32, %arg1: i32, %arg2: memref<4x256x147xbf16, #tpu.memory_space<vmem>>, %arg3: memref<147x64xbf16, #tpu.memory_space<vmem>>, %arg4: memref<1x64xf32, #tpu.memory_space<vmem>>, %arg5: memref<4x256x64xbf16, #tpu.memory_space<vmem>>) attributes {dimension_semantics = [#tpu.dimension_semantics<parallel>, #tpu.dimension_semantics<parallel>], iteration_bounds = array<i64: 2, 1>, scalar_prefetch = 0 : i64, scratch_operands = 0 : i64, tpu.core_type = #tpu.core_type<tc>, window_params = [{transform_indices = @transform_0, window_bounds = array<i64: 4, 256, 147>}, {transform_indices = @transform_1, window_bounds = array<i64: 147, 64>}, {transform_indices = @transform_2, window_bounds = array<i64: 1, 64>}, {transform_indices = @transform_3, window_bounds = array<i64: 4, 256, 64>}]} {
    %c0 = arith.constant 0 : index
    %c0_0 = arith.constant 0 : index
    %c0_1 = arith.constant 0 : index
    %0 = vector.load %arg2[%c0, %c0_0, %c0_1] : memref<4x256x147xbf16, #tpu.memory_space<vmem>>, vector<4x256x147xbf16>
    %1 = vector.shape_cast %0 : vector<4x256x147xbf16> to vector<1024x147xbf16>
    %c0_2 = arith.constant 0 : index
    %c0_3 = arith.constant 0 : index
    %2 = vector.load %arg3[%c0_2, %c0_3] : memref<147x64xbf16, #tpu.memory_space<vmem>>, vector<147x64xbf16>
    %cst = arith.constant dense<0.000000e+00> : vector<1024x64xf32>
    %3 = tpu.matmul %1, %2, %cst {dimension_numbers = #tpu.dot_dimension_numbers<[1], [0], [0], [1], [0, 0, 1, 1], [], []>} : vector<1024x147xbf16>, vector<147x64xbf16>, vector<1024x64xf32> -> vector<1024x64xf32>
    %c0_4 = arith.constant 0 : index
    %c0_5 = arith.constant 0 : index
    %4 = vector.load %arg4[%c0_4, %c0_5] : memref<1x64xf32, #tpu.memory_space<vmem>>, vector<1x64xf32>
    %5 = vector.broadcast %4 : vector<1x64xf32> to vector<1024x64xf32>
    %6 = arith.addf %3, %5 : vector<1024x64xf32>
    %cst_6 = arith.constant 0.000000e+00 : f32
    %7 = vector.broadcast %cst_6 : f32 to vector<256x64xf32>
    %8 = vector.extract_strided_slice %6 {offsets = [0, 0], sizes = [256, 64], strides = [1, 1]} : vector<1024x64xf32> to vector<256x64xf32>
    %9 = arith.subf %8, %7 : vector<256x64xf32>
    %cst_7 = arith.constant 5.000000e-01 : f32
    %10 = vector.broadcast %cst_7 : f32 to vector<256x64xf32>
    %11 = arith.mulf %9, %10 : vector<256x64xf32>
    %12 = arith.addf %7, %11 : vector<256x64xf32>
    %cst_8 = arith.constant 1.000000e+00 : f32
    %13 = vector.broadcast %cst_8 : f32 to vector<256x64xf32>
    %14 = arith.cmpf oge, %12, %13 : vector<256x64xf32>
    %15 = arith.extui %14 : vector<256x64xi1> to vector<256x64xi32>
    %16 = arith.sitofp %15 : vector<256x64xi32> to vector<256x64xf32>
    %cst_9 = arith.constant 1.000000e+00 : f32
    %17 = vector.broadcast %cst_9 : f32 to vector<256x64xf32>
    %18 = arith.subf %17, %16 : vector<256x64xf32>
    %19 = arith.mulf %12, %18 : vector<256x64xf32>
    %20 = arith.truncf %16 : vector<256x64xf32> to vector<256x64xbf16>
    %c0_10 = arith.constant 0 : index
    %c0_11 = arith.constant 0 : index
    %c0_12 = arith.constant 0 : index
    %21 = vector.load %arg5[%c0_10, %c0_11, %c0_12] : memref<4x256x64xbf16, #tpu.memory_space<vmem>>, vector<1x256x64xbf16>
    %22 = vector.shape_cast %21 : vector<1x256x64xbf16> to vector<256x64xbf16>
    %23 = vector.shape_cast %20 : vector<256x64xbf16> to vector<1x256x64xbf16>
    tpu.vector_store %arg5[%c0_10, %c0_11, %c0_12], %23 {strides = array<i32>} : memref<4x256x64xbf16, #tpu.memory_space<vmem>>, vector<1x256x64xbf16>,
    %24 = vector.extract_strided_slice %6 {offsets = [256, 0], sizes = [256, 64], strides = [1, 1]} : vector<1024x64xf32> to vector<256x64xf32>
    %25 = arith.subf %24, %19 : vector<256x64xf32>
    %cst_13 = arith.constant 5.000000e-01 : f32
    %26 = vector.broadcast %cst_13 : f32 to vector<256x64xf32>
    %27 = arith.mulf %25, %26 : vector<256x64xf32>
    %28 = arith.addf %19, %27 : vector<256x64xf32>
    %cst_14 = arith.constant 1.000000e+00 : f32
    %29 = vector.broadcast %cst_14 : f32 to vector<256x64xf32>
    %30 = arith.cmpf oge, %28, %29 : vector<256x64xf32>
    %31 = arith.extui %30 : vector<256x64xi1> to vector<256x64xi32>
    %32 = arith.sitofp %31 : vector<256x64xi32> to vector<256x64xf32>
    %cst_15 = arith.constant 1.000000e+00 : f32
    %33 = vector.broadcast %cst_15 : f32 to vector<256x64xf32>
    %34 = arith.subf %33, %32 : vector<256x64xf32>
    %35 = arith.mulf %28, %34 : vector<256x64xf32>
    %36 = arith.truncf %32 : vector<256x64xf32> to vector<256x64xbf16>
    %c1 = arith.constant 1 : index
    %c0_16 = arith.constant 0 : index
    %c0_17 = arith.constant 0 : index
    %37 = vector.load %arg5[%c1, %c0_16, %c0_17] : memref<4x256x64xbf16, #tpu.memory_space<vmem>>, vector<1x256x64xbf16>
    %38 = vector.shape_cast %37 : vector<1x256x64xbf16> to vector<256x64xbf16>
    %39 = vector.shape_cast %36 : vector<256x64xbf16> to vector<1x256x64xbf16>
    tpu.vector_store %arg5[%c1, %c0_16, %c0_17], %39 {strides = array<i32>} : memref<4x256x64xbf16, #tpu.memory_space<vmem>>, vector<1x256x64xbf16>,
    %40 = vector.extract_strided_slice %6 {offsets = [512, 0], sizes = [256, 64], strides = [1, 1]} : vector<1024x64xf32> to vector<256x64xf32>
    %41 = arith.subf %40, %35 : vector<256x64xf32>
    %cst_18 = arith.constant 5.000000e-01 : f32
    %42 = vector.broadcast %cst_18 : f32 to vector<256x64xf32>
    %43 = arith.mulf %41, %42 : vector<256x64xf32>
    %44 = arith.addf %35, %43 : vector<256x64xf32>
    %cst_19 = arith.constant 1.000000e+00 : f32
    %45 = vector.broadcast %cst_19 : f32 to vector<256x64xf32>
    %46 = arith.cmpf oge, %44, %45 : vector<256x64xf32>
    %47 = arith.extui %46 : vector<256x64xi1> to vector<256x64xi32>
    %48 = arith.sitofp %47 : vector<256x64xi32> to vector<256x64xf32>
    %cst_20 = arith.constant 1.000000e+00 : f32
    %49 = vector.broadcast %cst_20 : f32 to vector<256x64xf32>
    %50 = arith.subf %49, %48 : vector<256x64xf32>
    %51 = arith.mulf %44, %50 : vector<256x64xf32>
    %52 = arith.truncf %48 : vector<256x64xf32> to vector<256x64xbf16>
    %c2 = arith.constant 2 : index
    %c0_21 = arith.constant 0 : index
    %c0_22 = arith.constant 0 : index
    %53 = vector.load %arg5[%c2, %c0_21, %c0_22] : memref<4x256x64xbf16, #tpu.memory_space<vmem>>, vector<1x256x64xbf16>
    %54 = vector.shape_cast %53 : vector<1x256x64xbf16> to vector<256x64xbf16>
    %55 = vector.shape_cast %52 : vector<256x64xbf16> to vector<1x256x64xbf16>
    tpu.vector_store %arg5[%c2, %c0_21, %c0_22], %55 {strides = array<i32>} : memref<4x256x64xbf16, #tpu.memory_space<vmem>>, vector<1x256x64xbf16>,
    %56 = vector.extract_strided_slice %6 {offsets = [768, 0], sizes = [256, 64], strides = [1, 1]} : vector<1024x64xf32> to vector<256x64xf32>
    %57 = arith.subf %56, %51 : vector<256x64xf32>
    %cst_23 = arith.constant 5.000000e-01 : f32
    %58 = vector.broadcast %cst_23 : f32 to vector<256x64xf32>
    %59 = arith.mulf %57, %58 : vector<256x64xf32>
    %60 = arith.addf %51, %59 : vector<256x64xf32>
    %cst_24 = arith.constant 1.000000e+00 : f32
    %61 = vector.broadcast %cst_24 : f32 to vector<256x64xf32>
    %62 = arith.cmpf oge, %60, %61 : vector<256x64xf32>
    %63 = arith.extui %62 : vector<256x64xi1> to vector<256x64xi32>
    %64 = arith.sitofp %63 : vector<256x64xi32> to vector<256x64xf32>
    %65 = arith.truncf %64 : vector<256x64xf32> to vector<256x64xbf16>
    %c3 = arith.constant 3 : index
    %c0_25 = arith.constant 0 : index
    %c0_26 = arith.constant 0 : index
    %66 = vector.load %arg5[%c3, %c0_25, %c0_26] : memref<4x256x64xbf16, #tpu.memory_space<vmem>>, vector<1x256x64xbf16>
    %67 = vector.shape_cast %66 : vector<1x256x64xbf16> to vector<256x64xbf16>
    %68 = vector.shape_cast %65 : vector<256x64xbf16> to vector<1x256x64xbf16>
    tpu.vector_store %arg5[%c3, %c0_25, %c0_26], %68 {strides = array<i32>} : memref<4x256x64xbf16, #tpu.memory_space<vmem>>, vector<1x256x64xbf16>,
    return
  }
  func.func @transform_0(%arg0: i32, %arg1: i32) -> (i32, i32, i32) {
    %c0_i32 = arith.constant 0 : i32
    %c0_i32_0 = arith.constant 0 : i32
    %c0_i32_1 = arith.constant 0 : i32
    return %c0_i32, %arg0, %c0_i32_0 : i32, i32, i32
  }
  func.func @transform_1(%arg0: i32, %arg1: i32) -> (i32, i32) {
    %c0_i32 = arith.constant 0 : i32
    %c0_i32_0 = arith.constant 0 : i32
    return %c0_i32, %arg1 : i32, i32
  }
  func.func @transform_2(%arg0: i32, %arg1: i32) -> (i32, i32) {
    %c0_i32 = arith.constant 0 : i32
    %c0_i32_0 = arith.constant 0 : i32
    return %c0_i32, %arg1 : i32, i32
  }
  func.func @transform_3(%arg0: i32, %arg1: i32) -> (i32, i32, i32) {
    %c0_i32 = arith.constant 0 : i32
    %c0_i32_0 = arith.constant 0 : i32
    return %c0_i32, %arg0, %arg1 : i32, i32, i32
  }
}

</mosaic_0001>

<bundles_post_ra>
// kernel: tpu_custom_call.1
= control target key start
LH: loop header
LB: loop body
LE: loop exit
PB: predicated region body
PF: predicated region fallthrough
CT: control target
= control target key end

     0   :  { %s5539_s12 = smov 0   ;;  %s5541_s13 = smov 0   ;;  %s7369_s0 = inlined_call_operand.vmem [shape: bf16[4,512,147], index: 0, kind: input, shape index: {}]   ;;  %s7370_s1 = inlined_call_operand.vmem [shape: bf16[147,64], index: 1, kind: input, shape index: {}]   ;;  %s7371_s2 = inlined_call_operand.vmem [shape: f32[1,64], index: 2, kind: input, shape index: {}]   ;;  %s7372_s3 = inlined_call_operand.vmem [shape: bf16[4,512,64], index: 3, kind: output, shape index: {}]  }
   0x1   :  { %s5543_s14 = smov 0   ;;  %s5545_s15 = smov 0  }
   0x2   :  { %s5547_s16 = smov 0  }
   0x3 LB: > { %s25_s17 = sadd.s32 1, %s5510_s15  ;;  %s4513_s18 = sadd.s32 4294967295, %s5514_s16   ;;  %s5514_s16 = sphi %s5547_s16, %s13_s16   ;;  %s5510_s15 = sphi %s5545_s15, %s7452_s15   ;;  %s5506_s14 = sphi %s5543_s14, %s7451_s14   ;;  %s5502_s13 = sphi %s5541_s13, %s7450_s13   ;;  %s5498_s12 = sphi %s5539_s12, %s7449_s12  }
   0x4   : > { %p27_p0 = scmp.ge.s32.totalorder %s25_s17, 2  ;;  %p39_p1 = scmp.ne.s32.totalorder %s5502_s13, %s5498_s12 }
   0x5   : > { %p40_p2 = scmp.eq.s32.totalorder %s5514_s16, 0  ;;  %p123_p4 = scmp.eq.s32.totalorder %s4513_s18, 1 }
   0x6   : > { %s7454_s17 = smov (%p27_p0, %s25_s17), 0  ;;  %s32_s20 = sadd.s32 1, %s5502_s13 }
   0x7   : > { %p41_p3 = por %p40_p2, %p39_p1  ;;  %s29_s19 = ssub.s32 %s5510_s15, %s7454_s17 }
   0x8   : > { %p30_p5 = scmp.eq.s32.totalorder %s29_s19, 0  ;;  %p5574_p6 = por %p123_p4, %p39_p1 }
   0x9   : > { %p4518_p7 = scmp.ge.s32.totalorder %s5514_s16, 2 }
   0xa   : > { %s5579_s22 = scalar_select %p30_p5, %s5502_s13, %s32_s20  }
   0xb   : > { %158 = sbr.rel (%p4518_p7) target bundleno = 86 (0x56), region = 24 }
  0x12   : > { %161 = sbr.rel (!%p41_p3) target bundleno = 86 (0x56), region = 28  ;;  %s163_s23 = sand.u32 (%p41_p3), 1, %s5502_s13  }
  0x13   : > { %s5087_s24 = sshll.u32 (%p41_p3), %s5510_s15, 8  ;;  %s4519_s25 = sshll.u32 (%p41_p3), %s163_s23, 10 }
  0x14   : > { %s5587_s28 = scalar_lea.vmem (%p41_p3), %s7369_s0, %s5087_s24  ;;  %s5592_s29 = scalar_lea.vmem (%p41_p3), [#allocation2], %s4519_s25 }
  0x15   : > { %v451_v0 = vld [vmem:[%s5587_s28] sm:$0xff] (%p41_p3)  ;;  %v453_v1 = vld [vmem:[%s5587_s28 + $0x8] sm:$0xff] (%p41_p3)  ;;  %v455_v2 = vld [vmem:[%s5587_s28 + $0x10] sm:$0xff] (%p41_p3) }
  0x16   : > { %452 = vst [vmem:[%s5592_s29] sm:$0xff] (%p41_p3), %v451_v0  ;;  %454 = vst [vmem:[%s5592_s29 + $0x8] sm:$0xff] (%p41_p3), %v453_v1  ;;  %v457_v3 = vld [vmem:[%s5587_s28 + $0x18] sm:$0xff] (%p41_p3)  ;;  %v459_v4 = vld [vmem:[%s5587_s28 + $0x20] sm:$0xff] (%p41_p3) }
  0x17   : > { %456 = vst [vmem:[%s5592_s29 + $0x10] sm:$0xff] (%p41_p3), %v455_v2  ;;  %v461_v5 = vld [vmem:[%s5587_s28 + $0x28] sm:$0xff] (%p41_p3)  ;;  %458 = vst [vmem:[%s5592_s29 + $0x18] sm:$0xff] (%p41_p3), %v457_v3  ;;  %v463_v6 = vld [vmem:[%s5587_s28 + $0x30] sm:$0xff] (%p41_p3) }
  0x18   : > { %460 = vst [vmem:[%s5592_s29 + $0x20] sm:$0xff] (%p41_p3), %v459_v4  ;;  %462 = vst [vmem:[%s5592_s29 + $0x28] sm:$0xff] (%p41_p3), %v461_v5  ;;  %v465_v7 = vld [vmem:[%s5587_s28 + $0x38] sm:$0xff] (%p41_p3)  ;;  %v467_v8 = vld [vmem:[%s5587_s28 + $0x40] sm:$0xff] (%p41_p3) }
  0x19   : > { %464 = vst [vmem:[%s5592_s29 + $0x30] sm:$0xff] %v463_v6  ;;  %466 = vst [vmem:[%s5592_s29 + $0x38] sm:$0xff] %v465_v7  ;;  %v469_v9 = vld [vmem:[%s5587_s28 + $0x48] sm:$0xff]  ;;  %v471_v10 = vld [vmem:[%s5587_s28 + $0x50] sm:$0xff] }
  0x1a   : > { %468 = vst [vmem:[%s5592_s29 + $0x40] sm:$0xff] %v467_v8  ;;  %v473_v11 = vld [vmem:[%s5587_s28 + $0x58] sm:$0xff]  ;;  %470 = vst [vmem:[%s5592_s29 + $0x48] sm:$0xff] %v469_v9  ;;  %v475_v12 = vld [vmem:[%s5587_s28 + $0x60] sm:$0xff] }
  0x1b   : > { %472 = vst [vmem:[%s5592_s29 + $0x50] sm:$0xff] %v471_v10  ;;  %474 = vst [vmem:[%s5592_s29 + $0x58] sm:$0xff] %v473_v11  ;;  %v477_v13 = vld [vmem:[%s5587_s28 + $0x68] sm:$0xff]  ;;  %v479_v14 = vld [vmem:[%s5587_s28 + $0x70] sm:$0xff] }
  0x1c   : > { %476 = vst [vmem:[%s5592_s29 + $0x60] sm:$0xff] %v475_v12  ;;  %478 = vst [vmem:[%s5592_s29 + $0x68] sm:$0xff] %v477_v13  ;;  %v481_v15 = vld [vmem:[%s5587_s28 + $0x78] sm:$0xff]  ;;  %v483_v16 = vld [vmem:[%s5587_s28 + $0x80] sm:$0xff] }
  0x1d   : > { %480 = vst [vmem:[%s5592_s29 + $0x70] sm:$0xff] %v479_v14  ;;  %v485_v17 = vld [vmem:[%s5587_s28 + $0x88] sm:$0xff]  ;;  %482 = vst [vmem:[%s5592_s29 + $0x78] sm:$0xff] %v481_v15  ;;  %v487_v18 = vld [vmem:[%s5587_s28 + $0x90] sm:$0xff] }
  0x1e   : > { %484 = vst [vmem:[%s5592_s29 + $0x80] sm:$0xff] %v483_v16  ;;  %486 = vst [vmem:[%s5592_s29 + $0x88] sm:$0xff] %v485_v17  ;;  %v489_v19 = vld [vmem:[%s5587_s28 + $0x98] sm:$0xff]  ;;  %v491_v20 = vld [vmem:[%s5587_s28 + $0xa0] sm:$0xff] }
  0x1f   : > { %488 = vst [vmem:[%s5592_s29 + $0x90] sm:$0xff] %v487_v18  ;;  %490 = vst [vmem:[%s5592_s29 + $0x98] sm:$0xff] %v489_v19  ;;  %v493_v21 = vld [vmem:[%s5587_s28 + $0xa8] sm:$0xff]  ;;  %v495_v22 = vld [vmem:[%s5587_s28 + $0xb0] sm:$0xff] }
  0x20   : > { %492 = vst [vmem:[%s5592_s29 + $0xa0] sm:$0xff] %v491_v20  ;;  %v497_v23 = vld [vmem:[%s5587_s28 + $0xb8] sm:$0xff]  ;;  %494 = vst [vmem:[%s5592_s29 + $0xa8] sm:$0xff] %v493_v21  ;;  %v499_v24 = vld [vmem:[%s5587_s28 + $0xc0] sm:$0xff] }
  0x21   : > { %496 = vst [vmem:[%s5592_s29 + $0xb0] sm:$0xff] %v495_v22  ;;  %498 = vst [vmem:[%s5592_s29 + $0xb8] sm:$0xff] %v497_v23  ;;  %v501_v25 = vld [vmem:[%s5587_s28 + $0xc8] sm:$0xff]  ;;  %v503_v26 = vld [vmem:[%s5587_s28 + $0xd0] sm:$0xff] }
  0x22   : > { %500 = vst [vmem:[%s5592_s29 + $0xc0] sm:$0xff] %v499_v24  ;;  %502 = vst [vmem:[%s5592_s29 + $0xc8] sm:$0xff] %v501_v25  ;;  %v505_v27 = vld [vmem:[%s5587_s28 + $0xd8] sm:$0xff]  ;;  %v507_v28 = vld [vmem:[%s5587_s28 + $0xe0] sm:$0xff] }
  0x23   : > { %504 = vst [vmem:[%s5592_s29 + $0xd0] sm:$0xff] %v503_v26  ;;  %v509_v29 = vld [vmem:[%s5587_s28 + $0xe8] sm:$0xff]  ;;  %506 = vst [vmem:[%s5592_s29 + $0xd8] sm:$0xff] %v505_v27  ;;  %v511_v30 = vld [vmem:[%s5587_s28 + $0xf0] sm:$0xff] }
  0x24   : > { %508 = vst [vmem:[%s5592_s29 + $0xe0] sm:$0xff] %v507_v28  ;;  %510 = vst [vmem:[%s5592_s29 + $0xe8] sm:$0xff] %v509_v29  ;;  %v513_v31 = vld [vmem:[%s5587_s28 + $0xf8] sm:$0xff]  ;;  %v515_v32 = vld [vmem:[%s5587_s28 + $0x200] sm:$0xff] }
  0x25   : > { %512 = vst [vmem:[%s5592_s29 + $0xf0] sm:$0xff] %v511_v30  ;;  %514 = vst [vmem:[%s5592_s29 + $0xf8] sm:$0xff] %v513_v31  ;;  %v517_v33 = vld [vmem:[%s5587_s28 + $0x208] sm:$0xff]  ;;  %v519_v34 = vld [vmem:[%s5587_s28 + $0x210] sm:$0xff] }
  0x26   : > { %516 = vst [vmem:[%s5592_s29 + $0x100] sm:$0xff] %v515_v32  ;;  %v521_v35 = vld [vmem:[%s5587_s28 + $0x218] sm:$0xff]  ;;  %518 = vst [vmem:[%s5592_s29 + $0x108] sm:$0xff] %v517_v33  ;;  %v523_v36 = vld [vmem:[%s5587_s28 + $0x220] sm:$0xff] }
  0x27   : > { %520 = vst [vmem:[%s5592_s29 + $0x110] sm:$0xff] %v519_v34  ;;  %522 = vst [vmem:[%s5592_s29 + $0x118] sm:$0xff] %v521_v35  ;;  %v525_v37 = vld [vmem:[%s5587_s28 + $0x228] sm:$0xff]  ;;  %v527_v38 = vld [vmem:[%s5587_s28 + $0x230] sm:$0xff] }
  0x28   : > { %524 = vst [vmem:[%s5592_s29 + $0x120] sm:$0xff] %v523_v36  ;;  %526 = vst [vmem:[%s5592_s29 + $0x128] sm:$0xff] %v525_v37  ;;  %v529_v39 = vld [vmem:[%s5587_s28 + $0x238] sm:$0xff]  ;;  %v531_v40 = vld [vmem:[%s5587_s28 + $0x240] sm:$0xff] }
  0x29   : > { %528 = vst [vmem:[%s5592_s29 + $0x130] sm:$0xff] %v527_v38  ;;  %v533_v41 = vld [vmem:[%s5587_s28 + $0x248] sm:$0xff]  ;;  %530 = vst [vmem:[%s5592_s29 + $0x138] sm:$0xff] %v529_v39  ;;  %v535_v42 = vld [vmem:[%s5587_s28 + $0x250] sm:$0xff] }
  0x2a   : > { %532 = vst [vmem:[%s5592_s29 + $0x140] sm:$0xff] %v531_v40  ;;  %534 = vst [vmem:[%s5592_s29 + $0x148] sm:$0xff] %v533_v41  ;;  %v537_v43 = vld [vmem:[%s5587_s28 + $0x258] sm:$0xff]  ;;  %v539_v44 = vld [vmem:[%s5587_s28 + $0x260] sm:$0xff] }
  0x2b   : > { %536 = vst [vmem:[%s5592_s29 + $0x150] sm:$0xff] %v535_v42  ;;  %538 = vst [vmem:[%s5592_s29 + $0x158] sm:$0xff] %v537_v43  ;;  %v541_v45 = vld [vmem:[%s5587_s28 + $0x268] sm:$0xff]  ;;  %v543_v46 = vld [vmem:[%s5587_s28 + $0x270] sm:$0xff] }
  0x2c   : > { %540 = vst [vmem:[%s5592_s29 + $0x160] sm:$0xff] %v539_v44  ;;  %v545_v47 = vld [vmem:[%s5587_s28 + $0x278] sm:$0xff]  ;;  %542 = vst [vmem:[%s5592_s29 + $0x168] sm:$0xff] %v541_v45  ;;  %v547_v48 = vld [vmem:[%s5587_s28 + $0x280] sm:$0xff] }
  0x2d   : > { %544 = vst [vmem:[%s5592_s29 + $0x170] sm:$0xff] %v543_v46  ;;  %546 = vst [vmem:[%s5592_s29 + $0x178] sm:$0xff] %v545_v47  ;;  %v549_v49 = vld [vmem:[%s5587_s28 + $0x288] sm:$0xff]  ;;  %v551_v50 = vld [vmem:[%s5587_s28 + $0x290] sm:$0xff] }
  0x2e   : > { %548 = vst [vmem:[%s5592_s29 + $0x180] sm:$0xff] %v547_v48  ;;  %550 = vst [vmem:[%s5592_s29 + $0x188] sm:$0xff] %v549_v49  ;;  %v553_v51 = vld [vmem:[%s5587_s28 + $0x298] sm:$0xff]  ;;  %v555_v52 = vld [vmem:[%s5587_s28 + $0x2a0] sm:$0xff] }
  0x2f   : > { %552 = vst [vmem:[%s5592_s29 + $0x190] sm:$0xff] %v551_v50  ;;  %v557_v53 = vld [vmem:[%s5587_s28 + $0x2a8] sm:$0xff]  ;;  %554 = vst [vmem:[%s5592_s29 + $0x198] sm:$0xff] %v553_v51  ;;  %v559_v54 = vld [vmem:[%s5587_s28 + $0x2b0] sm:$0xff] }
  0x30   : > { %556 = vst [vmem:[%s5592_s29 + $0x1a0] sm:$0xff] %v555_v52  ;;  %558 = vst [vmem:[%s5592_s29 + $0x1a8] sm:$0xff] %v557_v53  ;;  %v561_v55 = vld [vmem:[%s5587_s28 + $0x2b8] sm:$0xff]  ;;  %v563_v56 = vld [vmem:[%s5587_s28 + $0x2c0] sm:$0xff] }
  0x31   : > { %560 = vst [vmem:[%s5592_s29 + $0x1b0] sm:$0xff] %v559_v54  ;;  %562 = vst [vmem:[%s5592_s29 + $0x1b8] sm:$0xff] %v561_v55  ;;  %v565_v57 = vld [vmem:[%s5587_s28 + $0x2c8] sm:$0xff]  ;;  %v567_v58 = vld [vmem:[%s5587_s28 + $0x2d0] sm:$0xff] }
  0x32   : > { %564 = vst [vmem:[%s5592_s29 + $0x1c0] sm:$0xff] %v563_v56  ;;  %v569_v59 = vld [vmem:[%s5587_s28 + $0x2d8] sm:$0xff]  ;;  %566 = vst [vmem:[%s5592_s29 + $0x1c8] sm:$0xff] %v565_v57  ;;  %v571_v60 = vld [vmem:[%s5587_s28 + $0x2e0] sm:$0xff] }
  0x33   : > { %568 = vst [vmem:[%s5592_s29 + $0x1d0] sm:$0xff] %v567_v58  ;;  %570 = vst [vmem:[%s5592_s29 + $0x1d8] sm:$0xff] %v569_v59  ;;  %v573_v61 = vld [vmem:[%s5587_s28 + $0x2e8] sm:$0xff]  ;;  %v575_v62 = vld [vmem:[%s5587_s28 + $0x2f0] sm:$0xff] }
  0x34   : > { %572 = vst [vmem:[%s5592_s29 + $0x1e0] sm:$0xff] %v571_v60  ;;  %574 = vst [vmem:[%s5592_s29 + $0x1e8] sm:$0xff] %v573_v61  ;;  %v577_v63 = vld [vmem:[%s5587_s28 + $0x2f8] sm:$0xff]  ;;  %v579_v0 = vld [vmem:[%s5587_s28 + $0x400] sm:$0xff] }
  0x35   : > { %576 = vst [vmem:[%s5592_s29 + $0x1f0] sm:$0xff] %v575_v62  ;;  %v581_v1 = vld [vmem:[%s5587_s28 + $0x408] sm:$0xff]  ;;  %578 = vst [vmem:[%s5592_s29 + $0x1f8] sm:$0xff] %v577_v63  ;;  %v583_v2 = vld [vmem:[%s5587_s28 + $0x410] sm:$0xff] }
  0x36   : > { %580 = vst [vmem:[%s5592_s29 + $0x200] sm:$0xff] %v579_v0  ;;  %582 = vst [vmem:[%s5592_s29 + $0x208] sm:$0xff] %v581_v1  ;;  %v585_v3 = vld [vmem:[%s5587_s28 + $0x418] sm:$0xff]  ;;  %v587_v4 = vld [vmem:[%s5587_s28 + $0x420] sm:$0xff] }
  0x37   : > { %584 = vst [vmem:[%s5592_s29 + $0x210] sm:$0xff] %v583_v2  ;;  %586 = vst [vmem:[%s5592_s29 + $0x218] sm:$0xff] %v585_v3  ;;  %v589_v5 = vld [vmem:[%s5587_s28 + $0x428] sm:$0xff]  ;;  %v591_v6 = vld [vmem:[%s5587_s28 + $0x430] sm:$0xff] }
  0x38   : > { %588 = vst [vmem:[%s5592_s29 + $0x220] sm:$0xff] %v587_v4  ;;  %v593_v7 = vld [vmem:[%s5587_s28 + $0x438] sm:$0xff]  ;;  %590 = vst [vmem:[%s5592_s29 + $0x228] sm:$0xff] %v589_v5  ;;  %v595_v8 = vld [vmem:[%s5587_s28 + $0x440] sm:$0xff] }
  0x39   : > { %592 = vst [vmem:[%s5592_s29 + $0x230] sm:$0xff] %v591_v6  ;;  %594 = vst [vmem:[%s5592_s29 + $0x238] sm:$0xff] %v593_v7  ;;  %v597_v9 = vld [vmem:[%s5587_s28 + $0x448] sm:$0xff]  ;;  %v599_v10 = vld [vmem:[%s5587_s28 + $0x450] sm:$0xff] }
  0x3a   : > { %596 = vst [vmem:[%s5592_s29 + $0x240] sm:$0xff] %v595_v8  ;;  %598 = vst [vmem:[%s5592_s29 + $0x248] sm:$0xff] %v597_v9  ;;  %v601_v11 = vld [vmem:[%s5587_s28 + $0x458] sm:$0xff]  ;;  %v603_v12 = vld [vmem:[%s5587_s28 + $0x460] sm:$0xff] }
  0x3b   : > { %600 = vst [vmem:[%s5592_s29 + $0x250] sm:$0xff] %v599_v10  ;;  %v605_v13 = vld [vmem:[%s5587_s28 + $0x468] sm:$0xff]  ;;  %602 = vst [vmem:[%s5592_s29 + $0x258] sm:$0xff] %v601_v11  ;;  %v607_v14 = vld [vmem:[%s5587_s28 + $0x470] sm:$0xff] }
  0x3c   : > { %604 = vst [vmem:[%s5592_s29 + $0x260] sm:$0xff] %v603_v12  ;;  %606 = vst [vmem:[%s5592_s29 + $0x268] sm:$0xff] %v605_v13  ;;  %v609_v15 = vld [vmem:[%s5587_s28 + $0x478] sm:$0xff]  ;;  %v611_v16 = vld [vmem:[%s5587_s28 + $0x480] sm:$0xff] }
  0x3d   : > { %608 = vst [vmem:[%s5592_s29 + $0x270] sm:$0xff] %v607_v14  ;;  %610 = vst [vmem:[%s5592_s29 + $0x278] sm:$0xff] %v609_v15  ;;  %v613_v17 = vld [vmem:[%s5587_s28 + $0x488] sm:$0xff]  ;;  %v615_v18 = vld [vmem:[%s5587_s28 + $0x490] sm:$0xff] }
  0x3e   : > { %612 = vst [vmem:[%s5592_s29 + $0x280] sm:$0xff] %v611_v16  ;;  %v617_v19 = vld [vmem:[%s5587_s28 + $0x498] sm:$0xff]  ;;  %614 = vst [vmem:[%s5592_s29 + $0x288] sm:$0xff] %v613_v17  ;;  %v619_v20 = vld [vmem:[%s5587_s28 + $0x4a0] sm:$0xff] }
  0x3f   : > { %616 = vst [vmem:[%s5592_s29 + $0x290] sm:$0xff] %v615_v18  ;;  %618 = vst [vmem:[%s5592_s29 + $0x298] sm:$0xff] %v617_v19  ;;  %v621_v21 = vld [vmem:[%s5587_s28 + $0x4a8] sm:$0xff]  ;;  %v623_v22 = vld [vmem:[%s5587_s28 + $0x4b0] sm:$0xff] }
  0x40   : > { %620 = vst [vmem:[%s5592_s29 + $0x2a0] sm:$0xff] %v619_v20  ;;  %622 = vst [vmem:[%s5592_s29 + $0x2a8] sm:$0xff] %v621_v21  ;;  %v625_v23 = vld [vmem:[%s5587_s28 + $0x4b8] sm:$0xff]  ;;  %v627_v24 = vld [vmem:[%s5587_s28 + $0x4c0] sm:$0xff] }
  0x41   : > { %624 = vst [vmem:[%s5592_s29 + $0x2b0] sm:$0xff] %v623_v22  ;;  %v629_v25 = vld [vmem:[%s5587_s28 + $0x4c8] sm:$0xff]  ;;  %626 = vst [vmem:[%s5592_s29 + $0x2b8] sm:$0xff] %v625_v23  ;;  %v631_v26 = vld [vmem:[%s5587_s28 + $0x4d0] sm:$0xff] }
  0x42   : > { %628 = vst [vmem:[%s5592_s29 + $0x2c0] sm:$0xff] %v627_v24  ;;  %630 = vst [vmem:[%s5592_s29 + $0x2c8] sm:$0xff] %v629_v25  ;;  %v633_v27 = vld [vmem:[%s5587_s28 + $0x4d8] sm:$0xff]  ;;  %v635_v28 = vld [vmem:[%s5587_s28 + $0x4e0] sm:$0xff] }
  0x43   : > { %632 = vst [vmem:[%s5592_s29 + $0x2d0] sm:$0xff] %v631_v26  ;;  %634 = vst [vmem:[%s5592_s29 + $0x2d8] sm:$0xff] %v633_v27  ;;  %v637_v29 = vld [vmem:[%s5587_s28 + $0x4e8] sm:$0xff]  ;;  %v639_v30 = vld [vmem:[%s5587_s28 + $0x4f0] sm:$0xff] }
  0x44   : > { %636 = vst [vmem:[%s5592_s29 + $0x2e0] sm:$0xff] %v635_v28  ;;  %v641_v31 = vld [vmem:[%s5587_s28 + $0x4f8] sm:$0xff]  ;;  %638 = vst [vmem:[%s5592_s29 + $0x2e8] sm:$0xff] %v637_v29  ;;  %v643_v32 = vld [vmem:[%s5587_s28 + $0x600] sm:$0xff] }
  0x45   : > { %640 = vst [vmem:[%s5592_s29 + $0x2f0] sm:$0xff] %v639_v30  ;;  %642 = vst [vmem:[%s5592_s29 + $0x2f8] sm:$0xff] %v641_v31  ;;  %v645_v33 = vld [vmem:[%s5587_s28 + $0x608] sm:$0xff]  ;;  %v647_v34 = vld [vmem:[%s5587_s28 + $0x610] sm:$0xff] }
  0x46   : > { %644 = vst [vmem:[%s5592_s29 + $0x300] sm:$0xff] %v643_v32  ;;  %646 = vst [vmem:[%s5592_s29 + $0x308] sm:$0xff] %v645_v33  ;;  %v649_v35 = vld [vmem:[%s5587_s28 + $0x618] sm:$0xff]  ;;  %v651_v36 = vld [vmem:[%s5587_s28 + $0x620] sm:$0xff] }
  0x47   : > { %648 = vst [vmem:[%s5592_s29 + $0x310] sm:$0xff] %v647_v34  ;;  %v653_v37 = vld [vmem:[%s5587_s28 + $0x628] sm:$0xff]  ;;  %650 = vst [vmem:[%s5592_s29 + $0x318] sm:$0xff] %v649_v35  ;;  %v655_v38 = vld [vmem:[%s5587_s28 + $0x630] sm:$0xff] }
  0x48   : > { %652 = vst [vmem:[%s5592_s29 + $0x320] sm:$0xff] %v651_v36  ;;  %654 = vst [vmem:[%s5592_s29 + $0x328] sm:$0xff] %v653_v37  ;;  %v657_v39 = vld [vmem:[%s5587_s28 + $0x638] sm:$0xff]  ;;  %v659_v40 = vld [vmem:[%s5587_s28 + $0x640] sm:$0xff] }
  0x49   : > { %656 = vst [vmem:[%s5592_s29 + $0x330] sm:$0xff] %v655_v38  ;;  %658 = vst [vmem:[%s5592_s29 + $0x338] sm:$0xff] %v657_v39  ;;  %v661_v41 = vld [vmem:[%s5587_s28 + $0x648] sm:$0xff]  ;;  %v663_v42 = vld [vmem:[%s5587_s28 + $0x650] sm:$0xff] }
  0x4a   : > { %660 = vst [vmem:[%s5592_s29 + $0x340] sm:$0xff] %v659_v40  ;;  %v665_v43 = vld [vmem:[%s5587_s28 + $0x658] sm:$0xff]  ;;  %662 = vst [vmem:[%s5592_s29 + $0x348] sm:$0xff] %v661_v41  ;;  %v667_v44 = vld [vmem:[%s5587_s28 + $0x660] sm:$0xff] }
  0x4b   : > { %664 = vst [vmem:[%s5592_s29 + $0x350] sm:$0xff] %v663_v42  ;;  %666 = vst [vmem:[%s5592_s29 + $0x358] sm:$0xff] %v665_v43  ;;  %v669_v45 = vld [vmem:[%s5587_s28 + $0x668] sm:$0xff]  ;;  %v671_v46 = vld [vmem:[%s5587_s28 + $0x670] sm:$0xff] }
  0x4c   : > { %668 = vst [vmem:[%s5592_s29 + $0x360] sm:$0xff] %v667_v44  ;;  %670 = vst [vmem:[%s5592_s29 + $0x368] sm:$0xff] %v669_v45  ;;  %v673_v47 = vld [vmem:[%s5587_s28 + $0x678] sm:$0xff]  ;;  %v675_v48 = vld [vmem:[%s5587_s28 + $0x680] sm:$0xff] }
  0x4d   : > { %672 = vst [vmem:[%s5592_s29 + $0x370] sm:$0xff] %v671_v46  ;;  %v677_v49 = vld [vmem:[%s5587_s28 + $0x688] sm:$0xff]  ;;  %674 = vst [vmem:[%s5592_s29 + $0x378] sm:$0xff] %v673_v47  ;;  %v679_v50 = vld [vmem:[%s5587_s28 + $0x690] sm:$0xff] }
  0x4e   : > { %676 = vst [vmem:[%s5592_s29 + $0x380] sm:$0xff] %v675_v48  ;;  %678 = vst [vmem:[%s5592_s29 + $0x388] sm:$0xff] %v677_v49  ;;  %v681_v51 = vld [vmem:[%s5587_s28 + $0x698] sm:$0xff]  ;;  %v683_v52 = vld [vmem:[%s5587_s28 + $0x6a0] sm:$0xff] }
  0x4f   : > { %680 = vst [vmem:[%s5592_s29 + $0x390] sm:$0xff] %v679_v50  ;;  %682 = vst [vmem:[%s5592_s29 + $0x398] sm:$0xff] %v681_v51  ;;  %v685_v53 = vld [vmem:[%s5587_s28 + $0x6a8] sm:$0xff]  ;;  %v687_v54 = vld [vmem:[%s5587_s28 + $0x6b0] sm:$0xff] }
  0x50   : > { %684 = vst [vmem:[%s5592_s29 + $0x3a0] sm:$0xff] %v683_v52  ;;  %v689_v55 = vld [vmem:[%s5587_s28 + $0x6b8] sm:$0xff]  ;;  %686 = vst [vmem:[%s5592_s29 + $0x3a8] sm:$0xff] %v685_v53  ;;  %v691_v56 = vld [vmem:[%s5587_s28 + $0x6c0] sm:$0xff] }
  0x51   : > { %688 = vst [vmem:[%s5592_s29 + $0x3b0] sm:$0xff] %v687_v54  ;;  %690 = vst [vmem:[%s5592_s29 + $0x3b8] sm:$0xff] %v689_v55  ;;  %v693_v57 = vld [vmem:[%s5587_s28 + $0x6c8] sm:$0xff]  ;;  %v695_v58 = vld [vmem:[%s5587_s28 + $0x6d0] sm:$0xff] }
  0x52   : > { %692 = vst [vmem:[%s5592_s29 + $0x3c0] sm:$0xff] %v691_v56  ;;  %694 = vst [vmem:[%s5592_s29 + $0x3c8] sm:$0xff] %v693_v57  ;;  %v697_v59 = vld [vmem:[%s5587_s28 + $0x6d8] sm:$0xff]  ;;  %v699_v60 = vld [vmem:[%s5587_s28 + $0x6e0] sm:$0xff] }
  0x53   : > { %696 = vst [vmem:[%s5592_s29 + $0x3d0] sm:$0xff] %v695_v58  ;;  %v701_v61 = vld [vmem:[%s5587_s28 + $0x6e8] sm:$0xff]  ;;  %698 = vst [vmem:[%s5592_s29 + $0x3d8] sm:$0xff] %v697_v59  ;;  %v703_v62 = vld [vmem:[%s5587_s28 + $0x6f0] sm:$0xff] }
  0x54   : > { %700 = vst [vmem:[%s5592_s29 + $0x3e0] sm:$0xff] %v699_v60  ;;  %702 = vst [vmem:[%s5592_s29 + $0x3e8] sm:$0xff] %v701_v61  ;;  %v705_v63 = vld [vmem:[%s5587_s28 + $0x6f8] sm:$0xff] }
  0x55   : > { %704 = vst [vmem:[%s5592_s29 + $0x3f0] sm:$0xff] %v703_v62  ;;  %706 = vst [vmem:[%s5592_s29 + $0x3f8] sm:$0xff] %v705_v63 }
  0x56 PF: > { %p4523_p8 = scmp.ge.s32.totalorder %s5514_s16, 1  ;;  %p711_p9 = scmp.lt.s32.totalorder %s5514_s16, 3 }
  0x58   : > { %p712_p10 = pnand %p4523_p8, %p711_p9 }
  0x5a   : > { %715 = sbr.rel (%p712_p10) target bundleno = 702 (0x2be), region = 66 }
  0x61   : > { %v5280_v0 = vld [vmem:[%s7370_s1] sm:$0xff]   ;;  %v5516_v1 = vmov 0   ;;  %v5281_v2 = vld [vmem:[%s7370_s1 + $0x8] sm:$0xff]   ;;  %v5282_v3 = vld [vmem:[%s7370_s1 + $0x10] sm:$0xff]   ;;  %s718_s9 = sand.u32 1, %s5498_s12   ;;  %vm1544_vm0 = vcmask 154624  }
  0x62   : > { %1744 = vmatprep.subr.bf16.mxu0 %v5516_v1  ;;  %5217 = vmatprep.subr.bf16.mxu1 %v5516_v1  ;;  %s4524_s10 = sshll.u32 %s718_s9, 10  ;;  %v5283_v4 = vld [vmem:[%s7370_s1 + $0x18] sm:$0xff]   ;;  %v5284_v6 = vld [vmem:[%s7370_s1 + $0x20] sm:$0xff]   ;;  %v5285_v8 = vld [vmem:[%s7370_s1 + $0x28] sm:$0xff]   ;;  %vm1737_vm1 = vcmask 1040384   ;;  %vm1738_vm2 = vcmask 1041408  }
  0x63   : > { %1745 = vmatpush1.bf16.msra.mxu0 %v5280_v0  ;;  %5227 = vmatpush1.bf16.msra.mxu1 %v5280_v0  ;;  %s5861_s11 = scalar_lea.vmem [#allocation2], %s4524_s10  ;;  %v5286_v9 = vld [vmem:[%s7370_s1 + $0x30] sm:$0xff]   ;;  %v5287_v10 = vld [vmem:[%s7370_s1 + $0x38] sm:$0xff]   ;;  %v5517_v11 = vmov 65535   ;;  %v5288_v13 = vld [vmem:[%s7370_s1 + $0x40] sm:$0xff]   ;;  %s4525_s10 = sshll.u32 %s718_s9, 9 }
  0x64   : > { %1746 = vmatprep.subr.bf16.mxu0 %v5516_v1  ;;  %5218 = vmatprep.subr.bf16.mxu1 %v5516_v1  ;;  %v5292_v5 = vld [vmem:[%s5861_s11 + $0x4] ss:$8 sps:$4 sm:$0xff]   ;;  %v1739_v12 = vsel %vm1737_vm1, 4294967295, %v5517_v11  ;;  %v5289_v14 = vld [vmem:[%s7370_s1 + $0x48] ss:$0 sps:$4 sm:$0x33]  }
  0x65   : > { %4665 = vmatprep.mubr.msk.bf16.mxu0 %vm1544_vm0, %v5292_v5  ;;  %v5301_v7 = vld [vmem:[%s5861_s11 + $0x204] ss:$8 sps:$4 sm:$0xff]   ;;  %v1740_v15 = vsel %vm1738_vm2, %v1739_v12, 0  ;;  %v5290_v17 = vld [vmem:[%s5861_s11] ss:$8 sps:$4 sm:$0xff]   ;;  %vm2641_vm4 = vcmask 519168  }
  0x66   : > { %4697 = vmatprep.mubr.msk.bf16.mxu1 %vm1544_vm0, %v5301_v7  ;;  %v1742_v16 = vand.u32 %v5289_v14, %v1740_v15  ;;  %v5299_v18 = vld [vmem:[%s5861_s11 + $0x200] ss:$8 sps:$4 sm:$0xff]   ;;  %v5293_v19 = vld [vmem:[%s5861_s11 + $0x14] ss:$8 sps:$4 sm:$0xff]   ;;  %v5295_v21 = vld [vmem:[%s5861_s11 + $0x10] ss:$8 sps:$4 sm:$0xff]  }
  0x67   : > { %1747 = vmatpush1.bf16.msra.mxu0 %v5281_v2  ;;  %5228 = vmatpush1.bf16.msra.mxu1 %v5281_v2  ;;  %v5305_v20 = vld [vmem:[%s5861_s11 + $0x214] ss:$8 sps:$4 sm:$0xff]   ;;  %v5307_v22 = vld [vmem:[%s5861_s11 + $0x210] ss:$8 sps:$4 sm:$0xff]   ;;  %v5296_v23 = vld [vmem:[%s5861_s11 + $0x24] ss:$8 sps:$4 sm:$0xff]  }
  0x68   : > { %1748 = vmatprep.subr.bf16.mxu0 %v5516_v1  ;;  %5219 = vmatprep.subr.bf16.mxu1 %v5516_v1  ;;  %v5311_v24 = vld [vmem:[%s5861_s11 + $0x224] ss:$8 sps:$4 sm:$0xff]   ;;  %v5298_v25 = vld [vmem:[%s5861_s11 + $0x20] ss:$8 sps:$4 sm:$0xff]   ;;  %v5302_v27 = vld [vmem:[%s5861_s11 + $0x34] ss:$8 sps:$4 sm:$0xff]  }
  0x69   : > { %v5313_v26 = vld [vmem:[%s5861_s11 + $0x220] ss:$8 sps:$4 sm:$0xff]   ;;  %v5317_v28 = vld [vmem:[%s5861_s11 + $0x234] ss:$8 sps:$4 sm:$0xff]   ;;  %v5304_v29 = vld [vmem:[%s5861_s11 + $0x30] ss:$8 sps:$4 sm:$0xff]  }
  0x6a   : > { %v5319_v30 = vld [vmem:[%s5861_s11 + $0x230] ss:$8 sps:$4 sm:$0xff]   ;;  %v5308_v31 = vld [vmem:[%s5861_s11 + $0x44] ss:$8 sps:$4 sm:$0xff]   ;;  %v5310_v33 = vld [vmem:[%s5861_s11 + $0x40] ss:$8 sps:$4 sm:$0xff]  }
  0x6b   : > { %1749 = vmatpush1.bf16.msra.mxu0 %v5282_v3  ;;  %5229 = vmatpush1.bf16.msra.mxu1 %v5282_v3  ;;  %v5323_v32 = vld [vmem:[%s5861_s11 + $0x244] ss:$8 sps:$4 sm:$0xff]   ;;  %v5325_v34 = vld [vmem:[%s5861_s11 + $0x240] ss:$8 sps:$4 sm:$0xff]   ;;  %v5314_v35 = vld [vmem:[%s5861_s11 + $0x54] ss:$8 sps:$4 sm:$0xff]  }
  0x6c   : > { %1750 = vmatprep.subr.bf16.mxu0 %v5516_v1  ;;  %5220 = vmatprep.subr.bf16.mxu1 %v5516_v1  ;;  %v5329_v36 = vld [vmem:[%s5861_s11 + $0x254] ss:$8 sps:$4 sm:$0xff]   ;;  %v5316_v37 = vld [vmem:[%s5861_s11 + $0x50] ss:$8 sps:$4 sm:$0xff]   ;;  %v5320_v39 = vld [vmem:[%s5861_s11 + $0x64] ss:$8 sps:$4 sm:$0xff]  }
  0x6d   : > { %v5331_v38 = vld [vmem:[%s5861_s11 + $0x250] ss:$8 sps:$4 sm:$0xff]   ;;  %v5335_v40 = vld [vmem:[%s5861_s11 + $0x264] ss:$8 sps:$4 sm:$0xff]   ;;  %v5322_v41 = vld [vmem:[%s5861_s11 + $0x60] ss:$8 sps:$4 sm:$0xff]  }
  0x6e   : > { %v5337_v42 = vld [vmem:[%s5861_s11 + $0x260] ss:$8 sps:$4 sm:$0xff]   ;;  %v5326_v43 = vld [vmem:[%s5861_s11 + $0x74] ss:$8 sps:$4 sm:$0xff]   ;;  %v5328_v45 = vld [vmem:[%s5861_s11 + $0x70] ss:$8 sps:$4 sm:$0xff]  }
  0x6f   : > { %1751 = vmatpush1.bf16.msra.mxu0 %v5283_v4  ;;  %5230 = vmatpush1.bf16.msra.mxu1 %v5283_v4  ;;  %v5341_v44 = vld [vmem:[%s5861_s11 + $0x274] ss:$8 sps:$4 sm:$0xff]   ;;  %v5343_v46 = vld [vmem:[%s5861_s11 + $0x270] ss:$8 sps:$4 sm:$0xff]   ;;  %v5332_v47 = vld [vmem:[%s5861_s11 + $0x84] ss:$8 sps:$4 sm:$0xff]  }
  0x70   : > { %1752 = vmatprep.subr.bf16.mxu0 %v5516_v1  ;;  %5221 = vmatprep.subr.bf16.mxu1 %v5516_v1  ;;  %v5347_v48 = vld [vmem:[%s5861_s11 + $0x284] ss:$8 sps:$4 sm:$0xff]   ;;  %v5334_v49 = vld [vmem:[%s5861_s11 + $0x80] ss:$8 sps:$4 sm:$0xff]   ;;  %v5338_v51 = vld [vmem:[%s5861_s11 + $0x94] ss:$8 sps:$4 sm:$0xff]  }
  0x71   : > { %v5349_v50 = vld [vmem:[%s5861_s11 + $0x280] ss:$8 sps:$4 sm:$0xff]   ;;  %v5353_v52 = vld [vmem:[%s5861_s11 + $0x294] ss:$8 sps:$4 sm:$0xff]   ;;  %v5340_v53 = vld [vmem:[%s5861_s11 + $0x90] ss:$8 sps:$4 sm:$0xff]  }
  0x72   : > { %v5355_v54 = vld [vmem:[%s5861_s11 + $0x290] ss:$8 sps:$4 sm:$0xff]   ;;  %v5344_v55 = vld [vmem:[%s5861_s11 + $0xa4] ss:$8 sps:$4 sm:$0xff]   ;;  %v5346_v57 = vld [vmem:[%s5861_s11 + $0xa0] ss:$8 sps:$4 sm:$0xff]  }
  0x73   : > { %1753 = vmatpush1.bf16.msra.mxu0 %v5284_v6  ;;  %5231 = vmatpush1.bf16.msra.mxu1 %v5284_v6  ;;  %v5359_v56 = vld [vmem:[%s5861_s11 + $0x2a4] ss:$8 sps:$4 sm:$0xff]   ;;  %v5361_v58 = vld [vmem:[%s5861_s11 + $0x2a0] ss:$8 sps:$4 sm:$0xff]   ;;  %v5350_v59 = vld [vmem:[%s5861_s11 + $0xb4] ss:$8 sps:$4 sm:$0xff]  }
  0x74   : > { %1754 = vmatprep.subr.bf16.mxu0 %v5516_v1  ;;  %5222 = vmatprep.subr.bf16.mxu1 %v5516_v1  ;;  %v5365_v60 = vld [vmem:[%s5861_s11 + $0x2b4] ss:$8 sps:$4 sm:$0xff]   ;;  %v5352_v61 = vld [vmem:[%s5861_s11 + $0xb0] ss:$8 sps:$4 sm:$0xff]   ;;  %v5356_v63 = vld [vmem:[%s5861_s11 + $0xc4] ss:$8 sps:$4 sm:$0xff]  }
  0x75   : > { %v5367_v62 = vld [vmem:[%s5861_s11 + $0x2b0] ss:$8 sps:$4 sm:$0xff]   ;;  %v5371_v0 = vld [vmem:[%s5861_s11 + $0x2c4] ss:$8 sps:$4 sm:$0xff]   ;;  %v5373_v2 = vld [vmem:[%s5861_s11 + $0x2c0] ss:$8 sps:$4 sm:$0xff]  }
  0x76   : > { %v5362_v3 = vld [vmem:[%s5861_s11 + $0xd4] ss:$8 sps:$4 sm:$0xff]   ;;  %v5364_v5 = vld [vmem:[%s5861_s11 + $0xd0] ss:$8 sps:$4 sm:$0xff]   ;;  %v5368_v7 = vld [vmem:[%s5861_s11 + $0xe4] ss:$8 sps:$4 sm:$0xff]  }
  0x77   : > { %1755 = vmatpush1.bf16.msra.mxu0 %v5285_v8  ;;  %5232 = vmatpush1.bf16.msra.mxu1 %v5285_v8  ;;  %v5377_v4 = vld [vmem:[%s5861_s11 + $0x2d4] ss:$8 sps:$4 sm:$0xff]   ;;  %v5379_v6 = vld [vmem:[%s5861_s11 + $0x2d0] ss:$8 sps:$4 sm:$0xff]   ;;  %v5383_v8 = vld [vmem:[%s5861_s11 + $0x2e4] ss:$8 sps:$4 sm:$0xff]  }
  0x78   : > { %1756 = vmatprep.subr.bf16.mxu0 %v5516_v1  ;;  %5223 = vmatprep.subr.bf16.mxu1 %v5516_v1  ;;  %v5374_v11 = vld [vmem:[%s5861_s11 + $0xf4] ss:$8 sps:$4 sm:$0xff]   ;;  %v5391_v14 = vld [vmem:[%s5861_s11 + $0x2f0] ss:$8 sps:$4 sm:$0xff]   ;;  %v5380_v15 = vld [vmem:[%s5861_s11 + $0x104] ss:$8 sps:$4 sm:$0xff]  }
  0x79   : > { %v5389_v12 = vld [vmem:[%s5861_s11 + $0x2f4] ss:$8 sps:$4 sm:$0xff]   ;;  %s6081_s12 = scalar_lea.vmem [#allocation3], %s4525_s10  ;;  %s5216_s20 = sshll.u32 (%p5574_p6), %s5506_s14, 7 }
  0x7a   : > { %s7227_s25 = scalar_lea.vmem (%p5574_p6), %s7372_s3, %s5216_s20 }
  0x7b   : > { %1757 = vmatpush1.bf16.msra.mxu0 %v5286_v9  ;;  %5233 = vmatpush1.bf16.msra.mxu1 %v5286_v9  ;;  %v5370_v9 = vld [vmem:[%s5861_s11 + $0xe0] ss:$8 sps:$4 sm:$0xff]  }
  0x7c   : > { %1758 = vmatprep.subr.bf16.mxu0 %v5516_v1  ;;  %5224 = vmatprep.subr.bf16.mxu1 %v5516_v1 }
  0x7f   : > { %1759 = vmatpush1.bf16.msra.mxu0 %v5287_v10  ;;  %5234 = vmatpush1.bf16.msra.mxu1 %v5287_v10  ;;  %v5385_v10 = vld [vmem:[%s5861_s11 + $0x2e0] ss:$8 sps:$4 sm:$0xff]  }
  0x80   : > { %1760 = vmatprep.subr.bf16.mxu0 %v5516_v1  ;;  %5225 = vmatprep.subr.bf16.mxu1 %v5516_v1 }
  0x83   : > { %1761 = vmatpush1.bf16.msra.mxu0 %v5288_v13  ;;  %5235 = vmatpush1.bf16.msra.mxu1 %v5288_v13  ;;  %v5376_v13 = vld [vmem:[%s5861_s11 + $0xf0] ss:$8 sps:$4 sm:$0xff]  }
  0x84   : > { %1762 = vmatprep.subr.bf16.mxu0 %v5516_v1  ;;  %5226 = vmatprep.subr.bf16.mxu1 %v5516_v1  ;;  %v5358_v1 = vld [vmem:[%s5861_s11 + $0xc0] ss:$8 sps:$4 sm:$0xff]  }
  0x87   : > { %1763 = vmatpush1.bf16.msra.mxu0 %v1742_v16  ;;  %5236 = vmatpush1.bf16.msra.mxu1 %v1742_v16  ;;  %v5395_v16 = vld [vmem:[%s5861_s11 + $0x304] ss:$8 sps:$4 sm:$0xff]  }
  0x8a   : > { %1777 = vmatmul.mubr.bf16.vlgmr.msra.gmra.mrb[0].mxu0 %v5290_v17  ;;  %2033 = vmatmul.mubr.bf16.vlgmr.msra.gmra.mrb[0].mxu1 %v5299_v18  ;;  %v5382_v17 = vld [vmem:[%s5861_s11 + $0x100] ss:$8 sps:$4 sm:$0xff]  }
  0x8b   : > { %4666 = vmatprep.mubr.msk.bf16.mxu0 %vm1544_vm0, %v5293_v19  ;;  %4698 = vmatprep.mubr.msk.bf16.mxu1 %vm1544_vm0, %v5305_v20  ;;  %v5397_v18 = vld [vmem:[%s5861_s11 + $0x300] ss:$8 sps:$4 sm:$0xff]   ;;  %v5386_v19 = vld [vmem:[%s5861_s11 + $0x114] ss:$8 sps:$4 sm:$0xff]  }
  0x8c   : > { %v5401_v20 = vld [vmem:[%s5861_s11 + $0x314] ss:$8 sps:$4 sm:$0xff]  }
  0x92   : > { %1785 = vmatmul.mubr.bf16.gmra.mrb[4].mxu0 %v5295_v21  ;;  %2041 = vmatmul.mubr.bf16.gmra.mrb[4].mxu1 %v5307_v22  ;;  %v5388_v21 = vld [vmem:[%s5861_s11 + $0x110] ss:$8 sps:$4 sm:$0xff]  }
  0x93   : > { %4667 = vmatprep.mubr.msk.bf16.mxu0 %vm1544_vm0, %v5296_v23  ;;  %4699 = vmatprep.mubr.msk.bf16.mxu1 %vm1544_vm0, %v5311_v24  ;;  %v5403_v22 = vld [vmem:[%s5861_s11 + $0x310] ss:$8 sps:$4 sm:$0xff]   ;;  %v5392_v23 = vld [vmem:[%s5861_s11 + $0x124] ss:$8 sps:$4 sm:$0xff]  }
  0x94   : > { %v5407_v24 = vld [vmem:[%s5861_s11 + $0x324] ss:$8 sps:$4 sm:$0xff]  }
  0x9a   : > { %1793 = vmatmul.mubr.bf16.gmra.mrb[8].mxu0 %v5298_v25  ;;  %2049 = vmatmul.mubr.bf16.gmra.mrb[8].mxu1 %v5313_v26  ;;  %v5394_v25 = vld [vmem:[%s5861_s11 + $0x120] ss:$8 sps:$4 sm:$0xff]  }
  0x9b   : > { %4668 = vmatprep.mubr.msk.bf16.mxu0 %vm1544_vm0, %v5302_v27  ;;  %4700 = vmatprep.mubr.msk.bf16.mxu1 %vm1544_vm0, %v5317_v28  ;;  %v5409_v26 = vld [vmem:[%s5861_s11 + $0x320] ss:$8 sps:$4 sm:$0xff]   ;;  %v5398_v27 = vld [vmem:[%s5861_s11 + $0x134] ss:$8 sps:$4 sm:$0xff]  }
  0x9c   : > { %v5413_v28 = vld [vmem:[%s5861_s11 + $0x334] ss:$8 sps:$4 sm:$0xff]  }
  0xa2   : > { %1801 = vmatmul.mubr.bf16.gmra.mrb[12].mxu0 %v5304_v29  ;;  %2057 = vmatmul.mubr.bf16.gmra.mrb[12].mxu1 %v5319_v30  ;;  %v5400_v29 = vld [vmem:[%s5861_s11 + $0x130] ss:$8 sps:$4 sm:$0xff]  }
  0xa3   : > { %4669 = vmatprep.mubr.msk.bf16.mxu0 %vm1544_vm0, %v5308_v31  ;;  %4701 = vmatprep.mubr.msk.bf16.mxu1 %vm1544_vm0, %v5323_v32  ;;  %v5415_v30 = vld [vmem:[%s5861_s11 + $0x330] ss:$8 sps:$4 sm:$0xff]   ;;  %v5404_v31 = vld [vmem:[%s5861_s11 + $0x144] ss:$8 sps:$4 sm:$0xff]  }
  0xa4   : > { %v5419_v32 = vld [vmem:[%s5861_s11 + $0x344] ss:$8 sps:$4 sm:$0xff]  }
  0xaa   : > { %1809 = vmatmul.mubr.bf16.gmra.mrb[16].mxu0 %v5310_v33  ;;  %2065 = vmatmul.mubr.bf16.gmra.mrb[16].mxu1 %v5325_v34  ;;  %v5406_v33 = vld [vmem:[%s5861_s11 + $0x140] ss:$8 sps:$4 sm:$0xff]  }
  0xab   : > { %4670 = vmatprep.mubr.msk.bf16.mxu0 %vm1544_vm0, %v5314_v35  ;;  %4702 = vmatprep.mubr.msk.bf16.mxu1 %vm1544_vm0, %v5329_v36  ;;  %v5421_v34 = vld [vmem:[%s5861_s11 + $0x340] ss:$8 sps:$4 sm:$0xff]   ;;  %v5410_v35 = vld [vmem:[%s5861_s11 + $0x154] ss:$8 sps:$4 sm:$0xff]  }
  0xac   : > { %v5425_v36 = vld [vmem:[%s5861_s11 + $0x354] ss:$8 sps:$4 sm:$0xff]  }
  0xb2   : > { %1817 = vmatmul.mubr.bf16.gmra.mrb[20].mxu0 %v5316_v37  ;;  %2073 = vmatmul.mubr.bf16.gmra.mrb[20].mxu1 %v5331_v38  ;;  %v5412_v37 = vld [vmem:[%s5861_s11 + $0x150] ss:$8 sps:$4 sm:$0xff]  }
  0xb3   : > { %4671 = vmatprep.mubr.msk.bf16.mxu0 %vm1544_vm0, %v5320_v39  ;;  %4703 = vmatprep.mubr.msk.bf16.mxu1 %vm1544_vm0, %v5335_v40  ;;  %v5427_v38 = vld [vmem:[%s5861_s11 + $0x350] ss:$8 sps:$4 sm:$0xff]   ;;  %v5416_v39 = vld [vmem:[%s5861_s11 + $0x164] ss:$8 sps:$4 sm:$0xff]  }
  0xb4   : > { %v5431_v40 = vld [vmem:[%s5861_s11 + $0x364] ss:$8 sps:$4 sm:$0xff]  }
  0xba   : > { %1825 = vmatmul.mubr.bf16.gmra.mrb[24].mxu0 %v5322_v41  ;;  %2081 = vmatmul.mubr.bf16.gmra.mrb[24].mxu1 %v5337_v42  ;;  %v5418_v41 = vld [vmem:[%s5861_s11 + $0x160] ss:$8 sps:$4 sm:$0xff]  }
  0xbb   : > { %4672 = vmatprep.mubr.msk.bf16.mxu0 %vm1544_vm0, %v5326_v43  ;;  %4704 = vmatprep.mubr.msk.bf16.mxu1 %vm1544_vm0, %v5341_v44  ;;  %v5433_v42 = vld [vmem:[%s5861_s11 + $0x360] ss:$8 sps:$4 sm:$0xff]   ;;  %v5422_v43 = vld [vmem:[%s5861_s11 + $0x174] ss:$8 sps:$4 sm:$0xff]  }
  0xbc   : > { %v5437_v44 = vld [vmem:[%s5861_s11 + $0x374] ss:$8 sps:$4 sm:$0xff]  }
  0xc2   : > { %1833 = vmatmul.mubr.bf16.gmra.mrb[28].mxu0 %v5328_v45  ;;  %2089 = vmatmul.mubr.bf16.gmra.mrb[28].mxu1 %v5343_v46  ;;  %v5424_v45 = vld [vmem:[%s5861_s11 + $0x170] ss:$8 sps:$4 sm:$0xff]  }
  0xc3   : > { %4673 = vmatprep.mubr.msk.bf16.mxu0 %vm1544_vm0, %v5332_v47  ;;  %4705 = vmatprep.mubr.msk.bf16.mxu1 %vm1544_vm0, %v5347_v48  ;;  %v5439_v46 = vld [vmem:[%s5861_s11 + $0x370] ss:$8 sps:$4 sm:$0xff]   ;;  %v5428_v47 = vld [vmem:[%s5861_s11 + $0x184] ss:$8 sps:$4 sm:$0xff]  }
  0xc4   : > { %v5443_v48 = vld [vmem:[%s5861_s11 + $0x384] ss:$8 sps:$4 sm:$0xff]  }
  0xca   : > { %1841 = vmatmul.mubr.bf16.gmra.mrb[32].mxu0 %v5334_v49  ;;  %2097 = vmatmul.mubr.bf16.gmra.mrb[32].mxu1 %v5349_v50  ;;  %v869_v49 = vld [vmem:[%s5861_s11 + $0x380] sm:$0xff]  ;;  %v870_v50 = vld [vmem:[%s5861_s11 + $0x388] sm:$0xff] }
  0xcb   : > { %4674 = vmatprep.mubr.msk.bf16.mxu0 %vm1544_vm0, %v5338_v51  ;;  %4706 = vmatprep.mubr.msk.bf16.mxu1 %vm1544_vm0, %v5353_v52  ;;  %v5430_v51 = vld [vmem:[%s5861_s11 + $0x180] ss:$8 sps:$4 sm:$0xff]   ;;  %v4639_v52 = vcombine.low %v869_v49, %v870_v50  ;;  %v879_v49 = vld [vmem:[%s5861_s11 + $0x3d0] sm:$0xff]  ;;  %v880_v50 = vld [vmem:[%s5861_s11 + $0x3d8] sm:$0xff] }
  0xd2   : > { %1849 = vmatmul.mubr.bf16.gmra.mrb[36].mxu0 %v5340_v53  ;;  %2105 = vmatmul.mubr.bf16.gmra.mrb[36].mxu1 %v5355_v54  ;;  %v5434_v53 = vld [vmem:[%s5861_s11 + $0x194] ss:$8 sps:$4 sm:$0xff]  }
  0xd3   : > { %4675 = vmatprep.mubr.msk.bf16.mxu0 %vm1544_vm0, %v5344_v55  ;;  %4707 = vmatprep.mubr.msk.bf16.mxu1 %vm1544_vm0, %v5359_v56  ;;  %v5448_v54 = vld [vmem:[%s5861_s11 + $0x394] ss:$8 sps:$4 sm:$0xff]  }
  0xd4   : > { %v871_v55 = vld [vmem:[%s5861_s11 + $0x390] sm:$0xff]  ;;  %v872_v56 = vld [vmem:[%s5861_s11 + $0x398] sm:$0xff] }
  0xda   : > { %1857 = vmatmul.mubr.bf16.gmra.mrb[40].mxu0 %v5346_v57  ;;  %2113 = vmatmul.mubr.bf16.gmra.mrb[40].mxu1 %v5361_v58  ;;  %v5436_v57 = vld [vmem:[%s5861_s11 + $0x190] ss:$8 sps:$4 sm:$0xff]   ;;  %v4641_v58 = vcombine.low %v871_v55, %v872_v56 }
  0xdb   : > { %4676 = vmatprep.mubr.msk.bf16.mxu0 %vm1544_vm0, %v5350_v59  ;;  %4708 = vmatprep.mubr.msk.bf16.mxu1 %vm1544_vm0, %v5365_v60  ;;  %v5440_v59 = vld [vmem:[%s5861_s11 + $0x1a4] ss:$8 sps:$4 sm:$0xff]  }
  0xdc   : > { %v5453_v60 = vld [vmem:[%s5861_s11 + $0x3a4] ss:$8 sps:$4 sm:$0xff]  }
  0xe2   : > { %1865 = vmatmul.mubr.bf16.gmra.mrb[44].mxu0 %v5352_v61  ;;  %2121 = vmatmul.mubr.bf16.gmra.mrb[44].mxu1 %v5367_v62  ;;  %v873_v61 = vld [vmem:[%s5861_s11 + $0x3a0] sm:$0xff]  ;;  %v874_v62 = vld [vmem:[%s5861_s11 + $0x3a8] sm:$0xff] }
  0xe3   : > { %4677 = vmatprep.mubr.msk.bf16.mxu0 %vm1544_vm0, %v5356_v63  ;;  %4709 = vmatprep.mubr.msk.bf16.mxu1 %vm1544_vm0, %v5371_v0  ;;  %v5442_v63 = vld [vmem:[%s5861_s11 + $0x1a0] ss:$8 sps:$4 sm:$0xff]   ;;  %v4643_v0 = vcombine.low %v873_v61, %v874_v62 }
  0xea   : > { %1873 = vmatmul.mubr.bf16.gmra.mrb[48].mxu0 %v5358_v1  ;;  %2129 = vmatmul.mubr.bf16.gmra.mrb[48].mxu1 %v5373_v2  ;;  %v5445_v1 = vld [vmem:[%s5861_s11 + $0x1b4] ss:$8 sps:$4 sm:$0xff]  }
  0xeb   : > { %4678 = vmatprep.mubr.msk.bf16.mxu0 %vm1544_vm0, %v5362_v3  ;;  %4710 = vmatprep.mubr.msk.bf16.mxu1 %vm1544_vm0, %v5377_v4  ;;  %v5458_v2 = vld [vmem:[%s5861_s11 + $0x3b4] ss:$8 sps:$4 sm:$0xff]   ;;  %v6054_v3 = vld [vmem:[%s7371_s2] ss:$0 sm:$0xff] }
  0xec   : > { %v875_v4 = vld [vmem:[%s5861_s11 + $0x3b0] sm:$0xff] }
  0xf2   : > { %1881 = vmatmul.mubr.bf16.gmra.mrb[52].mxu0 %v5364_v5  ;;  %2137 = vmatmul.mubr.bf16.gmra.mrb[52].mxu1 %v5379_v6  ;;  %v876_v5 = vld [vmem:[%s5861_s11 + $0x3b8] sm:$0xff] }
  0xf3   : > { %4679 = vmatprep.mubr.msk.bf16.mxu0 %vm1544_vm0, %v5368_v7  ;;  %4711 = vmatprep.mubr.msk.bf16.mxu1 %vm1544_vm0, %v5383_v8 }
  0xfa   : > { %1889 = vmatmul.mubr.bf16.gmra.mrb[56].mxu0 %v5370_v9  ;;  %2145 = vmatmul.mubr.bf16.gmra.mrb[56].mxu1 %v5385_v10  ;;  %v5447_v10 = vld [vmem:[%s5861_s11 + $0x1b0] ss:$8 sps:$4 sm:$0xff]  }
  0xfb   : > { %4680 = vmatprep.mubr.msk.bf16.mxu0 %vm1544_vm0, %v5374_v11  ;;  %4712 = vmatprep.mubr.msk.bf16.mxu1 %vm1544_vm0, %v5389_v12  ;;  %v4645_v12 = vcombine.low %v875_v4, %v876_v5  ;;  %v5470_v5 = vld [vmem:[%s5861_s11 + $0x3e4] ss:$8 sps:$4 sm:$0xff]  }
 0x102   : > { %1897 = vmatmul.mubr.bf16.gmra.mrb[60].mxu0 %v5376_v13  ;;  %2153 = vmatmul.mubr.bf16.gmra.mrb[60].mxu1 %v5391_v14  ;;  %v5450_v14 = vld [vmem:[%s5861_s11 + $0x1c4] ss:$8 sps:$4 sm:$0xff]  }
 0x103   : > { %4681 = vmatprep.mubr.msk.bf16.mxu0 %vm1544_vm0, %v5380_v15  ;;  %4713 = vmatprep.mubr.msk.bf16.mxu1 %vm1544_vm0, %v5395_v16  ;;  %v5463_v16 = vld [vmem:[%s5861_s11 + $0x3c4] ss:$8 sps:$4 sm:$0xff]  }
 0x10a   : > { %1905 = vmatmul.mubr.bf16.gmra.mrb[64].mxu0 %v5382_v17  ;;  %2161 = vmatmul.mubr.bf16.gmra.mrb[64].mxu1 %v5397_v18 }
 0x10b   : > { %4682 = vmatprep.mubr.msk.bf16.mxu0 %vm1544_vm0, %v5386_v19  ;;  %4714 = vmatprep.mubr.msk.bf16.mxu1 %vm1544_vm0, %v5401_v20 }
 0x112   : > { %1913 = vmatmul.mubr.bf16.gmra.mrb[68].mxu0 %v5388_v21  ;;  %2169 = vmatmul.mubr.bf16.gmra.mrb[68].mxu1 %v5403_v22  ;;  %v877_v22 = vld [vmem:[%s5861_s11 + $0x3c0] sm:$0xff] }
 0x113   : > { %4683 = vmatprep.mubr.msk.bf16.mxu0 %vm1544_vm0, %v5392_v23  ;;  %4715 = vmatprep.mubr.msk.bf16.mxu1 %vm1544_vm0, %v5407_v24  ;;  %v878_v23 = vld [vmem:[%s5861_s11 + $0x3c8] sm:$0xff]  ;;  %v7373_v24 = vmov 0.0  }
 0x11a   : > { %1921 = vmatmul.mubr.bf16.gmra.mrb[72].mxu0 %v5394_v25  ;;  %2177 = vmatmul.mubr.bf16.gmra.mrb[72].mxu1 %v5409_v26 }
 0x11b   : > { %4684 = vmatprep.mubr.msk.bf16.mxu0 %vm1544_vm0, %v5398_v27  ;;  %4716 = vmatprep.mubr.msk.bf16.mxu1 %vm1544_vm0, %v5413_v28 }
 0x122   : > { %1929 = vmatmul.mubr.bf16.gmra.mrb[76].mxu0 %v5400_v29  ;;  %2185 = vmatmul.mubr.bf16.gmra.mrb[76].mxu1 %v5415_v30 }
 0x123   : > { %4685 = vmatprep.mubr.msk.bf16.mxu0 %vm1544_vm0, %v5404_v31  ;;  %4717 = vmatprep.mubr.msk.bf16.mxu1 %vm1544_vm0, %v5419_v32  ;;  %v4647_v31 = vcombine.low %v877_v22, %v878_v23 }
 0x12a   : > { %1937 = vmatmul.mubr.bf16.gmra.mrb[80].mxu0 %v5406_v33  ;;  %2193 = vmatmul.mubr.bf16.gmra.mrb[80].mxu1 %v5421_v34 }
 0x12b   : > { %4686 = vmatprep.mubr.msk.bf16.mxu0 %vm1544_vm0, %v5410_v35  ;;  %4718 = vmatprep.mubr.msk.bf16.mxu1 %vm1544_vm0, %v5425_v36 }
 0x132   : > { %1945 = vmatmul.mubr.bf16.gmra.mrb[84].mxu0 %v5412_v37  ;;  %2201 = vmatmul.mubr.bf16.gmra.mrb[84].mxu1 %v5427_v38  ;;  %v5452_v37 = vld [vmem:[%s5861_s11 + $0x1c0] ss:$8 sps:$4 sm:$0xff]  }
 0x133   : > { %4687 = vmatprep.mubr.msk.bf16.mxu0 %vm1544_vm0, %v5416_v39  ;;  %4719 = vmatprep.mubr.msk.bf16.mxu1 %vm1544_vm0, %v5431_v40  ;;  %v5455_v40 = vld [vmem:[%s5861_s11 + $0x1d4] ss:$8 sps:$4 sm:$0xff]  }
 0x13a   : > { %1953 = vmatmul.mubr.bf16.gmra.mrb[88].mxu0 %v5418_v41  ;;  %2209 = vmatmul.mubr.bf16.gmra.mrb[88].mxu1 %v5433_v42  ;;  %v5468_v42 = vld [vmem:[%s5861_s11 + $0x3d4] ss:$8 sps:$4 sm:$0xff]  }
 0x13b   : > { %4688 = vmatprep.mubr.msk.bf16.mxu0 %vm1544_vm0, %v5422_v43  ;;  %4720 = vmatprep.mubr.msk.bf16.mxu1 %vm1544_vm0, %v5437_v44 }
 0x142   : > { %1961 = vmatmul.mubr.bf16.gmra.mrb[92].mxu0 %v5424_v45  ;;  %2217 = vmatmul.mubr.bf16.gmra.mrb[92].mxu1 %v5439_v46 }
 0x143   : > { %4689 = vmatprep.mubr.msk.bf16.mxu0 %vm1544_vm0, %v5428_v47  ;;  %4721 = vmatprep.mubr.msk.bf16.mxu1 %vm1544_vm0, %v5443_v48 }
 0x14a   : > { %1969 = vmatmul.mubr.bf16.gmra.mrb[96].mxu0 %v5430_v51  ;;  %2225 = vmatmul.mubr.bf16.gmra.mrb[96].mxu1 %v4639_v52 }
 0x14b   : > { %4690 = vmatprep.mubr.msk.bf16.mxu0 %vm1544_vm0, %v5434_v53  ;;  %4722 = vmatprep.mubr.msk.bf16.mxu1 %vm1544_vm0, %v5448_v54 }
 0x152   : > { %1977 = vmatmul.mubr.bf16.gmra.mrb[100].mxu0 %v5436_v57  ;;  %2233 = vmatmul.mubr.bf16.gmra.mrb[100].mxu1 %v4641_v58  ;;  %v4649_v57 = vcombine.low %v879_v49, %v880_v50 }
 0x153   : > { %4691 = vmatprep.mubr.msk.bf16.mxu0 %vm1544_vm0, %v5440_v59  ;;  %4723 = vmatprep.mubr.msk.bf16.mxu1 %vm1544_vm0, %v5453_v60 }
 0x15a   : > { %1985 = vmatmul.mubr.bf16.gmra.mrb[104].mxu0 %v5442_v63  ;;  %2241 = vmatmul.mubr.bf16.gmra.mrb[104].mxu1 %v4643_v0  ;;  %v5457_v63 = vld [vmem:[%s5861_s11 + $0x1d0] ss:$8 sps:$4 sm:$0xff]  }
 0x15b   : > { %4692 = vmatprep.mubr.msk.bf16.mxu0 %vm1544_vm0, %v5445_v1  ;;  %4724 = vmatprep.mubr.msk.bf16.mxu1 %vm1544_vm0, %v5458_v2  ;;  %v5460_v2 = vld [vmem:[%s5861_s11 + $0x1e4] ss:$8 sps:$4 sm:$0xff]  }
 0x15d   : > { %v1778_v6 = vpop.f32.mrb[0].mxu0  ;;  %v6060_v7 = vpop.f32.mrb[0].mxu1 }
 0x15e   : > { %v1779_v8 = vadd.f32 %v6054_v3, %v1778_v6  ;;  %v1780_v9 = vpop.f32.mrb[1].mxu0  ;;  %v2036_v11 = vpop.f32.mrb[1].mxu1 }
 0x15f   : > { %v1781_v13 = vpop.f32.mrb[2].mxu0  ;;  %v6065_v15 = vpop.f32.mrb[2].mxu1 }
 0x160   : > { %v2289_v17 = vmul.f32 0.5, %v1779_v8  ;;  %v1782_v18 = vadd.f32 %v6054_v3, %v1781_v13  ;;  %v1783_v19 = vpop.f32.mrb[3].mxu0  ;;  %v2039_v20 = vpop.f32.mrb[3].mxu1  ;;  %v881_v13 = vld [vmem:[%s5861_s11 + $0x3e0] sm:$0xff] }
 0x162   : > { %vm2353_vm3 = vcmp.ge.f32.partialorder %v2289_v17, 1.0  ;;  %v2290_v21 = vmul.f32 0.5, %v1782_v18  ;;  %1993 = vmatmul.mubr.bf16.gmra.mrb[108].mxu0 %v5447_v10  ;;  %2249 = vmatmul.mubr.bf16.gmra.mrb[108].mxu1 %v4645_v12 }
 0x163   : > { %v4729_v25 = vsel %vm2353_vm3, 1.0, %v7373_v24  ;;  %4693 = vmatprep.mubr.msk.bf16.mxu0 %vm1544_vm0, %v5450_v14  ;;  %4725 = vmatprep.mubr.msk.bf16.mxu1 %vm1544_vm0, %v5463_v16  ;;  %v882_v14 = vld [vmem:[%s5861_s11 + $0x3e8] sm:$0xff] }
 0x164   : > { %v2449_v26 = vsub.f32 1.0, %v4729_v25  ;;  %v5088_v27 = vpack.c.bf16 %v4729_v25, %v4729_v25  ;;  %vm2354_vm5 = vcmp.ge.f32.partialorder %v2290_v21, 1.0  ;;  %v4651_v22 = vcombine.low %v881_v13, %v882_v14 }
 0x165   : > { %v4730_v28 = vsel %vm2354_vm5, 1.0, %v7373_v24  ;;  %v1786_v29 = vpop.f32.mrb[4].mxu0  ;;  %v6077_v30 = vpop.f32.mrb[4].mxu1 }
 0x166   : > { %v6079_v32 = vmul.f32 %v2449_v26, %v2289_v17  ;;  %2642 = vst.msk [vmem:[%s6081_s12] sm:$0xf] %vm2641_vm4, %v5088_v27  ;;  %v2450_v33 = vsub.f32 1.0, %v4730_v28  ;;  %v5089_v34 = vpack.c.bf16 %v4730_v28, %v4730_v28  ;;  %v1787_v35 = vadd.f32 %v6054_v3, %v1786_v29  ;;  %v1788_v36 = vpop.f32.mrb[5].mxu0  ;;  %v2044_v38 = vpop.f32.mrb[5].mxu1 }
 0x167   : > { %v1789_v39 = vpop.f32.mrb[6].mxu0  ;;  %v6088_v41 = vpop.f32.mrb[6].mxu1  ;;  %v5462_v29 = vld [vmem:[%s5861_s11 + $0x1e0] ss:$8 sps:$4 sm:$0xff]   ;;  %v5472_v36 = vld [vmem:[%s5861_s11 + $0x3f4] ss:$8 sps:$4 sm:$0xff]  }
 0x168   : > { %v6091_v43 = vmul.f32 %v2450_v33, %v2290_v21  ;;  %2643 = vst.msk [vmem:[%s6081_s12 + $0x4] sm:$0xf] %vm2641_vm4, %v5089_v34  ;;  %v2291_v44 = vmul.f32 0.5, %v1787_v35  ;;  %v1790_v45 = vadd.f32 %v6054_v3, %v1789_v39  ;;  %v1791_v46 = vpop.f32.mrb[7].mxu0  ;;  %v2047_v47 = vpop.f32.mrb[7].mxu1 }
 0x169   : > { %v5465_v34 = vld [vmem:[%s5861_s11 + $0x1f4] ss:$8 sps:$4 sm:$0xff]  }
 0x16a   : > { %vm2355_vm6 = vcmp.ge.f32.partialorder %v2291_v44, 1.0  ;;  %v2292_v48 = vmul.f32 0.5, %v1790_v45  ;;  %2001 = vmatmul.mubr.bf16.gmra.mrb[112].mxu0 %v5452_v37  ;;  %2257 = vmatmul.mubr.bf16.gmra.mrb[112].mxu1 %v4647_v31  ;;  %v883_v45 = vld [vmem:[%s5861_s11 + $0x3f0] sm:$0xff]  ;;  %v884_v46 = vld [vmem:[%s5861_s11 + $0x3f8] sm:$0xff] }
 0x16b   : > { %v4731_v51 = vsel %vm2355_vm6, 1.0, %v7373_v24  ;;  %4694 = vmatprep.mubr.msk.bf16.mxu0 %vm1544_vm0, %v5455_v40  ;;  %4726 = vmatprep.mubr.msk.bf16.mxu1 %vm1544_vm0, %v5468_v42 }
 0x16c   : > { %v2451_v52 = vsub.f32 1.0, %v4731_v51  ;;  %v5090_v53 = vpack.c.bf16 %v4731_v51, %v4731_v51  ;;  %vm2356_vm7 = vcmp.ge.f32.partialorder %v2292_v48, 1.0 }
 0x16d   : > { %v4732_v54 = vsel %vm2356_vm7, 1.0, %v7373_v24  ;;  %v1794_v55 = vpop.f32.mrb[8].mxu0  ;;  %v6102_v56 = vpop.f32.mrb[8].mxu1 }
 0x16e   : > { %v6104_v58 = vmul.f32 %v2451_v52, %v2291_v44  ;;  %2644 = vst.msk [vmem:[%s6081_s12 + $0x8] sm:$0xf] %vm2641_vm4, %v5090_v53  ;;  %v2452_v59 = vsub.f32 1.0, %v4732_v54  ;;  %v5091_v60 = vpack.c.bf16 %v4732_v54, %v4732_v54  ;;  %v1795_v61 = vadd.f32 %v6054_v3, %v1794_v55  ;;  %v1796_v62 = vpop.f32.mrb[9].mxu0  ;;  %v2052_v0 = vpop.f32.mrb[9].mxu1 }
 0x16f   : > { %v1797_v1 = vpop.f32.mrb[10].mxu0  ;;  %v6111_v4 = vpop.f32.mrb[10].mxu1  ;;  %v4653_v53 = vcombine.low %v883_v45, %v884_v46 }
 0x170   : > { %v6114_v6 = vmul.f32 %v2452_v59, %v2292_v48  ;;  %2645 = vst.msk [vmem:[%s6081_s12 + $0xc] sm:$0xf] %vm2641_vm4, %v5091_v60  ;;  %v2293_v8 = vmul.f32 0.5, %v1795_v61  ;;  %v1798_v9 = vadd.f32 %v6054_v3, %v1797_v1  ;;  %v1799_v10 = vpop.f32.mrb[11].mxu0  ;;  %v2055_v11 = vpop.f32.mrb[11].mxu1 }
 0x171   : > { %v5467_v61 = vld [vmem:[%s5861_s11 + $0x1f0] ss:$8 sps:$4 sm:$0xff]  }
 0x172   : > { %vm2357_vm8 = vcmp.ge.f32.partialorder %v2293_v8, 1.0  ;;  %v2294_v12 = vmul.f32 0.5, %v1798_v9  ;;  %2009 = vmatmul.mubr.bf16.gmra.mrb[116].mxu0 %v5457_v63  ;;  %2265 = vmatmul.mubr.bf16.gmra.mrb[116].mxu1 %v4649_v57 }
 0x173   : > { %v4733_v16 = vsel %vm2357_vm8, 1.0, %v7373_v24  ;;  %4695 = vmatprep.mubr.msk.bf16.mxu0 %vm1544_vm0, %v5460_v2  ;;  %4727 = vmatprep.mubr.msk.bf16.mxu1 %vm1544_vm0, %v5470_v5 }
 0x174   : > { %v2453_v17 = vsub.f32 1.0, %v4733_v16  ;;  %v5092_v18 = vpack.c.bf16 %v4733_v16, %v4733_v16  ;;  %vm2358_vm9 = vcmp.ge.f32.partialorder %v2294_v12, 1.0 }
 0x175   : > { %v4734_v19 = vsel %vm2358_vm9, 1.0, %v7373_v24  ;;  %v1802_v20 = vpop.f32.mrb[12].mxu0  ;;  %v6125_v21 = vpop.f32.mrb[12].mxu1 }
 0x176   : > { %v6127_v23 = vmul.f32 %v2453_v17, %v2293_v8  ;;  %2646 = vst.msk [vmem:[%s6081_s12 + $0x10] sm:$0xf] %vm2641_vm4, %v5092_v18  ;;  %v2454_v25 = vsub.f32 1.0, %v4734_v19  ;;  %v5093_v26 = vpack.c.bf16 %v4734_v19, %v4734_v19  ;;  %v1803_v27 = vadd.f32 %v6054_v3, %v1802_v20  ;;  %v1804_v28 = vpop.f32.mrb[13].mxu0  ;;  %v2060_v31 = vpop.f32.mrb[13].mxu1 }
 0x177   : > { %v1805_v33 = vpop.f32.mrb[14].mxu0  ;;  %v6134_v35 = vpop.f32.mrb[14].mxu1 }
 0x178   : > { %v6137_v37 = vmul.f32 %v2454_v25, %v2294_v12  ;;  %2647 = vst.msk [vmem:[%s6081_s12 + $0x14] sm:$0xf] %vm2641_vm4, %v5093_v26  ;;  %v2295_v38 = vmul.f32 0.5, %v1803_v27  ;;  %v1806_v39 = vadd.f32 %v6054_v3, %v1805_v33  ;;  %v1807_v40 = vpop.f32.mrb[15].mxu0  ;;  %v2063_v42 = vpop.f32.mrb[15].mxu1 }
 0x17a   : > { %vm2359_vm10 = vcmp.ge.f32.partialorder %v2295_v38, 1.0  ;;  %v2296_v44 = vmul.f32 0.5, %v1806_v39  ;;  %2017 = vmatmul.mubr.bf16.gmra.mrb[120].mxu0 %v5462_v29  ;;  %2273 = vmatmul.mubr.bf16.gmra.mrb[120].mxu1 %v4651_v22 }
 0x17b   : > { %v4735_v47 = vsel %vm2359_vm10, 1.0, %v7373_v24  ;;  %4696 = vmatprep.mubr.msk.bf16.mxu0 %vm1544_vm0, %v5465_v34  ;;  %4728 = vmatprep.mubr.msk.bf16.mxu1 %vm1544_vm0, %v5472_v36 }
 0x17c   : > { %v2455_v48 = vsub.f32 1.0, %v4735_v47  ;;  %v5094_v49 = vpack.c.bf16 %v4735_v47, %v4735_v47  ;;  %vm2360_vm11 = vcmp.ge.f32.partialorder %v2296_v44, 1.0 }
 0x17d   : > { %v4736_v50 = vsel %vm2360_vm11, 1.0, %v7373_v24  ;;  %v1810_v51 = vpop.f32.mrb[16].mxu0  ;;  %v6148_v52 = vpop.f32.mrb[16].mxu1 }
 0x17e   : > { %v6150_v54 = vmul.f32 %v2455_v48, %v2295_v38  ;;  %2648 = vst.msk [vmem:[%s6081_s12 + $0x18] sm:$0xf] %vm2641_vm4, %v5094_v49  ;;  %v2456_v55 = vsub.f32 1.0, %v4736_v50  ;;  %v5095_v57 = vpack.c.bf16 %v4736_v50, %v4736_v50  ;;  %v1811_v59 = vadd.f32 %v6054_v3, %v1810_v51  ;;  %v1812_v60 = vpop.f32.mrb[17].mxu0  ;;  %v2068_v62 = vpop.f32.mrb[17].mxu1 }
 0x17f   : > { %v1813_v63 = vpop.f32.mrb[18].mxu0  ;;  %v6156_v0 = vpop.f32.mrb[18].mxu1 }
 0x180   : > { %v6158_v1 = vmul.f32 %v2456_v55, %v2296_v44  ;;  %2649 = vst.msk [vmem:[%s6081_s12 + $0x1c] sm:$0xf] %vm2641_vm4, %v5095_v57  ;;  %v2297_v2 = vmul.f32 0.5, %v1811_v59  ;;  %v1814_v5 = vadd.f32 %v6054_v3, %v1813_v63  ;;  %v1815_v8 = vpop.f32.mrb[19].mxu0  ;;  %v2071_v9 = vpop.f32.mrb[19].mxu1 }
 0x182   : > { %vm2361_vm12 = vcmp.ge.f32.partialorder %v2297_v2, 1.0  ;;  %v2298_v10 = vmul.f32 0.5, %v1814_v5  ;;  %2025 = vmatmul.mubr.bf16.gmra.mrb[124].mxu0 %v5467_v61  ;;  %2281 = vmatmul.mubr.bf16.gmra.mrb[124].mxu1 %v4653_v53 }
 0x183   : > { %v4737_v11 = vsel %vm2361_vm12, 1.0, %v7373_v24 }
 0x184   : > { %v2457_v12 = vsub.f32 1.0, %v4737_v11  ;;  %v5096_v13 = vpack.c.bf16 %v4737_v11, %v4737_v11  ;;  %vm2362_vm13 = vcmp.ge.f32.partialorder %v2298_v10, 1.0 }
 0x185   : > { %v4738_v14 = vsel %vm2362_vm13, 1.0, %v7373_v24  ;;  %v1818_v16 = vpop.f32.mrb[20].mxu0  ;;  %v6165_v17 = vpop.f32.mrb[20].mxu1 }
 0x186   : > { %v6167_v18 = vmul.f32 %v2457_v12, %v2297_v2  ;;  %2650 = vst.msk [vmem:[%s6081_s12 + $0x20] sm:$0xf] %vm2641_vm4, %v5096_v13  ;;  %v2458_v19 = vsub.f32 1.0, %v4738_v14  ;;  %v5097_v20 = vpack.c.bf16 %v4738_v14, %v4738_v14  ;;  %v1819_v22 = vadd.f32 %v6054_v3, %v1818_v16  ;;  %v1820_v25 = vpop.f32.mrb[21].mxu0  ;;  %v2076_v26 = vpop.f32.mrb[21].mxu1 }
 0x187   : > { %v1821_v27 = vpop.f32.mrb[22].mxu0  ;;  %v6172_v28 = vpop.f32.mrb[22].mxu1 }
 0x188   : > { %v6174_v29 = vmul.f32 %v2458_v19, %v2298_v10  ;;  %2651 = vst.msk [vmem:[%s6081_s12 + $0x24] sm:$0xf] %vm2641_vm4, %v5097_v20  ;;  %v2299_v31 = vmul.f32 0.5, %v1819_v22  ;;  %v1822_v33 = vadd.f32 %v6054_v3, %v1821_v27  ;;  %v1823_v34 = vpop.f32.mrb[23].mxu0  ;;  %v2079_v36 = vpop.f32.mrb[23].mxu1 }
 0x18a   : > { %vm2363_vm14 = vcmp.ge.f32.partialorder %v2299_v31, 1.0  ;;  %v2300_v38 = vmul.f32 0.5, %v1822_v33 }
 0x18b   : > { %v4739_v39 = vsel %vm2363_vm14, 1.0, %v7373_v24 }
 0x18c   : > { %v2459_v40 = vsub.f32 1.0, %v4739_v39  ;;  %v5098_v42 = vpack.c.bf16 %v4739_v39, %v4739_v39  ;;  %vm2364_vm15 = vcmp.ge.f32.partialorder %v2300_v38, 1.0 }
 0x18d   : > { %v4740_v44 = vsel %vm2364_vm15, 1.0, %v7373_v24  ;;  %v1826_v45 = vpop.f32.mrb[24].mxu0  ;;  %v6181_v46 = vpop.f32.mrb[24].mxu1 }
 0x18e   : > { %v6183_v47 = vmul.f32 %v2459_v40, %v2299_v31  ;;  %2652 = vst.msk [vmem:[%s6081_s12 + $0x28] sm:$0xf] %vm2641_vm4, %v5098_v42  ;;  %v2460_v48 = vsub.f32 1.0, %v4740_v44  ;;  %v5099_v49 = vpack.c.bf16 %v4740_v44, %v4740_v44  ;;  %v1827_v50 = vadd.f32 %v6054_v3, %v1826_v45  ;;  %v1828_v51 = vpop.f32.mrb[25].mxu0  ;;  %v2084_v53 = vpop.f32.mrb[25].mxu1 }
 0x18f   : > { %v1829_v55 = vpop.f32.mrb[26].mxu0  ;;  %v6188_v57 = vpop.f32.mrb[26].mxu1 }
 0x190   : > { %v6190_v59 = vmul.f32 %v2460_v48, %v2300_v38  ;;  %2653 = vst.msk [vmem:[%s6081_s12 + $0x2c] sm:$0xf] %vm2641_vm4, %v5099_v49  ;;  %v2301_v60 = vmul.f32 0.5, %v1827_v50  ;;  %v1830_v61 = vadd.f32 %v6054_v3, %v1829_v55  ;;  %v1831_v62 = vpop.f32.mrb[27].mxu0  ;;  %v2087_v63 = vpop.f32.mrb[27].mxu1 }
 0x192   : > { %vm2365_vm0 = vcmp.ge.f32.partialorder %v2301_v60, 1.0  ;;  %v2302_v2 = vmul.f32 0.5, %v1830_v61 }
 0x193   : > { %v4741_v5 = vsel %vm2365_vm0, 1.0, %v7373_v24 }
 0x194   : > { %v2461_v8 = vsub.f32 1.0, %v4741_v5  ;;  %v5100_v9 = vpack.c.bf16 %v4741_v5, %v4741_v5  ;;  %vm2366_vm1 = vcmp.ge.f32.partialorder %v2302_v2, 1.0 }
 0x195   : > { %v4742_v10 = vsel %vm2366_vm1, 1.0, %v7373_v24  ;;  %v1834_v11 = vpop.f32.mrb[28].mxu0  ;;  %v6197_v12 = vpop.f32.mrb[28].mxu1 }
 0x196   : > { %v6199_v13 = vmul.f32 %v2461_v8, %v2301_v60  ;;  %2654 = vst.msk [vmem:[%s6081_s12 + $0x30] sm:$0xf] %vm2641_vm4, %v5100_v9  ;;  %v2462_v14 = vsub.f32 1.0, %v4742_v10  ;;  %v5101_v16 = vpack.c.bf16 %v4742_v10, %v4742_v10  ;;  %v1835_v19 = vadd.f32 %v6054_v3, %v1834_v11  ;;  %v1836_v20 = vpop.f32.mrb[29].mxu0  ;;  %v2092_v22 = vpop.f32.mrb[29].mxu1 }
 0x197   : > { %v1837_v25 = vpop.f32.mrb[30].mxu0  ;;  %v6204_v26 = vpop.f32.mrb[30].mxu1 }
 0x198   : > { %v6206_v27 = vmul.f32 %v2462_v14, %v2302_v2  ;;  %2655 = vst.msk [vmem:[%s6081_s12 + $0x34] sm:$0xf] %vm2641_vm4, %v5101_v16  ;;  %v2303_v31 = vmul.f32 0.5, %v1835_v19  ;;  %v1838_v33 = vadd.f32 %v6054_v3, %v1837_v25  ;;  %v1839_v34 = vpop.f32.mrb[31].mxu0  ;;  %v2095_v36 = vpop.f32.mrb[31].mxu1 }
 0x19a   : > { %vm2367_vm2 = vcmp.ge.f32.partialorder %v2303_v31, 1.0  ;;  %v2304_v38 = vmul.f32 0.5, %v1838_v33 }
 0x19b   : > { %v4743_v39 = vsel %vm2367_vm2, 1.0, %v7373_v24 }
 0x19c   : > { %v2463_v40 = vsub.f32 1.0, %v4743_v39  ;;  %v5102_v42 = vpack.c.bf16 %v4743_v39, %v4743_v39  ;;  %vm2368_vm3 = vcmp.ge.f32.partialorder %v2304_v38, 1.0 }
 0x19d   : > { %v4744_v44 = vsel %vm2368_vm3, 1.0, %v7373_v24  ;;  %v1842_v45 = vpop.f32.mrb[32].mxu0  ;;  %v6213_v48 = vpop.f32.mrb[32].mxu1 }
 0x19e   : > { %v6215_v49 = vmul.f32 %v2463_v40, %v2303_v31  ;;  %2656 = vst.msk [vmem:[%s6081_s12 + $0x38] sm:$0xf] %vm2641_vm4, %v5102_v42  ;;  %v2464_v50 = vsub.f32 1.0, %v4744_v44  ;;  %v5103_v51 = vpack.c.bf16 %v4744_v44, %v4744_v44  ;;  %v1843_v53 = vadd.f32 %v6054_v3, %v1842_v45  ;;  %v1844_v55 = vpop.f32.mrb[33].mxu0  ;;  %v2100_v60 = vpop.f32.mrb[33].mxu1 }
 0x19f   : > { %v1845_v61 = vpop.f32.mrb[34].mxu0  ;;  %v6220_v62 = vpop.f32.mrb[34].mxu1 }
 0x1a0   : > { %7394 = vst [vmem:[#allocation4_spill] sm:$0xff] %v6215_v49  ;;  %v6222_v63 = vmul.f32 %v2464_v50, %v2304_v38  ;;  %2657 = vst.msk [vmem:[%s6081_s12 + $0x3c] sm:$0xf] %vm2641_vm4, %v5103_v51  ;;  %v2305_v2 = vmul.f32 0.5, %v1843_v53  ;;  %v1846_v5 = vadd.f32 %v6054_v3, %v1845_v61  ;;  %v1847_v8 = vpop.f32.mrb[35].mxu0  ;;  %v2103_v9 = vpop.f32.mrb[35].mxu1 }
 0x1a2   : > { %7395 = vst [vmem:[#allocation5_spill] sm:$0xff] %v6222_v63  ;;  %vm2369_vm5 = vcmp.ge.f32.partialorder %v2305_v2, 1.0  ;;  %v2306_v10 = vmul.f32 0.5, %v1846_v5 }
 0x1a3   : > { %v4745_v11 = vsel %vm2369_vm5, 1.0, %v7373_v24 }
 0x1a4   : > { %v2465_v14 = vsub.f32 1.0, %v4745_v11  ;;  %v5104_v16 = vpack.c.bf16 %v4745_v11, %v4745_v11  ;;  %vm2370_vm6 = vcmp.ge.f32.partialorder %v2306_v10, 1.0 }
 0x1a5   : > { %v4746_v19 = vsel %vm2370_vm6, 1.0, %v7373_v24  ;;  %v1850_v20 = vpop.f32.mrb[36].mxu0  ;;  %v6229_v22 = vpop.f32.mrb[36].mxu1 }
 0x1a6   : > { %v6231_v25 = vmul.f32 %v2465_v14, %v2305_v2  ;;  %2658 = vst.msk [vmem:[%s6081_s12 + $0x40] sm:$0xf] %vm2641_vm4, %v5104_v16  ;;  %v2466_v31 = vsub.f32 1.0, %v4746_v19  ;;  %v5105_v33 = vpack.c.bf16 %v4746_v19, %v4746_v19  ;;  %v1851_v34 = vadd.f32 %v6054_v3, %v1850_v20  ;;  %v1852_v36 = vpop.f32.mrb[37].mxu0  ;;  %v2108_v38 = vpop.f32.mrb[37].mxu1 }
 0x1a7   : > { %v1853_v39 = vpop.f32.mrb[38].mxu0  ;;  %v6236_v40 = vpop.f32.mrb[38].mxu1 }
 0x1a8   : > { %7396 = vst [vmem:[#allocation6_spill] sm:$0xff] %v6231_v25  ;;  %v6238_v42 = vmul.f32 %v2466_v31, %v2306_v10  ;;  %2659 = vst.msk [vmem:[%s6081_s12 + $0x44] sm:$0xf] %vm2641_vm4, %v5105_v33  ;;  %v2307_v44 = vmul.f32 0.5, %v1851_v34  ;;  %v1854_v45 = vadd.f32 %v6054_v3, %v1853_v39  ;;  %v1855_v50 = vpop.f32.mrb[39].mxu0  ;;  %v2111_v51 = vpop.f32.mrb[39].mxu1 }
 0x1aa   : > { %7397 = vst [vmem:[#allocation7_spill] sm:$0xff] %v6238_v42  ;;  %vm2371_vm7 = vcmp.ge.f32.partialorder %v2307_v44, 1.0  ;;  %v2308_v53 = vmul.f32 0.5, %v1854_v45 }
 0x1ab   : > { %v4747_v55 = vsel %vm2371_vm7, 1.0, %v7373_v24 }
 0x1ac   : > { %v2467_v60 = vsub.f32 1.0, %v4747_v55  ;;  %v5106_v61 = vpack.c.bf16 %v4747_v55, %v4747_v55  ;;  %vm2372_vm8 = vcmp.ge.f32.partialorder %v2308_v53, 1.0 }
 0x1ad   : > { %v4748_v2 = vsel %vm2372_vm8, 1.0, %v7373_v24  ;;  %v1858_v5 = vpop.f32.mrb[40].mxu0  ;;  %v6245_v8 = vpop.f32.mrb[40].mxu1 }
 0x1ae   : > { %v6247_v9 = vmul.f32 %v2467_v60, %v2307_v44  ;;  %2660 = vst.msk [vmem:[%s6081_s12 + $0x48] sm:$0xf] %vm2641_vm4, %v5106_v61  ;;  %v2468_v10 = vsub.f32 1.0, %v4748_v2  ;;  %v5107_v11 = vpack.c.bf16 %v4748_v2, %v4748_v2  ;;  %v1859_v14 = vadd.f32 %v6054_v3, %v1858_v5  ;;  %v1860_v16 = vpop.f32.mrb[41].mxu0  ;;  %v2116_v19 = vpop.f32.mrb[41].mxu1 }
 0x1af   : > { %v1861_v20 = vpop.f32.mrb[42].mxu0  ;;  %v6252_v31 = vpop.f32.mrb[42].mxu1 }
 0x1b0   : > { %7398 = vst [vmem:[#allocation8_spill] sm:$0xff] %v6247_v9  ;;  %v6254_v33 = vmul.f32 %v2468_v10, %v2308_v53  ;;  %2661 = vst.msk [vmem:[%s6081_s12 + $0x4c] sm:$0xf] %vm2641_vm4, %v5107_v11  ;;  %v2309_v34 = vmul.f32 0.5, %v1859_v14  ;;  %v1862_v36 = vadd.f32 %v6054_v3, %v1861_v20  ;;  %v1863_v38 = vpop.f32.mrb[43].mxu0  ;;  %v2119_v39 = vpop.f32.mrb[43].mxu1 }
 0x1b2   : > { %7399 = vst [vmem:[#allocation9_spill] sm:$0xff] %v6254_v33  ;;  %vm2373_vm9 = vcmp.ge.f32.partialorder %v2309_v34, 1.0  ;;  %v2310_v44 = vmul.f32 0.5, %v1862_v36 }
 0x1b3   : > { %v4749_v45 = vsel %vm2373_vm9, 1.0, %v7373_v24 }
 0x1b4   : > { %v2469_v50 = vsub.f32 1.0, %v4749_v45  ;;  %v5108_v51 = vpack.c.bf16 %v4749_v45, %v4749_v45  ;;  %vm2374_vm10 = vcmp.ge.f32.partialorder %v2310_v44, 1.0 }
 0x1b5   : > { %v4750_v55 = vsel %vm2374_vm10, 1.0, %v7373_v24  ;;  %v1866_v53 = vpop.f32.mrb[44].mxu0  ;;  %v6261_v60 = vpop.f32.mrb[44].mxu1 }
 0x1b6   : > { %v6263_v61 = vmul.f32 %v2469_v50, %v2309_v34  ;;  %2662 = vst.msk [vmem:[%s6081_s12 + $0x50] sm:$0xf] %vm2641_vm4, %v5108_v51  ;;  %v2470_v2 = vsub.f32 1.0, %v4750_v55  ;;  %v5109_v5 = vpack.c.bf16 %v4750_v55, %v4750_v55  ;;  %v1867_v10 = vadd.f32 %v6054_v3, %v1866_v53  ;;  %v1868_v11 = vpop.f32.mrb[45].mxu0  ;;  %v2124_v14 = vpop.f32.mrb[45].mxu1 }
 0x1b7   : > { %v1869_v16 = vpop.f32.mrb[46].mxu0  ;;  %v6268_v19 = vpop.f32.mrb[46].mxu1 }
 0x1b8   : > { %7400 = vst [vmem:[#allocation10_spill] sm:$0xff] %v6263_v61  ;;  %v6270_v20 = vmul.f32 %v2470_v2, %v2310_v44  ;;  %2663 = vst.msk [vmem:[%s6081_s12 + $0x54] sm:$0xf] %vm2641_vm4, %v5109_v5  ;;  %v2311_v36 = vmul.f32 0.5, %v1867_v10  ;;  %v1870_v34 = vadd.f32 %v6054_v3, %v1869_v16  ;;  %v1871_v38 = vpop.f32.mrb[47].mxu0  ;;  %v2127_v39 = vpop.f32.mrb[47].mxu1 }
 0x1ba   : > { %7401 = vst [vmem:[#allocation11_spill] sm:$0xff] %v6270_v20  ;;  %vm2375_vm11 = vcmp.ge.f32.partialorder %v2311_v36, 1.0  ;;  %v2312_v45 = vmul.f32 0.5, %v1870_v34 }
 0x1bb   : > { %v4751_v50 = vsel %vm2375_vm11, 1.0, %v7373_v24 }
 0x1bc   : > { %v2471_v51 = vsub.f32 1.0, %v4751_v50  ;;  %v5110_v55 = vpack.c.bf16 %v4751_v50, %v4751_v50  ;;  %vm2376_vm12 = vcmp.ge.f32.partialorder %v2312_v45, 1.0 }
 0x1bd   : > { %v4752_v53 = vsel %vm2376_vm12, 1.0, %v7373_v24  ;;  %v1874_v44 = vpop.f32.mrb[48].mxu0  ;;  %v6277_v2 = vpop.f32.mrb[48].mxu1 }
 0x1be   : > { %v6279_v11 = vmul.f32 %v2471_v51, %v2311_v36  ;;  %2664 = vst.msk [vmem:[%s6081_s12 + $0x58] sm:$0xf] %vm2641_vm4, %v5110_v55  ;;  %v2472_v5 = vsub.f32 1.0, %v4752_v53  ;;  %v5111_v10 = vpack.c.bf16 %v4752_v53, %v4752_v53  ;;  %v1875_v14 = vadd.f32 %v6054_v3, %v1874_v44  ;;  %v1876_v16 = vpop.f32.mrb[49].mxu0  ;;  %v2132_v34 = vpop.f32.mrb[49].mxu1 }
 0x1bf   : > { %v1877_v38 = vpop.f32.mrb[50].mxu0  ;;  %v6284_v39 = vpop.f32.mrb[50].mxu1  ;;  %v7404_v53 = vmov 0.0  }
 0x1c0   : > { %7402 = vst [vmem:[#allocation12_spill] sm:$0xff] %v6279_v11  ;;  %v6286_v50 = vmul.f32 %v2472_v5, %v2312_v45  ;;  %2665 = vst.msk [vmem:[%s6081_s12 + $0x5c] sm:$0xf] %vm2641_vm4, %v5111_v10  ;;  %v2313_v24 = vmul.f32 0.5, %v1875_v14  ;;  %v1878_v36 = vadd.f32 %v6054_v3, %v1877_v38  ;;  %v1879_v51 = vpop.f32.mrb[51].mxu0  ;;  %v2135_v11 = vpop.f32.mrb[51].mxu1 }
 0x1c2   : > { %7403 = vst [vmem:[#allocation13_spill] sm:$0xff] %v6286_v50  ;;  %vm2377_vm13 = vcmp.ge.f32.partialorder %v2313_v24, 1.0  ;;  %v2314_v55 = vmul.f32 0.5, %v1878_v36 }
 0x1c3   : > { %v4753_v20 = vsel %vm2377_vm13, 1.0, %v7404_v53 }
 0x1c4   : > { %v2473_v44 = vsub.f32 1.0, %v4753_v20  ;;  %v5112_v16 = vpack.c.bf16 %v4753_v20, %v4753_v20  ;;  %vm2378_vm14 = vcmp.ge.f32.partialorder %v2314_v55, 1.0 }
 0x1c5   : > { %v4754_v34 = vsel %vm2378_vm14, 1.0, %v7404_v53  ;;  %v1882_v45 = vpop.f32.mrb[52].mxu0  ;;  %v6293_v5 = vpop.f32.mrb[52].mxu1 }
 0x1c6   : > { %v6295_v50 = vmul.f32 %v2473_v44, %v2313_v24  ;;  %2666 = vst.msk [vmem:[%s6081_s12 + $0x60] sm:$0xf] %vm2641_vm4, %v5112_v16  ;;  %v2474_v10 = vsub.f32 1.0, %v4754_v34  ;;  %v5113_v14 = vpack.c.bf16 %v4754_v34, %v4754_v34  ;;  %v1883_v11 = vadd.f32 %v6054_v3, %v1882_v45  ;;  %v1884_v38 = vpop.f32.mrb[53].mxu0  ;;  %v2140_v36 = vpop.f32.mrb[53].mxu1 }
 0x1c7   : > { %v1885_v51 = vpop.f32.mrb[54].mxu0  ;;  %v6300_v61 = vpop.f32.mrb[54].mxu1 }
 0x1c8   : > { %7405 = vst [vmem:[#allocation14_spill] sm:$0xff] %v6295_v50  ;;  %v6302_v20 = vmul.f32 %v2474_v10, %v2314_v55  ;;  %2667 = vst.msk [vmem:[%s6081_s12 + $0x64] sm:$0xf] %vm2641_vm4, %v5113_v14  ;;  %v2315_v33 = vmul.f32 0.5, %v1883_v11  ;;  %v1886_v24 = vadd.f32 %v6054_v3, %v1885_v51  ;;  %v1887_v44 = vpop.f32.mrb[55].mxu0  ;;  %v2143_v50 = vpop.f32.mrb[55].mxu1 }
 0x1ca   : > { %7406 = vst [vmem:[#allocation15_spill] sm:$0xff] %v6302_v20  ;;  %vm2379_vm15 = vcmp.ge.f32.partialorder %v2315_v33, 1.0  ;;  %v2316_v16 = vmul.f32 0.5, %v1886_v24 }
 0x1cb   : > { %v4755_v34 = vsel %vm2379_vm15, 1.0, %v7404_v53 }
 0x1cc   : > { %v2475_v45 = vsub.f32 1.0, %v4755_v34  ;;  %v5114_v38 = vpack.c.bf16 %v4755_v34, %v4755_v34  ;;  %vm2380_vm0 = vcmp.ge.f32.partialorder %v2316_v16, 1.0 }
 0x1cd   : > { %v4756_v36 = vsel %vm2380_vm0, 1.0, %v7404_v53  ;;  %v1890_v55 = vpop.f32.mrb[56].mxu0  ;;  %v6309_v10 = vpop.f32.mrb[56].mxu1 }
 0x1ce   : > { %v6311_v20 = vmul.f32 %v2475_v45, %v2315_v33  ;;  %2668 = vst.msk [vmem:[%s6081_s12 + $0x68] sm:$0xf] %vm2641_vm4, %v5114_v38  ;;  %v2476_v14 = vsub.f32 1.0, %v4756_v36  ;;  %v5115_v11 = vpack.c.bf16 %v4756_v36, %v4756_v36  ;;  %v1891_v50 = vadd.f32 %v6054_v3, %v1890_v55  ;;  %v1892_v51 = vpop.f32.mrb[57].mxu0  ;;  %v2148_v24 = vpop.f32.mrb[57].mxu1 }
 0x1cf   : > { %v1893_v44 = vpop.f32.mrb[58].mxu0  ;;  %v6316_v9 = vpop.f32.mrb[58].mxu1 }
 0x1d0   : > { %7407 = vst [vmem:[#allocation16_spill] sm:$0xff] %v6311_v20  ;;  %v6318_v34 = vmul.f32 %v2476_v14, %v2316_v16  ;;  %2669 = vst.msk [vmem:[%s6081_s12 + $0x6c] sm:$0xf] %vm2641_vm4, %v5115_v11  ;;  %v2317_v42 = vmul.f32 0.5, %v1891_v50  ;;  %v1894_v33 = vadd.f32 %v6054_v3, %v1893_v44  ;;  %v1895_v45 = vpop.f32.mrb[59].mxu0  ;;  %v2151_v20 = vpop.f32.mrb[59].mxu1 }
 0x1d2   : > { %7408 = vst [vmem:[#allocation17_spill] sm:$0xff] %v6318_v34  ;;  %vm2381_vm1 = vcmp.ge.f32.partialorder %v2317_v42, 1.0  ;;  %v2318_v38 = vmul.f32 0.5, %v1894_v33 }
 0x1d3   : > { %v4757_v36 = vsel %vm2381_vm1, 1.0, %v7404_v53 }
 0x1d4   : > { %v2477_v55 = vsub.f32 1.0, %v4757_v36  ;;  %v5116_v51 = vpack.c.bf16 %v4757_v36, %v4757_v36  ;;  %vm2382_vm2 = vcmp.ge.f32.partialorder %v2318_v38, 1.0 }
 0x1d5   : > { %v4758_v24 = vsel %vm2382_vm2, 1.0, %v7404_v53  ;;  %v1898_v16 = vpop.f32.mrb[60].mxu0  ;;  %v6325_v14 = vpop.f32.mrb[60].mxu1 }
 0x1d6   : > { %v6327_v34 = vmul.f32 %v2477_v55, %v2317_v42  ;;  %2670 = vst.msk [vmem:[%s6081_s12 + $0x70] sm:$0xf] %vm2641_vm4, %v5116_v51  ;;  %v2478_v11 = vsub.f32 1.0, %v4758_v24  ;;  %v5117_v50 = vpack.c.bf16 %v4758_v24, %v4758_v24  ;;  %v1899_v20 = vadd.f32 %v6054_v3, %v1898_v16  ;;  %v1900_v44 = vpop.f32.mrb[61].mxu0  ;;  %v2156_v33 = vpop.f32.mrb[61].mxu1 }
 0x1d7   : > { %v1901_v45 = vpop.f32.mrb[62].mxu0  ;;  %v6332_v25 = vpop.f32.mrb[62].mxu1 }
 0x1d8   : > { %7409 = vst [vmem:[#allocation18_spill] sm:$0xff] %v6327_v34  ;;  %v6334_v36 = vmul.f32 %v2478_v11, %v2318_v38  ;;  %2671 = vst.msk [vmem:[%s6081_s12 + $0x74] sm:$0xf] %vm2641_vm4, %v5117_v50  ;;  %v2319_v63 = vmul.f32 0.5, %v1899_v20  ;;  %v1902_v42 = vadd.f32 %v6054_v3, %v1901_v45  ;;  %v1903_v55 = vpop.f32.mrb[63].mxu0  ;;  %v2159_v34 = vpop.f32.mrb[63].mxu1 }
 0x1d9   : > { %v6350_v55 = vadd.f32 %v6054_v3, %v6060_v7 }
 0x1da   : > { %7410 = vst [vmem:[#allocation19_spill] sm:$0xff] %v6334_v36  ;;  %vm2383_vm3 = vcmp.ge.f32.partialorder %v2319_v63, 1.0  ;;  %v2320_v51 = vmul.f32 0.5, %v1902_v42 }
 0x1db   : > { %v4759_v24 = vsel %vm2383_vm3, 1.0, %v7404_v53 }
 0x1dc   : > { %v2479_v16 = vsub.f32 1.0, %v4759_v24  ;;  %v5118_v44 = vpack.c.bf16 %v4759_v24, %v4759_v24  ;;  %vm2384_vm5 = vcmp.ge.f32.partialorder %v2320_v51, 1.0  ;;  %v6354_v24 = vadd.f32 %v6054_v3, %v6065_v15 }
 0x1dd   : > { %v4760_v33 = vsel %vm2384_vm5, 1.0, %v7404_v53  ;;  %v1906_v49 = vpop.f32.mrb[64].mxu0  ;;  %v6341_v38 = vpop.f32.mrb[64].mxu1 }
 0x1de   : > { %v6343_v11 = vmul.f32 %v2479_v16, %v2319_v63  ;;  %2672 = vst.msk [vmem:[%s6081_s12 + $0x78] sm:$0xf] %vm2641_vm4, %v5118_v44  ;;  %v2480_v50 = vsub.f32 1.0, %v4760_v33  ;;  %v5119_v20 = vpack.c.bf16 %v4760_v33, %v4760_v33  ;;  %v1907_v34 = vadd.f32 %v6054_v3, %v1906_v49  ;;  %v1908_v45 = vpop.f32.mrb[65].mxu0  ;;  %v2164_v42 = vpop.f32.mrb[65].mxu1 }
 0x1df   : > { %v6358_v63 = vadd.f32 %v6054_v3, %v6077_v30  ;;  %v1909_v16 = vpop.f32.mrb[66].mxu0  ;;  %v6360_v44 = vpop.f32.mrb[66].mxu1  ;;  %v6364_v49 = vadd.f32 %v6054_v3, %v6088_v41  ;;  %v6374_v30 = vadd.f32 %v6054_v3, %v6102_v56  ;;  %v6382_v41 = vadd.f32 %v6054_v3, %v6125_v21 }
 0x1e0   : > { %7411 = vst [vmem:[#allocation20_spill] sm:$0xff] %v6343_v11  ;;  %v6366_v33 = vmul.f32 %v2480_v50, %v2320_v51  ;;  %2673 = vst.msk [vmem:[%s6081_s12 + $0x7c] sm:$0xf] %vm2641_vm4, %v5119_v20  ;;  %v2674_v7 = vsub.f32 %v1907_v34, %v6079_v32  ;;  %v1910_v15 = vadd.f32 %v6054_v3, %v1909_v16  ;;  %v1911_v45 = vpop.f32.mrb[67].mxu0  ;;  %v2167_v42 = vpop.f32.mrb[67].mxu1 }
 0x1e1   : > { %v6378_v11 = vadd.f32 %v6054_v3, %v6111_v4  ;;  %v6386_v51 = vadd.f32 %v6054_v3, %v6134_v35  ;;  %v6390_v50 = vadd.f32 %v6054_v3, %v6148_v52  ;;  %v6394_v56 = vadd.f32 %v6054_v3, %v6156_v0 }
 0x1e2   : > { %7412 = vst [vmem:[#allocation21_spill] sm:$0xff] %v6366_v33  ;;  %v2706_v20 = vmul.f32 0.5, %v2674_v7  ;;  %v2675_v4 = vsub.f32 %v1910_v15, %v6091_v43  ;;  %v6399_v34 = vadd.f32 %v6054_v3, %v6165_v17  ;;  %v6403_v21 = vadd.f32 %v6054_v3, %v6172_v28 }
 0x1e3   : > { %v6407_v35 = vadd.f32 %v6054_v3, %v6181_v46  ;;  %v6411_v52 = vadd.f32 %v6054_v3, %v6188_v57  ;;  %v6415_v0 = vadd.f32 %v6054_v3, %v6197_v12  ;;  %v6419_v17 = vadd.f32 %v6054_v3, %v6204_v26 }
 0x1e4   : > { %v2738_v16 = vadd.f32 %v2706_v20, %v6079_v32  ;;  %v2707_v28 = vmul.f32 0.5, %v2675_v4  ;;  %v6424_v7 = vadd.f32 %v6054_v3, %v6213_v48  ;;  %v6428_v46 = vadd.f32 %v6054_v3, %v6220_v62 }
 0x1e5   : > { %v6432_v57 = vadd.f32 %v6054_v3, %v6229_v22  ;;  %v6436_v12 = vadd.f32 %v6054_v3, %v6236_v40  ;;  %v1914_v26 = vpop.f32.mrb[68].mxu0  ;;  %v2170_v15 = vpop.f32.mrb[68].mxu1  ;;  %v6440_v32 = vadd.f32 %v6054_v3, %v6245_v8  ;;  %v6446_v22 = vadd.f32 %v6054_v3, %v6252_v31 }
 0x1e6   : > { %vm2770_vm6 = vcmp.ge.f32.partialorder %v2738_v16, 1.0  ;;  %v2739_v48 = vadd.f32 %v2707_v28, %v6091_v43  ;;  %v1915_v62 = vadd.f32 %v6054_v3, %v1914_v26  ;;  %v1916_v45 = vpop.f32.mrb[69].mxu0  ;;  %v2172_v42 = vpop.f32.mrb[69].mxu1  ;;  %v6450_v40 = vadd.f32 %v6054_v3, %v6261_v60 }
 0x1e7   : > { %v6454_v8 = vadd.f32 %v6054_v3, %v6268_v19  ;;  %v4793_v20 = vsel %vm2770_vm6, 1.0, %v7404_v53  ;;  %v1917_v43 = vpop.f32.mrb[70].mxu0  ;;  %v2173_v4 = vpop.f32.mrb[70].mxu1  ;;  %v6460_v60 = vadd.f32 %v6054_v3, %v6277_v2  ;;  %v6464_v19 = vadd.f32 %v6054_v3, %v6284_v39 }
 0x1e8   : > { %v2866_v28 = vsub.f32 1.0, %v4793_v20  ;;  %v5120_v26 = vpack.c.bf16 %v4793_v20, %v4793_v20  ;;  %vm2771_vm7 = vcmp.ge.f32.partialorder %v2739_v48, 1.0  ;;  %v2676_v45 = vsub.f32 %v1915_v62, %v6104_v58  ;;  %v1919_v31 = vpop.f32.mrb[71].mxu0  ;;  %v2175_v42 = vpop.f32.mrb[71].mxu1 }
 0x1e9   : > { %7413 = vst [vmem:[#allocation22_spill] sm:$0xff] %v6454_v8  ;;  %7414 = vst [vmem:[#allocation23_spill] sm:$0xff] %v6460_v60  ;;  %v4794_v33 = vsel %vm2771_vm7, 1.0, %v7404_v53  ;;  %v1918_v36 = vadd.f32 %v6054_v3, %v1917_v43  ;;  %v6472_v42 = vadd.f32 %v6054_v3, %v6293_v5  ;;  %v6476_v2 = vadd.f32 %v6054_v3, %v6300_v61 }
 0x1ea   : > { %7415 = vst [vmem:[#allocation24_spill] sm:$0xff] %v6464_v19  ;;  %v2898_v8 = vmul.f32 %v2866_v28, %v2738_v16  ;;  %4857 = vst.msk [vmem:[%s6081_s12 + $0x80] sm:$0xf] %vm2641_vm4, %v5120_v26  ;;  %v2867_v20 = vsub.f32 1.0, %v4794_v33  ;;  %v5121_v62 = vpack.c.bf16 %v4794_v33, %v4794_v33  ;;  %v2708_v31 = vmul.f32 0.5, %v2676_v45 }
 0x1eb   : > { %7416 = vst [vmem:[#allocation25_spill] sm:$0xff] %v6472_v42  ;;  %7417 = vst [vmem:[#allocation26_spill] sm:$0xff] %v6476_v2  ;;  %v6480_v39 = vadd.f32 %v6054_v3, %v6309_v10  ;;  %v2677_v43 = vsub.f32 %v1918_v36, %v6114_v6  ;;  %v6487_v33 = vadd.f32 %v6054_v3, %v6316_v9  ;;  %v6498_v10 = vld [vmem:[%s7371_s2] ss:$0 sm:$0xff] }
 0x1ec   : > { %v2899_v16 = vmul.f32 %v2867_v20, %v2739_v48  ;;  %4858 = vst.msk [vmem:[%s6081_s12 + $0x84] sm:$0xf] %vm2641_vm4, %v5121_v62  ;;  %v2740_v5 = vadd.f32 %v2708_v31, %v6104_v58  ;;  %v3091_v28 = vsub.f32 %v6350_v55, %v2898_v8  ;;  %v6493_v61 = vadd.f32 %v6054_v3, %v6325_v14 }
 0x1ed   : > { %7418 = vst [vmem:[#allocation27_spill] sm:$0xff] %v6480_v39  ;;  %7419 = vst [vmem:[#allocation28_spill] sm:$0xff] %v6487_v33  ;;  %v2709_v26 = vmul.f32 0.5, %v2677_v43  ;;  %v6502_v36 = vadd.f32 %v6498_v10, %v6332_v25  ;;  %v1922_v9 = vpop.f32.mrb[72].mxu0  ;;  %v6506_v58 = vadd.f32 %v6498_v10, %v6341_v38  ;;  %v6508_v55 = vpop.f32.mrb[72].mxu1  ;;  %v6516_v38 = vadd.f32 %v6498_v10, %v6360_v44 }
 0x1ee   : > { %7420 = vst [vmem:[#allocation29_spill] sm:$0xff] %v6493_v61  ;;  %vm2772_vm8 = vcmp.ge.f32.partialorder %v2740_v5, 1.0  ;;  %v1923_v3 = vadd.f32 %v6498_v10, %v1922_v9  ;;  %v1924_v14 = vpop.f32.mrb[73].mxu0  ;;  %v3123_v48 = vmul.f32 0.5, %v3091_v28  ;;  %v3092_v45 = vsub.f32 %v6354_v24, %v2899_v16  ;;  %v2180_v20 = vpop.f32.mrb[73].mxu1 }
 0x1ef   : > { %7421 = vst [vmem:[#allocation30_spill] sm:$0xff] %v6502_v36  ;;  %v4795_v62 = vsel %vm2772_vm8, 1.0, %v7404_v53  ;;  %v2741_v25 = vadd.f32 %v2709_v26, %v6114_v6  ;;  %v1925_v31 = vpop.f32.mrb[74].mxu0  ;;  %v6519_v43 = vadd.f32 %v6498_v10, %v2170_v15  ;;  %v6521_v36 = vpop.f32.mrb[74].mxu1  ;;  %v6526_v44 = vadd.f32 %v6498_v10, %v2173_v4 }
 0x1f0   : > { %v2868_v9 = vsub.f32 1.0, %v4795_v62  ;;  %v5122_v28 = vpack.c.bf16 %v4795_v62, %v4795_v62  ;;  %v2678_v24 = vsub.f32 %v1923_v3, %v6127_v23  ;;  %v1926_v14 = vadd.f32 %v6498_v10, %v1925_v31  ;;  %v1927_v20 = vpop.f32.mrb[75].mxu0  ;;  %v2183_v61 = vpop.f32.mrb[75].mxu1 }
 0x1f1   : > { %vm2773_vm9 = vcmp.ge.f32.partialorder %v2741_v25, 1.0  ;;  %v3155_v6 = vadd.f32 %v3123_v48, %v2898_v8  ;;  %v3124_v26 = vmul.f32 0.5, %v3092_v45 }
 0x1f2   : > { %v2900_v33 = vmul.f32 %v2868_v9, %v2740_v5  ;;  %4859 = vst.msk [vmem:[%s6081_s12 + $0x88] sm:$0xf] %vm2641_vm4, %v5122_v28  ;;  %v4796_v15 = vsel %vm2773_vm9, 1.0, %v7404_v53  ;;  %v2710_v39 = vmul.f32 0.5, %v2678_v24  ;;  %v2679_v62 = vsub.f32 %v1926_v14, %v6137_v37 }
 0x1f3   : > { %v2869_v3 = vsub.f32 1.0, %v4796_v15  ;;  %v5123_v2 = vpack.c.bf16 %v4796_v15, %v4796_v15  ;;  %vm3187_vm10 = vcmp.ge.f32.partialorder %v3155_v6, 1.0  ;;  %v3156_v31 = vadd.f32 %v3124_v26, %v2899_v16 }
 0x1f4   : > { %v2742_v61 = vadd.f32 %v2710_v39, %v6127_v23  ;;  %v2711_v8 = vmul.f32 0.5, %v2679_v62  ;;  %v4889_v48 = vsel %vm3187_vm10, 1.0, %v7404_v53  ;;  %v3093_v4 = vsub.f32 %v6358_v63, %v2900_v33 }
 0x1f5   : > { %v6535_v5 = vmul.f32 %v2869_v3, %v2741_v25  ;;  %4860 = vst.msk [vmem:[%s6081_s12 + $0x8c] sm:$0xf] %vm2641_vm4, %v5123_v2  ;;  %v3283_v45 = vsub.f32 1.0, %v4889_v48  ;;  %v5152_v9 = vpack.c.bf16 %v4889_v48, %v4889_v48  ;;  %vm3188_vm11 = vcmp.ge.f32.partialorder %v3156_v31, 1.0  ;;  %v1930_v28 = vpop.f32.mrb[76].mxu0  ;;  %v6539_v24 = vpop.f32.mrb[76].mxu1 }
 0x1f6   : > { %vm2774_vm12 = vcmp.ge.f32.partialorder %v2742_v61, 1.0  ;;  %v2743_v16 = vadd.f32 %v2711_v8, %v6137_v37  ;;  %v4890_v23 = vsel %vm3188_vm11, 1.0, %v7404_v53  ;;  %v1931_v39 = vadd.f32 %v6498_v10, %v1930_v28  ;;  %v1932_v14 = vpop.f32.mrb[77].mxu0  ;;  %v2188_v63 = vpop.f32.mrb[77].mxu1 }
 0x1f7   : > { %v4797_v25 = vsel %vm2774_vm12, 1.0, %v7404_v53  ;;  %v3315_v20 = vmul.f32 %v3283_v45, %v3155_v6  ;;  %4953 = vst.msk [vmem:[%s6081_s12 + $0x100] sm:$0xf] %vm2641_vm4, %v5152_v9  ;;  %v3284_v2 = vsub.f32 1.0, %v4890_v23  ;;  %v5153_v26 = vpack.c.bf16 %v4890_v23, %v4890_v23  ;;  %v1933_v15 = vpop.f32.mrb[78].mxu0  ;;  %v6547_v62 = vpop.f32.mrb[78].mxu1 }
 0x1f8   : > { %v2870_v3 = vsub.f32 1.0, %v4797_v25  ;;  %v5124_v37 = vpack.c.bf16 %v4797_v25, %v4797_v25  ;;  %vm2775_vm13 = vcmp.ge.f32.partialorder %v2743_v16, 1.0  ;;  %v2680_v8 = vsub.f32 %v1931_v39, %v6150_v54  ;;  %v1935_v48 = vpop.f32.mrb[79].mxu0  ;;  %v2191_v28 = vpop.f32.mrb[79].mxu1 }
 0x1f9   : > { %v4798_v14 = vsel %vm2775_vm13, 1.0, %v7404_v53  ;;  %v3508_v6 = vsub.f32 %v6506_v58, %v3315_v20  ;;  %v3316_v45 = vmul.f32 %v3284_v2, %v3156_v31  ;;  %4954 = vst.msk [vmem:[%s6081_s12 + $0x104] sm:$0xf] %vm2641_vm4, %v5153_v26  ;;  %v1934_v9 = vadd.f32 %v6498_v10, %v1933_v15 }
 0x1fa   : > { %v2902_v23 = vmul.f32 %v2870_v3, %v2742_v61  ;;  %4861 = vst.msk [vmem:[%s6081_s12 + $0x90] sm:$0xf] %vm2641_vm4, %v5124_v37  ;;  %v2871_v63 = vsub.f32 1.0, %v4798_v14  ;;  %v5125_v25 = vpack.c.bf16 %v4798_v14, %v4798_v14  ;;  %v2712_v42 = vmul.f32 0.5, %v2680_v8 }
 0x1fb   : > { %v3540_v19 = vmul.f32 0.5, %v3508_v6  ;;  %v3509_v39 = vsub.f32 %v6516_v38, %v3316_v45  ;;  %v2681_v48 = vsub.f32 %v1934_v9, %v6158_v1  ;;  %v3125_v28 = vmul.f32 0.5, %v3093_v4 }
 0x1fc   : > { %v6559_v60 = vmul.f32 %v2871_v63, %v2743_v16  ;;  %4862 = vst.msk [vmem:[%s6081_s12 + $0x94] sm:$0xf] %vm2641_vm4, %v5125_v25  ;;  %v2744_v58 = vadd.f32 %v2712_v42, %v6150_v54  ;;  %v3094_v31 = vsub.f32 %v6364_v49, %v6535_v5  ;;  %v3095_v61 = vsub.f32 %v6374_v30, %v2902_v23 }
 0x1fd   : > { %v3572_v2 = vadd.f32 %v3540_v19, %v3315_v20  ;;  %v3541_v26 = vmul.f32 0.5, %v3509_v39  ;;  %v2713_v15 = vmul.f32 0.5, %v2681_v48  ;;  %v3157_v3 = vadd.f32 %v3125_v28, %v2900_v33  ;;  %v1938_v37 = vpop.f32.mrb[80].mxu0  ;;  %v6567_v38 = vpop.f32.mrb[80].mxu1 }
 0x1fe   : > { %vm2776_vm14 = vcmp.ge.f32.partialorder %v2744_v58, 1.0  ;;  %v3126_v4 = vmul.f32 0.5, %v3094_v31  ;;  %v1939_v16 = vadd.f32 %v6498_v10, %v1938_v37  ;;  %v1940_v8 = vpop.f32.mrb[81].mxu0  ;;  %v3127_v14 = vmul.f32 0.5, %v3095_v61  ;;  %v2196_v6 = vpop.f32.mrb[81].mxu1 }
 0x1ff   : > { %vm3604_vm15 = vcmp.ge.f32.partialorder %v3572_v2, 1.0  ;;  %v3573_v54 = vadd.f32 %v3541_v26, %v3316_v45  ;;  %v4799_v49 = vsel %vm2776_vm14, 1.0, %v7404_v53  ;;  %v6572_v30 = vadd.f32 %v2713_v15, %v6158_v1  ;;  %v1941_v19 = vpop.f32.mrb[82].mxu0  ;;  %v6574_v42 = vpop.f32.mrb[82].mxu1 }
 0x200   : > { %v4985_v33 = vsel %vm3604_vm15, 1.0, %v7404_v53  ;;  %v2872_v20 = vsub.f32 1.0, %v4799_v49  ;;  %v5126_v9 = vpack.c.bf16 %v4799_v49, %v4799_v49  ;;  %vm3189_vm0 = vcmp.ge.f32.partialorder %v3157_v3, 1.0  ;;  %v1943_v63 = vpop.f32.mrb[83].mxu0  ;;  %v2199_v25 = vpop.f32.mrb[83].mxu1 }
 0x201   : > { %v5184_v39 = vpack.c.bf16 %v4985_v33, %v4985_v33  ;;  %vm3605_vm1 = vcmp.ge.f32.partialorder %v3573_v54, 1.0  ;;  %vm2777_vm2 = vcmp.ge.f32.partialorder %v6572_v30, 1.0  ;;  %v4891_v45 = vsel %vm3189_vm0, 1.0, %v7404_v53 }
 0x202   : > { %v4986_v1 = vsel %vm3605_vm1, 1.0, %v7404_v53  ;;  %4863 = vst.msk [vmem:[%s6081_s12 + $0x98] sm:$0xf] %vm2641_vm4, %v5126_v9  ;;  %v6583_v48 = vsel %vm2777_vm2, 1.0, %v7404_v53  ;;  %v3285_v28 = vsub.f32 1.0, %v4891_v45  ;;  %v6587_v31 = vadd.f32 %v6498_v10, %v6508_v55 }
 0x203   : > { %5049 = vst.msk [vmem:[%s6081_s12 + $0x180] sm:$0xf] %vm2641_vm4, %v5184_v39  ;;  %v5185_v61 = vpack.c.bf16 %v4986_v1, %v4986_v1  ;;  %v5127_v2 = vpack.c.bf16 %v6583_v48, %v6583_v48  ;;  %v5154_v26 = vpack.c.bf16 %v4891_v45, %v4891_v45  ;;  %v6595_v15 = vadd.f32 %v6498_v10, %v6521_v36 }
 0x204   : > { %v3317_v37 = vmul.f32 %v3285_v28, %v3157_v3  ;;  %v3158_v8 = vadd.f32 %v3126_v4, %v6535_v5  ;;  %v2682_v6 = vsub.f32 %v1939_v16, %v6167_v18  ;;  %v1942_v54 = vadd.f32 %v6498_v10, %v1941_v19 }
 0x205   : > { %5050 = vst.msk [vmem:[%s6081_s12 + $0x184] sm:$0xf] %vm2641_vm4, %v5185_v61  ;;  %v6602_v55 = vmul.f32 %v2872_v20, %v2744_v58  ;;  %v2873_v49 = vsub.f32 1.0, %v6583_v48  ;;  %4864 = vst.msk [vmem:[%s6081_s12 + $0x9c] sm:$0xf] %vm2641_vm4, %v5127_v2  ;;  %v3159_v33 = vadd.f32 %v3127_v14, %v2902_v23  ;;  %v3096_v36 = vsub.f32 %v6378_v11, %v6559_v60  ;;  %v1946_v3 = vpop.f32.mrb[84].mxu0 }
 0x206   : > { %4955 = vst.msk [vmem:[%s6081_s12 + $0x108] sm:$0xf] %vm2641_vm4, %v5154_v26  ;;  %v6611_v5 = vpop.f32.mrb[84].mxu1  ;;  %v3510_v4 = vsub.f32 %v6519_v43, %v3317_v37  ;;  %vm3190_vm3 = vcmp.ge.f32.partialorder %v3158_v8, 1.0  ;;  %v2714_v16 = vmul.f32 0.5, %v2682_v6  ;;  %v2683_v58 = vsub.f32 %v1942_v54, %v6174_v29  ;;  %v1948_v19 = vpop.f32.mrb[85].mxu0 }
 0x207   : > { %v2204_v20 = vpop.f32.mrb[85].mxu1  ;;  %v4892_v9 = vsel %vm3190_vm3, 1.0, %v7404_v53  ;;  %vm3191_vm5 = vcmp.ge.f32.partialorder %v3159_v33, 1.0  ;;  %v3128_v63 = vmul.f32 0.5, %v3096_v36  ;;  %v1947_v23 = vadd.f32 %v6498_v10, %v1946_v3  ;;  %v1949_v14 = vpop.f32.mrb[86].mxu0 }
 0x208   : > { %v6617_v11 = vpop.f32.mrb[86].mxu1  ;;  %v3542_v25 = vmul.f32 0.5, %v3510_v4  ;;  %v3286_v39 = vsub.f32 1.0, %v4892_v9  ;;  %v5155_v45 = vpack.c.bf16 %v4892_v9, %v4892_v9  ;;  %v2746_v43 = vadd.f32 %v2714_v16, %v6167_v18  ;;  %v1951_v1 = vpop.f32.mrb[87].mxu0 }
 0x209   : > { %v2207_v48 = vpop.f32.mrb[87].mxu1  ;;  %v2715_v28 = vmul.f32 0.5, %v2683_v58  ;;  %v4893_v61 = vsel %vm3191_vm5, 1.0, %v7404_v53  ;;  %v3160_v2 = vadd.f32 %v3128_v63, %v6559_v60  ;;  %v2684_v26 = vsub.f32 %v1947_v23, %v6183_v47 }
 0x20a   : > { %v3574_v6 = vadd.f32 %v3542_v25, %v3317_v37  ;;  %v3318_v54 = vmul.f32 %v3286_v39, %v3158_v8  ;;  %4956 = vst.msk [vmem:[%s6081_s12 + $0x10c] sm:$0xf] %vm2641_vm4, %v5155_v45  ;;  %vm2778_vm6 = vcmp.ge.f32.partialorder %v2746_v43, 1.0  ;;  %v3287_v36 = vsub.f32 1.0, %v4893_v61 }
 0x20b   : > { %v4801_v3 = vsel %vm2778_vm6, 1.0, %v7404_v53  ;;  %v2747_v18 = vadd.f32 %v2715_v28, %v6174_v29  ;;  %v5156_v4 = vpack.c.bf16 %v4893_v61, %v4893_v61  ;;  %vm3192_vm7 = vcmp.ge.f32.partialorder %v3160_v2, 1.0 }
 0x20c   : > { %vm3606_vm8 = vcmp.ge.f32.partialorder %v3574_v6, 1.0  ;;  %v3511_v16 = vsub.f32 %v6526_v44, %v3318_v54  ;;  %v2874_v60 = vsub.f32 1.0, %v4801_v3  ;;  %v5128_v58 = vpack.c.bf16 %v4801_v3, %v4801_v3 }
 0x20d   : > { %v4987_v37 = vsel %vm3606_vm8, 1.0, %v7404_v53  ;;  %vm2779_vm9 = vcmp.ge.f32.partialorder %v2747_v18, 1.0  ;;  %v3319_v8 = vmul.f32 %v3287_v36, %v3159_v33  ;;  %4957 = vst.msk [vmem:[%s6081_s12 + $0x110] sm:$0xf] %vm2641_vm4, %v5156_v4  ;;  %v4894_v19 = vsel %vm3192_vm7, 1.0, %v7404_v53  ;;  %v6632_v20 = vpop.f32.mrb[88].mxu0 }
 0x20e   : > { %v6634_v29 = vpop.f32.mrb[88].mxu1  ;;  %v6637_v9 = vmul.f32 %v2873_v49, %v6572_v30  ;;  %v5186_v63 = vpack.c.bf16 %v4987_v37, %v4987_v37  ;;  %v3543_v44 = vmul.f32 0.5, %v3511_v16  ;;  %4865 = vst.msk [vmem:[%s6081_s12 + $0xa0] sm:$0xf] %vm2641_vm4, %v5128_v58  ;;  %v4802_v23 = vsel %vm2779_vm9, 1.0, %v7404_v53  ;;  %v1956_v25 = vpop.f32.mrb[89].mxu0 }
 0x20f   : > { %v2212_v33 = vpop.f32.mrb[89].mxu1  ;;  %v5129_v39 = vpack.c.bf16 %v4802_v23, %v4802_v23  ;;  %v3512_v45 = vsub.f32 %v6587_v31, %v3319_v8  ;;  %v3288_v1 = vsub.f32 1.0, %v4894_v19  ;;  %v6645_v48 = vadd.f32 %v6498_v10, %v6539_v24  ;;  %v6647_v28 = vpop.f32.mrb[90].mxu0 }
 0x210   : > { %v6649_v30 = vpop.f32.mrb[90].mxu1  ;;  %5051 = vst.msk [vmem:[%s6081_s12 + $0x188] sm:$0xf] %vm2641_vm4, %v5186_v63  ;;  %v3575_v49 = vadd.f32 %v3543_v44, %v3318_v54  ;;  %v5157_v61 = vpack.c.bf16 %v4894_v19, %v4894_v19  ;;  %v2716_v6 = vmul.f32 0.5, %v2684_v26  ;;  %v1950_v36 = vadd.f32 %v6498_v10, %v1949_v14  ;;  %v1959_v3 = vpop.f32.mrb[91].mxu0 }
 0x211   : > { %v2215_v4 = vpop.f32.mrb[91].mxu1  ;;  %v6654_v31 = vmul.f32 %v2874_v60, %v2746_v43  ;;  %4866 = vst.msk [vmem:[%s6081_s12 + $0xa4] sm:$0xf] %vm2641_vm4, %v5129_v39  ;;  %v3544_v24 = vmul.f32 0.5, %v3512_v45  ;;  %v3320_v16 = vmul.f32 %v3288_v1, %v3160_v2  ;;  %v3097_v58 = vsub.f32 %v6382_v41, %v6602_v55 }
 0x212   : > { %vm3607_vm10 = vcmp.ge.f32.partialorder %v3575_v49, 1.0  ;;  %v2875_v37 = vsub.f32 1.0, %v4802_v23  ;;  %4958 = vst.msk [vmem:[%s6081_s12 + $0x114] sm:$0xf] %vm2641_vm4, %v5157_v61  ;;  %v2748_v54 = vadd.f32 %v2716_v6, %v6183_v47  ;;  %v2685_v14 = vsub.f32 %v1950_v36, %v6190_v59 }
 0x213   : > { %v4988_v26 = vsel %vm3607_vm10, 1.0, %v7404_v53  ;;  %v3576_v43 = vadd.f32 %v3544_v24, %v3319_v8  ;;  %v3513_v60 = vsub.f32 %v6595_v15, %v3320_v16  ;;  %v3129_v19 = vmul.f32 0.5, %v3097_v58 }
 0x214   : > { %v5187_v63 = vpack.c.bf16 %v4988_v26, %v4988_v26  ;;  %vm2780_vm11 = vcmp.ge.f32.partialorder %v2748_v54, 1.0  ;;  %v2717_v2 = vmul.f32 0.5, %v2685_v14  ;;  %v3098_v41 = vsub.f32 %v6386_v51, %v6637_v9 }
 0x215   : > { %vm3608_vm12 = vcmp.ge.f32.partialorder %v3576_v43, 1.0  ;;  %v3545_v44 = vmul.f32 0.5, %v3513_v60  ;;  %v4803_v23 = vsel %vm2780_vm11, 1.0, %v7404_v53  ;;  %v3161_v47 = vadd.f32 %v3129_v19, %v6602_v55  ;;  %v6670_v25 = vpop.f32.mrb[92].mxu0  ;;  %v6672_v33 = vpop.f32.mrb[92].mxu1 }
 0x216   : > { %5052 = vst.msk [vmem:[%s6081_s12 + $0x18c] sm:$0xf] %vm2641_vm4, %v5187_v63  ;;  %v6676_v15 = vmul.f32 %v2875_v37, %v2747_v18  ;;  %v4989_v8 = vsel %vm3608_vm12, 1.0, %v7404_v53  ;;  %v5130_v39 = vpack.c.bf16 %v4803_v23, %v4803_v23  ;;  %v2749_v51 = vadd.f32 %v2717_v2, %v6190_v59  ;;  %v1964_v45 = vpop.f32.mrb[93].mxu0  ;;  %v2220_v1 = vpop.f32.mrb[93].mxu1 }
 0x217   : > { %v5188_v49 = vpack.c.bf16 %v4989_v8, %v4989_v8  ;;  %v3577_v61 = vadd.f32 %v3545_v44, %v3320_v16  ;;  %vm3193_vm13 = vcmp.ge.f32.partialorder %v3161_v47, 1.0  ;;  %v3130_v55 = vmul.f32 0.5, %v3098_v41  ;;  %v1965_v6 = vpop.f32.mrb[94].mxu0  ;;  %v6680_v36 = vpop.f32.mrb[94].mxu1 }
 0x218   : > { %v2876_v3 = vsub.f32 1.0, %v4803_v23  ;;  %4867 = vst.msk [vmem:[%s6081_s12 + $0xa8] sm:$0xf] %vm2641_vm4, %v5130_v39  ;;  %vm2781_vm14 = vcmp.ge.f32.partialorder %v2749_v51, 1.0  ;;  %v4895_v18 = vsel %vm3193_vm13, 1.0, %v7404_v53  ;;  %v1955_v59 = vadd.f32 %v6498_v10, %v6632_v20  ;;  %v1967_v4 = vpop.f32.mrb[95].mxu0 }
 0x219   : > { %v2223_v24 = vpop.f32.mrb[95].mxu1  ;;  %5053 = vst.msk [vmem:[%s6081_s12 + $0x190] sm:$0xf] %vm2641_vm4, %v5188_v49  ;;  %vm3609_vm15 = vcmp.ge.f32.partialorder %v3577_v61, 1.0  ;;  %v4804_v16 = vsel %vm2781_vm14, 1.0, %v7404_v53  ;;  %v3289_v58 = vsub.f32 1.0, %v4895_v18  ;;  %v5158_v37 = vpack.c.bf16 %v4895_v18, %v4895_v18 }
 0x21a   : > { %v4990_v14 = vsel %vm3609_vm15, 1.0, %v7404_v53  ;;  %v2877_v26 = vsub.f32 1.0, %v4804_v16  ;;  %v5131_v43 = vpack.c.bf16 %v4804_v16, %v4804_v16  ;;  %v3162_v60 = vadd.f32 %v3130_v55, %v6637_v9 }
 0x21b   : > { %v5189_v19 = vpack.c.bf16 %v4990_v14, %v4990_v14  ;;  %v3321_v63 = vmul.f32 %v3289_v58, %v3161_v47  ;;  %4959 = vst.msk [vmem:[%s6081_s12 + $0x118] sm:$0xf] %vm2641_vm4, %v5158_v37  ;;  %v2686_v20 = vsub.f32 %v1955_v59, %v6199_v13  ;;  %v1958_v2 = vadd.f32 %v6498_v10, %v6647_v28 }
 0x21c   : > { %v6697_v41 = vmul.f32 %v2876_v3, %v2748_v54  ;;  %4868 = vst.msk [vmem:[%s6081_s12 + $0xac] sm:$0xf] %vm2641_vm4, %v5131_v43  ;;  %v2190_v44 = vadd.f32 %v6498_v10, %v6547_v62  ;;  %vm3194_vm0 = vcmp.ge.f32.partialorder %v3162_v60, 1.0  ;;  %v3099_v9 = vsub.f32 %v6390_v50, %v6654_v31 }
 0x21d   : > { %5054 = vst.msk [vmem:[%s6081_s12 + $0x194] sm:$0xf] %vm2641_vm4, %v5189_v19  ;;  %v3514_v23 = vsub.f32 %v6645_v48, %v3321_v63  ;;  %v4896_v47 = vsel %vm3194_vm0, 1.0, %v7404_v53  ;;  %v2718_v8 = vmul.f32 0.5, %v2686_v20  ;;  %v2687_v28 = vsub.f32 %v1958_v2, %v6206_v27  ;;  %v6710_v54 = vpop.f32.mrb[96].mxu0  ;;  %v6712_v39 = vpop.f32.mrb[96].mxu1 }
 0x21e   : > { %v6714_v45 = vmul.f32 %v2877_v26, %v2749_v51  ;;  %v3290_v62 = vsub.f32 1.0, %v4896_v47  ;;  %v5159_v1 = vpack.c.bf16 %v4896_v47, %v4896_v47  ;;  %v3131_v49 = vmul.f32 0.5, %v3099_v9  ;;  %v1972_v50 = vpop.f32.mrb[97].mxu0  ;;  %v2228_v61 = vpop.f32.mrb[97].mxu1  ;;  %v7422_v19 = vld [vmem:[#allocation4_spill] sm:$0xff] }
 0x21f   : > { %v3546_v55 = vmul.f32 0.5, %v3514_v23  ;;  %v2750_v48 = vadd.f32 %v2718_v8, %v6199_v13  ;;  %v2719_v3 = vmul.f32 0.5, %v2687_v28  ;;  %v3100_v18 = vsub.f32 %v6394_v56, %v6676_v15  ;;  %v6719_v59 = vpop.f32.mrb[98].mxu0  ;;  %v6721_v4 = vpop.f32.mrb[98].mxu1 }
 0x220   : > { %v3322_v24 = vmul.f32 %v3290_v62, %v3162_v60  ;;  %4960 = vst.msk [vmem:[%s6081_s12 + $0x11c] sm:$0xf] %vm2641_vm4, %v5159_v1  ;;  %v3163_v51 = vadd.f32 %v3131_v49, %v6654_v31  ;;  %v1963_v16 = vadd.f32 %v6498_v10, %v6670_v25  ;;  %v1966_v58 = vadd.f32 %v6498_v10, %v1965_v6  ;;  %v1975_v37 = vpop.f32.mrb[99].mxu0  ;;  %v2231_v13 = vpop.f32.mrb[99].mxu1 }
 0x221   : > { %v3578_v14 = vadd.f32 %v3546_v55, %v3321_v63  ;;  %vm2782_vm1 = vcmp.ge.f32.partialorder %v2750_v48, 1.0  ;;  %v2751_v56 = vadd.f32 %v2719_v3, %v6206_v27  ;;  %v3132_v26 = vmul.f32 0.5, %v3100_v18  ;;  %v7423_v18 = vld [vmem:[#allocation5_spill] sm:$0xff] }
 0x222   : > { %v3515_v43 = vsub.f32 %v2190_v44, %v3322_v24  ;;  %v4805_v60 = vsel %vm2782_vm1, 1.0, %v7404_v53  ;;  %vm3195_vm2 = vcmp.ge.f32.partialorder %v3163_v51, 1.0  ;;  %v2688_v20 = vsub.f32 %v1963_v16, %v7422_v19 }
 0x223   : > { %vm3610_vm3 = vcmp.ge.f32.partialorder %v3578_v14, 1.0  ;;  %v2878_v31 = vsub.f32 1.0, %v4805_v60  ;;  %v5132_v2 = vpack.c.bf16 %v4805_v60, %v4805_v60  ;;  %vm2783_vm5 = vcmp.ge.f32.partialorder %v2751_v56, 1.0 }
 0x224   : > { %v4991_v25 = vsel %vm3610_vm3, 1.0, %v7404_v53  ;;  %v3547_v6 = vmul.f32 0.5, %v3515_v43  ;;  %v4806_v63 = vsel %vm2783_vm5, 1.0, %v7404_v53  ;;  %v4897_v9 = vsel %vm3195_vm2, 1.0, %v7404_v53 }
 0x225   : > { %v5190_v27 = vpack.c.bf16 %v4991_v25, %v4991_v25  ;;  %4869 = vst.msk [vmem:[%s6081_s12 + $0xb0] sm:$0xf] %vm2641_vm4, %v5132_v2  ;;  %v5133_v44 = vpack.c.bf16 %v4806_v63, %v4806_v63  ;;  %v2195_v23 = vadd.f32 %v6498_v10, %v6567_v38  ;;  %v2198_v47 = vadd.f32 %v6498_v10, %v6574_v42  ;;  %v6741_v8 = vpop.f32.mrb[100].mxu0  ;;  %v6743_v28 = vpop.f32.mrb[100].mxu1 }
 0x226   : > { %v3579_v62 = vadd.f32 %v3547_v6, %v3322_v24  ;;  %v3291_v1 = vsub.f32 1.0, %v4897_v9  ;;  %v5160_v49 = vpack.c.bf16 %v4897_v9, %v4897_v9  ;;  %v3164_v50 = vadd.f32 %v3132_v26, %v6676_v15  ;;  %v1980_v61 = vpop.f32.mrb[101].mxu0  ;;  %v2236_v55 = vpop.f32.mrb[101].mxu1 }
 0x227   : > { %5055 = vst.msk [vmem:[%s6081_s12 + $0x198] sm:$0xf] %vm2641_vm4, %v5190_v27  ;;  %v6748_v3 = vmul.f32 %v2878_v31, %v2750_v48  ;;  %v2879_v38 = vsub.f32 1.0, %v4806_v63  ;;  %4870 = vst.msk [vmem:[%s6081_s12 + $0xb4] sm:$0xf] %vm2641_vm4, %v5133_v44  ;;  %v2720_v42 = vmul.f32 0.5, %v2688_v20  ;;  %v2689_v16 = vsub.f32 %v1966_v58, %v7423_v18 }
 0x228   : > { %v6753_v37 = vpop.f32.mrb[102].mxu0  ;;  %v6755_v24 = vpop.f32.mrb[102].mxu1  ;;  %vm3611_vm6 = vcmp.ge.f32.partialorder %v3579_v62, 1.0  ;;  %v3323_v13 = vmul.f32 %v3291_v1, %v3163_v51  ;;  %4961 = vst.msk [vmem:[%s6081_s12 + $0x120] sm:$0xf] %vm2641_vm4, %v5160_v49  ;;  %vm3196_vm7 = vcmp.ge.f32.partialorder %v3164_v50, 1.0  ;;  %v3101_v15 = vsub.f32 %v6399_v34, %v6697_v41 }
 0x229   : > { %v1983_v48 = vpop.f32.mrb[103].mxu0  ;;  %v2239_v14 = vpop.f32.mrb[103].mxu1  ;;  %v4992_v26 = vsel %vm3611_vm6, 1.0, %v7404_v53  ;;  %v4898_v58 = vsel %vm3196_vm7, 1.0, %v7404_v53  ;;  %v2752_v43 = vadd.f32 %v2720_v42, %v7422_v19  ;;  %v2721_v60 = vmul.f32 0.5, %v2689_v16 }
 0x22a   : > { %v5191_v20 = vpack.c.bf16 %v4992_v26, %v4992_v26  ;;  %v3516_v31 = vsub.f32 %v2195_v23, %v3323_v13  ;;  %v3292_v51 = vsub.f32 1.0, %v4898_v58  ;;  %v5161_v2 = vpack.c.bf16 %v4898_v58, %v4898_v58 }
 0x22b   : > { %v6764_v25 = vmul.f32 %v2879_v38, %v2751_v56  ;;  %vm2784_vm8 = vcmp.ge.f32.partialorder %v2752_v43, 1.0  ;;  %v2753_v6 = vadd.f32 %v2721_v60, %v7423_v18  ;;  %v3133_v34 = vmul.f32 0.5, %v3101_v15 }
 0x22c   : > { %5056 = vst.msk [vmem:[%s6081_s12 + $0x19c] sm:$0xf] %vm2641_vm4, %v5191_v20  ;;  %v3548_v63 = vmul.f32 0.5, %v3516_v31  ;;  %v3324_v9 = vmul.f32 %v3292_v51, %v3164_v50  ;;  %4962 = vst.msk [vmem:[%s6081_s12 + $0x124] sm:$0xf] %vm2641_vm4, %v5161_v2  ;;  %v4807_v19 = vsel %vm2784_vm8, 1.0, %v7404_v53  ;;  %v3102_v27 = vsub.f32 %v6403_v21, %v6714_v45 }
 0x22d   : > { %v5134_v44 = vpack.c.bf16 %v4807_v19, %v4807_v19  ;;  %vm2785_vm9 = vcmp.ge.f32.partialorder %v2753_v6, 1.0  ;;  %v2203_v56 = vadd.f32 %v6498_v10, %v6611_v5  ;;  %v3165_v23 = vadd.f32 %v3133_v34, %v6697_v41  ;;  %v6777_v62 = vpop.f32.mrb[104].mxu0  ;;  %v6779_v1 = vpop.f32.mrb[104].mxu1 }
 0x22e   : > { %v3580_v49 = vadd.f32 %v3548_v63, %v3323_v13  ;;  %v3517_v50 = vsub.f32 %v2198_v47, %v3324_v9  ;;  %v4808_v61 = vsel %vm2785_vm9, 1.0, %v7404_v53  ;;  %v3134_v55 = vmul.f32 0.5, %v3102_v27  ;;  %v1988_v38 = vpop.f32.mrb[105].mxu0  ;;  %v2244_v42 = vpop.f32.mrb[105].mxu1  ;;  %v7424_v27 = vld [vmem:[#allocation6_spill] sm:$0xff] }
 0x22f   : > { %v2880_v21 = vsub.f32 1.0, %v4807_v19  ;;  %4871 = vst.msk [vmem:[%s6081_s12 + $0xb8] sm:$0xf] %vm2641_vm4, %v5134_v44  ;;  %v5135_v18 = vpack.c.bf16 %v4808_v61, %v4808_v61  ;;  %vm3197_vm10 = vcmp.ge.f32.partialorder %v3165_v23, 1.0  ;;  %v2206_v5 = vadd.f32 %v6498_v10, %v6617_v11  ;;  %v6786_v41 = vpop.f32.mrb[106].mxu0  ;;  %v6788_v16 = vpop.f32.mrb[106].mxu1 }
 0x230   : > { %vm3612_vm11 = vcmp.ge.f32.partialorder %v3580_v49, 1.0  ;;  %v3549_v47 = vmul.f32 0.5, %v3517_v50  ;;  %v4899_v13 = vsel %vm3197_vm10, 1.0, %v7404_v53  ;;  %v3166_v15 = vadd.f32 %v3134_v55, %v6714_v45  ;;  %v1991_v48 = vpop.f32.mrb[107].mxu0  ;;  %v2247_v14 = vpop.f32.mrb[107].mxu1  ;;  %v7425_v49 = vld [vmem:[#allocation7_spill] sm:$0xff] }
 0x231   : > { %v4993_v26 = vsel %vm3612_vm11, 1.0, %v7404_v53  ;;  %v2881_v58 = vsub.f32 1.0, %v4808_v61  ;;  %4872 = vst.msk [vmem:[%s6081_s12 + $0xbc] sm:$0xf] %vm2641_vm4, %v5135_v18  ;;  %v3293_v11 = vsub.f32 1.0, %v4899_v13  ;;  %v5162_v60 = vpack.c.bf16 %v4899_v13, %v4899_v13 }
 0x232   : > { %v5192_v20 = vpack.c.bf16 %v4993_v26, %v4993_v26  ;;  %v3581_v31 = vadd.f32 %v3549_v47, %v3324_v9  ;;  %vm3198_vm12 = vcmp.ge.f32.partialorder %v3166_v15, 1.0  ;;  %v1971_v51 = vadd.f32 %v6498_v10, %v6710_v54 }
 0x233   : > { %v6797_v2 = vmul.f32 %v2880_v21, %v2752_v43  ;;  %v3325_v34 = vmul.f32 %v3293_v11, %v3165_v23  ;;  %4963 = vst.msk [vmem:[%s6081_s12 + $0x128] sm:$0xf] %vm2641_vm4, %v5162_v60  ;;  %v4900_v45 = vsel %vm3198_vm12, 1.0, %v7404_v53  ;;  %v1974_v63 = vadd.f32 %v6498_v10, %v6719_v59 }
 0x234   : > { %5057 = vst.msk [vmem:[%s6081_s12 + $0x1a0] sm:$0xf] %vm2641_vm4, %v5192_v20  ;;  %vm3613_vm13 = vcmp.ge.f32.partialorder %v3581_v31, 1.0  ;;  %v3294_v19 = vsub.f32 1.0, %v4900_v45  ;;  %v5163_v9 = vpack.c.bf16 %v4900_v45, %v4900_v45  ;;  %v2690_v44 = vsub.f32 %v1971_v51, %v7424_v27 }
 0x235   : > { %v4994_v54 = vsel %vm3613_vm13, 1.0, %v7404_v53  ;;  %v3518_v43 = vsub.f32 %v2203_v56, %v3325_v34  ;;  %v2691_v23 = vsub.f32 %v1974_v63, %v7425_v49  ;;  %v3103_v50 = vsub.f32 %v6407_v35, %v6748_v3  ;;  %v6811_v61 = vpop.f32.mrb[108].mxu0  ;;  %v6813_v55 = vpop.f32.mrb[108].mxu1 }
 0x236   : > { %v5193_v59 = vpack.c.bf16 %v4994_v54, %v4994_v54  ;;  %v6815_v38 = vmul.f32 %v2881_v58, %v2753_v6  ;;  %v3326_v42 = vmul.f32 %v3294_v19, %v3166_v15  ;;  %4964 = vst.msk [vmem:[%s6081_s12 + $0x12c] sm:$0xf] %vm2641_vm4, %v5163_v9  ;;  %v2722_v21 = vmul.f32 0.5, %v2690_v44  ;;  %v1996_v18 = vpop.f32.mrb[109].mxu0  ;;  %v2252_v47 = vpop.f32.mrb[109].mxu1  ;;  %v7426_v19 = vld [vmem:[#allocation8_spill] sm:$0xff] }
 0x237   : > { %v3550_v56 = vmul.f32 0.5, %v3518_v43  ;;  %v2723_v13 = vmul.f32 0.5, %v2691_v23  ;;  %v3135_v48 = vmul.f32 0.5, %v3103_v50  ;;  %v3104_v35 = vsub.f32 %v6411_v52, %v6764_v25  ;;  %v6821_v14 = vpop.f32.mrb[110].mxu0  ;;  %v6823_v26 = vpop.f32.mrb[110].mxu1  ;;  %v7427_v9 = vld [vmem:[#allocation9_spill] sm:$0xff] }
 0x238   : > { %5058 = vst.msk [vmem:[%s6081_s12 + $0x1a4] sm:$0xf] %vm2641_vm4, %v5193_v59  ;;  %v3519_v6 = vsub.f32 %v2206_v5, %v3326_v42  ;;  %v2754_v15 = vadd.f32 %v2722_v21, %v7424_v27  ;;  %v1979_v58 = vadd.f32 %v6498_v10, %v6741_v8  ;;  %v1982_v11 = vadd.f32 %v6498_v10, %v6753_v37  ;;  %v1999_v60 = vpop.f32.mrb[111].mxu0  ;;  %v2255_v20 = vpop.f32.mrb[111].mxu1 }
 0x239   : > { %v3582_v31 = vadd.f32 %v3550_v56, %v3325_v34  ;;  %v2755_v52 = vadd.f32 %v2723_v13, %v7425_v49  ;;  %v3167_v51 = vadd.f32 %v3135_v48, %v6748_v3  ;;  %v3136_v45 = vmul.f32 0.5, %v3104_v35 }
 0x23a   : > { %v3551_v63 = vmul.f32 0.5, %v3519_v6  ;;  %vm2786_vm14 = vcmp.ge.f32.partialorder %v2754_v15, 1.0  ;;  %v2692_v5 = vsub.f32 %v1979_v58, %v7426_v19  ;;  %v2693_v27 = vsub.f32 %v1982_v11, %v7427_v9 }
 0x23b   : > { %vm3614_vm15 = vcmp.ge.f32.partialorder %v3582_v31, 1.0  ;;  %v4809_v8 = vsel %vm2786_vm14, 1.0, %v7404_v53  ;;  %vm2787_vm0 = vcmp.ge.f32.partialorder %v2755_v52, 1.0  ;;  %vm3199_vm1 = vcmp.ge.f32.partialorder %v3167_v51, 1.0 }
 0x23c   : > { %v4995_v37 = vsel %vm3614_vm15, 1.0, %v7404_v53  ;;  %v3583_v34 = vadd.f32 %v3551_v63, %v3326_v42  ;;  %v5136_v44 = vpack.c.bf16 %v4809_v8, %v4809_v8  ;;  %v2211_v3 = vadd.f32 %v6498_v10, %v6634_v29 }
 0x23d   : > { %v5194_v54 = vpack.c.bf16 %v4995_v37, %v4995_v37  ;;  %v4810_v43 = vsel %vm2787_vm0, 1.0, %v7404_v53  ;;  %v4901_v49 = vsel %vm3199_vm1, 1.0, %v7404_v53  ;;  %v3168_v23 = vadd.f32 %v3136_v45, %v6764_v25  ;;  %v6843_v50 = vpop.f32.mrb[112].mxu0  ;;  %v6845_v59 = vpop.f32.mrb[112].mxu1 }
 0x23e   : > { %vm3615_vm2 = vcmp.ge.f32.partialorder %v3583_v34, 1.0  ;;  %v2882_v21 = vsub.f32 1.0, %v4809_v8  ;;  %4873 = vst.msk [vmem:[%s6081_s12 + $0xc0] sm:$0xf] %vm2641_vm4, %v5136_v44  ;;  %v2883_v42 = vsub.f32 1.0, %v4810_v43  ;;  %v5137_v18 = vpack.c.bf16 %v4810_v43, %v4810_v43  ;;  %v2004_v47 = vpop.f32.mrb[113].mxu0 }
 0x23f   : > { %v2260_v29 = vpop.f32.mrb[113].mxu1  ;;  %5059 = vst.msk [vmem:[%s6081_s12 + $0x1a8] sm:$0xf] %vm2641_vm4, %v5194_v54  ;;  %v4996_v56 = vsel %vm3615_vm2, 1.0, %v7404_v53  ;;  %v3295_v13 = vsub.f32 1.0, %v4901_v49  ;;  %v5164_v25 = vpack.c.bf16 %v4901_v49, %v4901_v49  ;;  %vm3200_vm3 = vcmp.ge.f32.partialorder %v3168_v23, 1.0 }
 0x240   : > { %v6852_v48 = vpop.f32.mrb[114].mxu0  ;;  %v6854_v35 = vpop.f32.mrb[114].mxu1  ;;  %v5195_v6 = vpack.c.bf16 %v4996_v56, %v4996_v56  ;;  %4874 = vst.msk [vmem:[%s6081_s12 + $0xc4] sm:$0xf] %vm2641_vm4, %v5137_v18  ;;  %v2214_v58 = vadd.f32 %v6498_v10, %v6649_v30  ;;  %v4902_v11 = vsel %vm3200_vm3, 1.0, %v7404_v53  ;;  %v2724_v60 = vmul.f32 0.5, %v2692_v5 }
 0x241   : > { %v2007_v20 = vpop.f32.mrb[115].mxu0  ;;  %v2263_v31 = vpop.f32.mrb[115].mxu1  ;;  %v3327_v45 = vmul.f32 %v3295_v13, %v3167_v51  ;;  %4965 = vst.msk [vmem:[%s6081_s12 + $0x130] sm:$0xf] %vm2641_vm4, %v5164_v25  ;;  %v3296_v63 = vsub.f32 1.0, %v4902_v11  ;;  %v5165_v8 = vpack.c.bf16 %v4902_v11, %v4902_v11  ;;  %v2725_v37 = vmul.f32 0.5, %v2693_v27 }
 0x242   : > { %5060 = vst.msk [vmem:[%s6081_s12 + $0x1ac] sm:$0xf] %vm2641_vm4, %v5195_v6  ;;  %v6865_v34 = vmul.f32 %v2882_v21, %v2754_v15  ;;  %v6867_v44 = vmul.f32 %v2883_v42, %v2755_v52  ;;  %v2756_v30 = vadd.f32 %v2724_v60, %v7426_v19  ;;  %v3105_v54 = vsub.f32 %v6415_v0, %v6797_v2 }
 0x243   : > { %v3520_v5 = vsub.f32 %v2211_v3, %v3327_v45  ;;  %v3328_v43 = vmul.f32 %v3296_v63, %v3168_v23  ;;  %4966 = vst.msk [vmem:[%s6081_s12 + $0x134] sm:$0xf] %vm2641_vm4, %v5165_v8  ;;  %v6875_v51 = vadd.f32 %v2725_v37, %v7427_v9  ;;  %v3106_v27 = vsub.f32 %v6419_v17, %v6815_v38 }
 0x244   : > { %vm2788_vm5 = vcmp.ge.f32.partialorder %v2756_v30, 1.0  ;;  %v6881_v15 = vadd.f32 %v6498_v10, %v6672_v33  ;;  %v3137_v52 = vmul.f32 0.5, %v3105_v54  ;;  %v1987_v19 = vadd.f32 %v6498_v10, %v6777_v62 }
 0x245   : > { %v3552_v0 = vmul.f32 0.5, %v3520_v5  ;;  %v3521_v3 = vsub.f32 %v2214_v58, %v3328_v43  ;;  %v4811_v49 = vsel %vm2788_vm5, 1.0, %v7404_v53  ;;  %vm2789_vm6 = vcmp.ge.f32.partialorder %v6875_v51, 1.0  ;;  %v6887_v9 = vpop.f32.mrb[116].mxu0  ;;  %v6889_v23 = vpop.f32.mrb[116].mxu1 }
 0x246   : > { %v5138_v17 = vpack.c.bf16 %v4811_v49, %v4811_v49  ;;  %v4812_v21 = vsel %vm2789_vm6, 1.0, %v7404_v53  ;;  %v3169_v33 = vadd.f32 %v3137_v52, %v6797_v2  ;;  %v6895_v42 = vadd.f32 %v6498_v10, %v6680_v36  ;;  %v2012_v62 = vpop.f32.mrb[117].mxu0  ;;  %v2268_v18 = vpop.f32.mrb[117].mxu1  ;;  %v7428_v36 = vld [vmem:[#allocation10_spill] sm:$0xff] }
 0x247   : > { %v3584_v47 = vadd.f32 %v3552_v0, %v3327_v45  ;;  %v3553_v29 = vmul.f32 0.5, %v3521_v3  ;;  %v5139_v56 = vpack.c.bf16 %v4812_v21, %v4812_v21  ;;  %v1990_v13 = vadd.f32 %v6498_v10, %v6786_v41  ;;  %v6899_v25 = vpop.f32.mrb[118].mxu0  ;;  %v6901_v6 = vpop.f32.mrb[118].mxu1 }
 0x248   : > { %v2884_v58 = vsub.f32 1.0, %v4811_v49  ;;  %4875 = vst.msk [vmem:[%s6081_s12 + $0xc8] sm:$0xf] %vm2641_vm4, %v5138_v17  ;;  %vm3201_vm7 = vcmp.ge.f32.partialorder %v3169_v33, 1.0  ;;  %v3138_v2 = vmul.f32 0.5, %v3106_v27  ;;  %v2694_v11 = vsub.f32 %v1987_v19, %v7428_v36  ;;  %v2015_v60 = vpop.f32.mrb[119].mxu0 }
 0x249   : > { %v2271_v20 = vpop.f32.mrb[119].mxu1  ;;  %vm3616_vm8 = vcmp.ge.f32.partialorder %v3584_v47, 1.0  ;;  %v3585_v31 = vadd.f32 %v3553_v29, %v3328_v43  ;;  %v2885_v45 = vsub.f32 1.0, %v4812_v21  ;;  %4876 = vst.msk [vmem:[%s6081_s12 + $0xcc] sm:$0xf] %vm2641_vm4, %v5139_v56  ;;  %v4903_v10 = vsel %vm3201_vm7, 1.0, %v7404_v53 }
 0x24a   : > { %v4997_v41 = vsel %vm3616_vm8, 1.0, %v7404_v53  ;;  %v3297_v63 = vsub.f32 1.0, %v4903_v10  ;;  %v5166_v8 = vpack.c.bf16 %v4903_v10, %v4903_v10  ;;  %v3170_v37 = vadd.f32 %v3138_v2, %v6815_v38  ;;  %v7429_v27 = vld [vmem:[#allocation11_spill] sm:$0xff] }
 0x24b   : > { %v5196_v54 = vpack.c.bf16 %v4997_v41, %v4997_v41  ;;  %vm3617_vm9 = vcmp.ge.f32.partialorder %v3585_v31, 1.0  ;;  %v2726_v5 = vmul.f32 0.5, %v2694_v11  ;;  %v2695_v52 = vsub.f32 %v1990_v13, %v7429_v27 }
 0x24c   : > { %v4998_v19 = vsel %vm3617_vm9, 1.0, %v7404_v53  ;;  %v6913_v43 = vmul.f32 %v2884_v58, %v2756_v30  ;;  %v3329_v0 = vmul.f32 %v3297_v63, %v3169_v33  ;;  %4967 = vst.msk [vmem:[%s6081_s12 + $0x138] sm:$0xf] %vm2641_vm4, %v5166_v8  ;;  %vm3202_vm10 = vcmp.ge.f32.partialorder %v3170_v37, 1.0 }
 0x24d   : > { %5061 = vst.msk [vmem:[%s6081_s12 + $0x1b0] sm:$0xf] %vm2641_vm4, %v5196_v54  ;;  %v5197_v3 = vpack.c.bf16 %v4998_v19, %v4998_v19  ;;  %v4904_v49 = vsel %vm3202_vm10, 1.0, %v7404_v53  ;;  %v2758_v38 = vadd.f32 %v2726_v5, %v7428_v36  ;;  %v2727_v17 = vmul.f32 0.5, %v2695_v52  ;;  %v6921_v21 = vpop.f32.mrb[120].mxu0  ;;  %v6923_v62 = vpop.f32.mrb[120].mxu1 }
 0x24e   : > { %v3522_v30 = vsub.f32 %v6881_v15, %v3329_v0  ;;  %v3298_v33 = vsub.f32 1.0, %v4904_v49  ;;  %v5167_v18 = vpack.c.bf16 %v4904_v49, %v4904_v49  ;;  %v3107_v47 = vsub.f32 %v6424_v7, %v6865_v34  ;;  %v2020_v29 = vpop.f32.mrb[121].mxu0  ;;  %v2276_v56 = vpop.f32.mrb[121].mxu1 }
 0x24f   : > { %5062 = vst.msk [vmem:[%s6081_s12 + $0x1b4] sm:$0xf] %vm2641_vm4, %v5197_v3  ;;  %v6931_v13 = vmul.f32 %v2885_v45, %v6875_v51  ;;  %vm2790_vm11 = vcmp.ge.f32.partialorder %v2758_v38, 1.0  ;;  %v2759_v58 = vadd.f32 %v2727_v17, %v7429_v27  ;;  %v3108_v2 = vsub.f32 %v6428_v46, %v6867_v44  ;;  %v6936_v36 = vpop.f32.mrb[122].mxu0  ;;  %v6938_v15 = vpop.f32.mrb[122].mxu1  ;;  %v7430_v56 = vld [vmem:[#allocation12_spill] sm:$0xff] }
 0x250   : > { %v3554_v11 = vmul.f32 0.5, %v3522_v30  ;;  %v3330_v60 = vmul.f32 %v3298_v33, %v3170_v37  ;;  %4968 = vst.msk [vmem:[%s6081_s12 + $0x13c] sm:$0xf] %vm2641_vm4, %v5167_v18  ;;  %v4813_v7 = vsel %vm2790_vm11, 1.0, %v7404_v53  ;;  %v3139_v20 = vmul.f32 0.5, %v3107_v47  ;;  %v2023_v51 = vpop.f32.mrb[123].mxu0 }
 0x251   : > { %v2279_v31 = vpop.f32.mrb[123].mxu1  ;;  %v5140_v45 = vpack.c.bf16 %v4813_v7, %v4813_v7  ;;  %vm2791_vm12 = vcmp.ge.f32.partialorder %v2759_v58, 1.0  ;;  %v6946_v46 = vld [vmem:[%s7371_s2] ss:$0 sm:$0xff]  ;;  %v3140_v41 = vmul.f32 0.5, %v3108_v2  ;;  %v2886_v5 = vsub.f32 1.0, %v4813_v7 }
 0x252   : > { %v2227_v10 = vadd.f32 %v6946_v46, %v6712_v39  ;;  %v3586_v63 = vadd.f32 %v3554_v11, %v3329_v0  ;;  %v3523_v8 = vsub.f32 %v6895_v42, %v3330_v60  ;;  %v4814_v37 = vsel %vm2791_vm12, 1.0, %v7404_v53 }
 0x253   : > { %v3171_v54 = vadd.f32 %v3139_v20, %v6865_v34  ;;  %4877 = vst.msk [vmem:[%s6081_s12 + $0xd0] sm:$0xf] %vm2641_vm4, %v5140_v45  ;;  %v5141_v27 = vpack.c.bf16 %v4814_v37, %v4814_v37  ;;  %v2230_v52 = vadd.f32 %v6946_v46, %v6721_v4  ;;  %v3172_v19 = vadd.f32 %v3140_v41, %v6867_v44 }
 0x254   : > { %vm3618_vm13 = vcmp.ge.f32.partialorder %v3586_v63, 1.0  ;;  %v3555_v39 = vmul.f32 0.5, %v3523_v8  ;;  %v1995_v0 = vadd.f32 %v6946_v46, %v6811_v61  ;;  %v2887_v3 = vsub.f32 1.0, %v4814_v37 }
 0x255   : > { %vm3203_vm14 = vcmp.ge.f32.partialorder %v3171_v54, 1.0  ;;  %v4999_v42 = vsel %vm3618_vm13, 1.0, %v7404_v53  ;;  %4878 = vst.msk [vmem:[%s6081_s12 + $0xd4] sm:$0xf] %vm2641_vm4, %v5141_v27  ;;  %vm3204_vm15 = vcmp.ge.f32.partialorder %v3172_v19, 1.0  ;;  %v6964_v49 = vpop.f32.mrb[124].mxu0  ;;  %v6968_v47 = vmul.f32 %v2886_v5, %v2758_v38 }
 0x256   : > { %v4905_v34 = vsel %vm3203_vm14, 1.0, %v7404_v53  ;;  %v6966_v4 = vpop.f32.mrb[124].mxu1  ;;  %v5198_v44 = vpack.c.bf16 %v4999_v42, %v4999_v42  ;;  %v3587_v17 = vadd.f32 %v3555_v39, %v3330_v60  ;;  %v2028_v18 = vpop.f32.mrb[125].mxu0  ;;  %v4906_v29 = vsel %vm3204_vm15, 1.0, %v7404_v53 }
 0x257   : > { %v3299_v30 = vsub.f32 1.0, %v4905_v34  ;;  %v5168_v33 = vpack.c.bf16 %v4905_v34, %v4905_v34  ;;  %v2284_v61 = vpop.f32.mrb[125].mxu1  ;;  %v2696_v2 = vsub.f32 %v1995_v0, %v7430_v56  ;;  %v1998_v11 = vadd.f32 %v6946_v46, %v6821_v14  ;;  %v6974_v7 = vpop.f32.mrb[126].mxu0  ;;  %v7431_v14 = vld [vmem:[#allocation13_spill] sm:$0xff] }
 0x258   : > { %v6976_v20 = vpop.f32.mrb[126].mxu1  ;;  %5063 = vst.msk [vmem:[%s6081_s12 + $0x1b8] sm:$0xf] %vm2641_vm4, %v5198_v44  ;;  %vm3619_vm0 = vcmp.ge.f32.partialorder %v3587_v17, 1.0  ;;  %v3300_v38 = vsub.f32 1.0, %v4906_v29  ;;  %v5169_v51 = vpack.c.bf16 %v4906_v29, %v4906_v29  ;;  %v2031_v31 = vpop.f32.mrb[127].mxu0  ;;  %v3109_v37 = vsub.f32 %v6432_v57, %v6913_v43 }
 0x259   : > { %v3331_v60 = vmul.f32 %v3299_v30, %v3171_v54  ;;  %4969 = vst.msk [vmem:[%s6081_s12 + $0x140] sm:$0xf] %vm2641_vm4, %v5168_v33  ;;  %v2287_v45 = vpop.f32.mrb[127].mxu1  ;;  %v5000_v41 = vsel %vm3619_vm0, 1.0, %v7404_v53  ;;  %v2728_v63 = vmul.f32 0.5, %v2696_v2  ;;  %v2697_v8 = vsub.f32 %v1998_v11, %v7431_v14  ;;  %v7432_v61 = vld [vmem:[#allocation14_spill] sm:$0xff] }
 0x25a   : > { %v5199_v5 = vpack.c.bf16 %v5000_v41, %v5000_v41  ;;  %v6986_v27 = vmul.f32 %v2887_v3, %v2759_v58  ;;  %v3332_v54 = vmul.f32 %v3300_v38, %v3172_v19  ;;  %4970 = vst.msk [vmem:[%s6081_s12 + $0x144] sm:$0xf] %vm2641_vm4, %v5169_v51  ;;  %v3141_v34 = vmul.f32 0.5, %v3109_v37 }
 0x25b   : > { %v3524_v39 = vsub.f32 %v2227_v10, %v3331_v60  ;;  %v2760_v0 = vadd.f32 %v2728_v63, %v7430_v56  ;;  %v2729_v42 = vmul.f32 0.5, %v2697_v8  ;;  %v3110_v44 = vsub.f32 %v6436_v12, %v6931_v13 }
 0x25c   : > { %5064 = vst.msk [vmem:[%s6081_s12 + $0x1bc] sm:$0xf] %vm2641_vm4, %v5199_v5  ;;  %v3525_v30 = vsub.f32 %v2230_v52, %v3332_v54  ;;  %v2003_v57 = vadd.f32 %v6946_v46, %v6843_v50  ;;  %v2006_v58 = vadd.f32 %v6946_v46, %v6852_v48  ;;  %v3173_v19 = vadd.f32 %v3141_v34, %v6913_v43 }
 0x25d   : > { %v3556_v17 = vmul.f32 0.5, %v3524_v39  ;;  %vm2792_vm1 = vcmp.ge.f32.partialorder %v2760_v0, 1.0  ;;  %v2761_v10 = vadd.f32 %v2729_v42, %v7431_v14  ;;  %v3142_v3 = vmul.f32 0.5, %v3110_v44  ;;  %v7433_v39 = vld [vmem:[#allocation15_spill] sm:$0xff] }
 0x25e   : > { %v3557_v18 = vmul.f32 0.5, %v3525_v30  ;;  %v4815_v12 = vsel %vm2792_vm1, 1.0, %v7404_v53  ;;  %v2698_v29 = vsub.f32 %v2003_v57, %v7432_v61  ;;  %vm3205_vm3 = vcmp.ge.f32.partialorder %v3173_v19, 1.0 }
 0x25f   : > { %v3588_v33 = vadd.f32 %v3556_v17, %v3331_v60  ;;  %v2888_v52 = vsub.f32 1.0, %v4815_v12  ;;  %v5142_v56 = vpack.c.bf16 %v4815_v12, %v4815_v12  ;;  %vm2793_vm2 = vcmp.ge.f32.partialorder %v2761_v10, 1.0 }
 0x260   : > { %v3589_v50 = vadd.f32 %v3557_v18, %v3332_v54  ;;  %v4816_v48 = vsel %vm2793_vm2, 1.0, %v7404_v53  ;;  %v4907_v2 = vsel %vm3205_vm3, 1.0, %v7404_v53  ;;  %v2235_v38 = vadd.f32 %v6946_v46, %v6743_v28 }
 0x261   : > { %vm3620_vm5 = vcmp.ge.f32.partialorder %v3588_v33, 1.0  ;;  %4879 = vst.msk [vmem:[%s6081_s12 + $0xd8] sm:$0xf] %vm2641_vm4, %v5142_v56  ;;  %v2889_v11 = vsub.f32 1.0, %v4816_v48  ;;  %v5143_v60 = vpack.c.bf16 %v4816_v48, %v4816_v48  ;;  %v3301_v31 = vsub.f32 1.0, %v4907_v2 }
 0x262   : > { %v5001_v43 = vsel %vm3620_vm5, 1.0, %v7404_v53  ;;  %vm3621_vm6 = vcmp.ge.f32.partialorder %v3589_v50, 1.0  ;;  %v5170_v45 = vpack.c.bf16 %v4907_v2, %v4907_v2  ;;  %v2238_v63 = vadd.f32 %v6946_v46, %v6755_v24 }
 0x263   : > { %v5200_v51 = vpack.c.bf16 %v5001_v43, %v5001_v43  ;;  %v5002_v41 = vsel %vm3621_vm6, 1.0, %v7404_v53  ;;  %4880 = vst.msk [vmem:[%s6081_s12 + $0xdc] sm:$0xf] %vm2641_vm4, %v5143_v60  ;;  %v3174_v14 = vadd.f32 %v3142_v3, %v6931_v13  ;;  %v2730_v8 = vmul.f32 0.5, %v2698_v29 }
 0x264   : > { %v5201_v37 = vpack.c.bf16 %v5002_v41, %v5002_v41  ;;  %v7018_v5 = vmul.f32 %v2888_v52, %v2760_v0  ;;  %v3333_v28 = vmul.f32 %v3301_v31, %v3173_v19  ;;  %4971 = vst.msk [vmem:[%s6081_s12 + $0x148] sm:$0xf] %vm2641_vm4, %v5170_v45  ;;  %v2699_v54 = vsub.f32 %v2006_v58, %v7433_v39 }
 0x265   : > { %5065 = vst.msk [vmem:[%s6081_s12 + $0x1c0] sm:$0xf] %vm2641_vm4, %v5200_v51  ;;  %v7023_v42 = vmul.f32 %v2889_v11, %v2761_v10  ;;  %vm3206_vm7 = vcmp.ge.f32.partialorder %v3174_v14, 1.0  ;;  %v2762_v34 = vadd.f32 %v2730_v8, %v7432_v61  ;;  %v3111_v24 = vsub.f32 %v6440_v32, %v6968_v47  ;;  %v7434_v51 = vld [vmem:[#allocation16_spill] sm:$0xff] }
 0x266   : > { %5066 = vst.msk [vmem:[%s6081_s12 + $0x1c4] sm:$0xf] %vm2641_vm4, %v5201_v37  ;;  %v3526_v13 = vsub.f32 %v2235_v38, %v3333_v28  ;;  %v4908_v0 = vsel %vm3206_vm7, 1.0, %v7404_v53  ;;  %v2731_v44 = vmul.f32 0.5, %v2699_v54  ;;  %v3112_v17 = vsub.f32 %v6446_v22, %v6986_v27  ;;  %v7435_v54 = vld [vmem:[#allocation17_spill] sm:$0xff] }
 0x267   : > { %v3302_v30 = vsub.f32 1.0, %v4908_v0  ;;  %v5171_v57 = vpack.c.bf16 %v4908_v0, %v4908_v0  ;;  %vm2794_vm8 = vcmp.ge.f32.partialorder %v2762_v34, 1.0  ;;  %v3143_v58 = vmul.f32 0.5, %v3111_v24 }
 0x268   : > { %v3558_v10 = vmul.f32 0.5, %v3526_v13  ;;  %v4817_v19 = vsel %vm2794_vm8, 1.0, %v7404_v53  ;;  %v2763_v3 = vadd.f32 %v2731_v44, %v7433_v39  ;;  %v3144_v32 = vmul.f32 0.5, %v3112_v17 }
 0x269   : > { %v3334_v33 = vmul.f32 %v3302_v30, %v3174_v14  ;;  %4972 = vst.msk [vmem:[%s6081_s12 + $0x14c] sm:$0xf] %vm2641_vm4, %v5171_v57  ;;  %v5144_v18 = vpack.c.bf16 %v4817_v19, %v4817_v19  ;;  %v2243_v12 = vadd.f32 %v6946_v46, %v6779_v1  ;;  %v3175_v22 = vadd.f32 %v3143_v58, %v6968_v47 }
 0x26a   : > { %v3590_v61 = vadd.f32 %v3558_v10, %v3333_v28  ;;  %vm2795_vm9 = vcmp.ge.f32.partialorder %v2763_v3, 1.0  ;;  %v3176_v29 = vadd.f32 %v3144_v32, %v6986_v27  ;;  %v2011_v52 = vadd.f32 %v6946_v46, %v6887_v9 }
 0x26b   : > { %v3527_v56 = vsub.f32 %v2238_v63, %v3334_v33  ;;  %4881 = vst.msk [vmem:[%s6081_s12 + $0xe0] sm:$0xf] %vm2641_vm4, %v5144_v18  ;;  %v4818_v50 = vsel %vm2795_vm9, 1.0, %v7404_v53  ;;  %vm3207_vm10 = vcmp.ge.f32.partialorder %v3175_v22, 1.0  ;;  %v2246_v48 = vadd.f32 %v6946_v46, %v6788_v16 }
 0x26c   : > { %vm3622_vm11 = vcmp.ge.f32.partialorder %v3590_v61, 1.0  ;;  %v2890_v1 = vsub.f32 1.0, %v4817_v19  ;;  %v5145_v47 = vpack.c.bf16 %v4818_v50, %v4818_v50  ;;  %v4909_v27 = vsel %vm3207_vm10, 1.0, %v7404_v53  ;;  %v7436_v19 = vld [vmem:[#allocation22_spill] sm:$0xff] }
 0x26d   : > { %v5003_v2 = vsel %vm3622_vm11, 1.0, %v7404_v53  ;;  %v3559_v9 = vmul.f32 0.5, %v3527_v56  ;;  %v3303_v43 = vsub.f32 1.0, %v4909_v27  ;;  %v5172_v11 = vpack.c.bf16 %v4909_v27, %v4909_v27 }
 0x26e   : > { %v5202_v60 = vpack.c.bf16 %v5003_v2, %v5003_v2  ;;  %v2891_v38 = vsub.f32 1.0, %v4818_v50  ;;  %4882 = vst.msk [vmem:[%s6081_s12 + $0xe4] sm:$0xf] %vm2641_vm4, %v5145_v47  ;;  %vm3208_vm12 = vcmp.ge.f32.partialorder %v3176_v29, 1.0  ;;  %v2700_v31 = vsub.f32 %v2011_v52, %v7434_v51 }
 0x26f   : > { %v3591_v16 = vadd.f32 %v3559_v9, %v3334_v33  ;;  %v3335_v45 = vmul.f32 %v3303_v43, %v3175_v22  ;;  %4973 = vst.msk [vmem:[%s6081_s12 + $0x150] sm:$0xf] %vm2641_vm4, %v5172_v11  ;;  %v4910_v41 = vsel %vm3208_vm12, 1.0, %v7404_v53  ;;  %v2014_v63 = vadd.f32 %v6946_v46, %v6899_v25 }
 0x270   : > { %5067 = vst.msk [vmem:[%s6081_s12 + $0x1c8] sm:$0xf] %vm2641_vm4, %v5202_v60  ;;  %v7060_v14 = vmul.f32 %v2890_v1, %v2762_v34  ;;  %v3304_v8 = vsub.f32 1.0, %v4910_v41  ;;  %v5173_v37 = vpack.c.bf16 %v4910_v41, %v4910_v41  ;;  %v2732_v28 = vmul.f32 0.5, %v2700_v31 }
 0x271   : > { %vm3623_vm13 = vcmp.ge.f32.partialorder %v3591_v16, 1.0  ;;  %v3528_v39 = vsub.f32 %v2243_v12, %v3335_v45  ;;  %v2701_v24 = vsub.f32 %v2014_v63, %v7435_v54  ;;  %v3113_v13 = vsub.f32 %v6450_v40, %v7018_v5 }
 0x272   : > { %v5004_v0 = vsel %vm3623_vm13, 1.0, %v7404_v53  ;;  %v7066_v44 = vmul.f32 %v2891_v38, %v2763_v3  ;;  %v3336_v25 = vmul.f32 %v3304_v8, %v3176_v29  ;;  %4974 = vst.msk [vmem:[%s6081_s12 + $0x154] sm:$0xf] %vm2641_vm4, %v5173_v37  ;;  %v2764_v34 = vadd.f32 %v2732_v28, %v7434_v51  ;;  %v7438_v8 = vld [vmem:[#allocation19_spill] sm:$0xff] }
 0x273   : > { %v5203_v17 = vpack.c.bf16 %v5004_v0, %v5004_v0  ;;  %v3560_v30 = vmul.f32 0.5, %v3528_v39  ;;  %v2733_v57 = vmul.f32 0.5, %v2701_v24  ;;  %v3145_v58 = vmul.f32 0.5, %v3113_v13 }
 0x274   : > { %v3529_v10 = vsub.f32 %v2246_v48, %v3336_v25  ;;  %vm2796_vm14 = vcmp.ge.f32.partialorder %v2764_v34, 1.0  ;;  %v3114_v32 = vsub.f32 %v7436_v19, %v7023_v42  ;;  %v2019_v40 = vadd.f32 %v6946_v46, %v6921_v21  ;;  %v7437_v21 = vld [vmem:[#allocation18_spill] sm:$0xff] }
 0x275   : > { %5068 = vst.msk [vmem:[%s6081_s12 + $0x1cc] sm:$0xf] %vm2641_vm4, %v5203_v17  ;;  %v3592_v3 = vadd.f32 %v3560_v30, %v3335_v45  ;;  %v4819_v33 = vsel %vm2796_vm14, 1.0, %v7404_v53  ;;  %v2765_v18 = vadd.f32 %v2733_v57, %v7435_v54  ;;  %v3177_v12 = vadd.f32 %v3145_v58, %v7018_v5 }
 0x276   : > { %v3561_v22 = vmul.f32 0.5, %v3529_v10  ;;  %v5146_v61 = vpack.c.bf16 %v4819_v33, %v4819_v33  ;;  %v2251_v29 = vadd.f32 %v6946_v46, %v6813_v55  ;;  %v3146_v52 = vmul.f32 0.5, %v3114_v32 }
 0x277   : > { %vm3624_vm15 = vcmp.ge.f32.partialorder %v3592_v3, 1.0  ;;  %vm2797_vm0 = vcmp.ge.f32.partialorder %v2765_v18, 1.0  ;;  %vm3209_vm1 = vcmp.ge.f32.partialorder %v3177_v12, 1.0  ;;  %v2702_v56 = vsub.f32 %v2019_v40, %v7437_v21 }
 0x278   : > { %v5005_v50 = vsel %vm3624_vm15, 1.0, %v7404_v53  ;;  %v3593_v48 = vadd.f32 %v3561_v22, %v3336_v25  ;;  %v2892_v1 = vsub.f32 1.0, %v4819_v33  ;;  %4883 = vst.msk [vmem:[%s6081_s12 + $0xe8] sm:$0xf] %vm2641_vm4, %v5146_v61  ;;  %v4820_v5 = vsel %vm2797_vm0, 1.0, %v7404_v53  ;;  %v7440_v25 = vld [vmem:[#allocation24_spill] sm:$0xff] }
 0x279   : > { %v5204_v47 = vpack.c.bf16 %v5005_v50, %v5005_v50  ;;  %v2893_v27 = vsub.f32 1.0, %v4820_v5  ;;  %v5147_v55 = vpack.c.bf16 %v4820_v5, %v4820_v5  ;;  %v4911_v2 = vsel %vm3209_vm1, 1.0, %v7404_v53 }
 0x27a   : > { %vm3625_vm2 = vcmp.ge.f32.partialorder %v3593_v48, 1.0  ;;  %v3305_v9 = vsub.f32 1.0, %v4911_v2  ;;  %v5174_v43 = vpack.c.bf16 %v4911_v2, %v4911_v2  ;;  %v3178_v11 = vadd.f32 %v3146_v52, %v7023_v42  ;;  %v7442_v2 = vld [vmem:[#allocation21_spill] sm:$0xff] }
 0x27b   : > { %5069 = vst.msk [vmem:[%s6081_s12 + $0x1d0] sm:$0xf] %vm2641_vm4, %v5204_v47  ;;  %v5006_v60 = vsel %vm3625_vm2, 1.0, %v7404_v53  ;;  %4884 = vst.msk [vmem:[%s6081_s12 + $0xec] sm:$0xf] %vm2641_vm4, %v5147_v55  ;;  %v2254_v38 = vadd.f32 %v6946_v46, %v6823_v26  ;;  %v2734_v51 = vmul.f32 0.5, %v2702_v56  ;;  %v2022_v31 = vadd.f32 %v6946_v46, %v6936_v36 }
 0x27c   : > { %v5205_v16 = vpack.c.bf16 %v5006_v60, %v5006_v60  ;;  %v7098_v45 = vmul.f32 %v2892_v1, %v2764_v34  ;;  %v3337_v41 = vmul.f32 %v3305_v9, %v3177_v12  ;;  %4975 = vst.msk [vmem:[%s6081_s12 + $0x158] sm:$0xf] %vm2641_vm4, %v5174_v43  ;;  %vm3210_vm3 = vcmp.ge.f32.partialorder %v3178_v11, 1.0  ;;  %v7439_v26 = vld [vmem:[#allocation23_spill] sm:$0xff]  ;;  %v7441_v12 = vld [vmem:[#allocation20_spill] sm:$0xff] }
 0x27d   : > { %v4912_v42 = vsel %vm3210_vm3, 1.0, %v7404_v53  ;;  %v2766_v63 = vadd.f32 %v2734_v51, %v7437_v21  ;;  %v2703_v37 = vsub.f32 %v2022_v31, %v7438_v8  ;;  %v3115_v28 = vsub.f32 %v7439_v26, %v7060_v14 }
 0x27e   : > { %5070 = vst.msk [vmem:[%s6081_s12 + $0x1d4] sm:$0xf] %vm2641_vm4, %v5205_v16  ;;  %v7109_v36 = vmul.f32 %v2893_v27, %v2765_v18  ;;  %v3530_v39 = vsub.f32 %v2251_v29, %v3337_v41  ;;  %v3306_v54 = vsub.f32 1.0, %v4912_v42  ;;  %v5175_v24 = vpack.c.bf16 %v4912_v42, %v4912_v42 }
 0x27f   : > { %vm2798_vm5 = vcmp.ge.f32.partialorder %v2766_v63, 1.0  ;;  %v2735_v13 = vmul.f32 0.5, %v2703_v37  ;;  %v3147_v0 = vmul.f32 0.5, %v3115_v28  ;;  %v3116_v34 = vsub.f32 %v7440_v25, %v7066_v44 }
 0x280   : > { %v3562_v17 = vmul.f32 0.5, %v3530_v39  ;;  %v3338_v30 = vmul.f32 %v3306_v54, %v3178_v11  ;;  %4976 = vst.msk [vmem:[%s6081_s12 + $0x15c] sm:$0xf] %vm2641_vm4, %v5175_v24  ;;  %v4821_v57 = vsel %vm2798_vm5, 1.0, %v7404_v53  ;;  %v2027_v58 = vadd.f32 %v6946_v46, %v6964_v49  ;;  %v7444_v54 = vld [vmem:[#allocation26_spill] sm:$0xff] }
 0x281   : > { %v5148_v10 = vpack.c.bf16 %v4821_v57, %v4821_v57  ;;  %v2767_v19 = vadd.f32 %v2735_v13, %v7438_v8  ;;  %v2259_v32 = vadd.f32 %v6946_v46, %v6845_v59  ;;  %v3179_v40 = vadd.f32 %v3147_v0, %v7060_v14 }
 0x282   : > { %v3594_v3 = vadd.f32 %v3562_v17, %v3337_v41  ;;  %v3531_v33 = vsub.f32 %v2254_v38, %v3338_v30  ;;  %v3148_v18 = vmul.f32 0.5, %v3116_v34  ;;  %v2704_v22 = vsub.f32 %v2027_v58, %v7441_v12 }
 0x283   : > { %v2894_v61 = vsub.f32 1.0, %v4821_v57  ;;  %4885 = vst.msk [vmem:[%s6081_s12 + $0xf0] sm:$0xf] %vm2641_vm4, %v5148_v10  ;;  %vm2799_vm6 = vcmp.ge.f32.partialorder %v2767_v19, 1.0  ;;  %vm3211_vm7 = vcmp.ge.f32.partialorder %v3179_v40, 1.0  ;;  %v2030_v49 = vadd.f32 %v6946_v46, %v6974_v7 }
 0x284   : > { %vm3626_vm8 = vcmp.ge.f32.partialorder %v3594_v3, 1.0  ;;  %v3563_v29 = vmul.f32 0.5, %v3531_v33  ;;  %v4822_v59 = vsel %vm2799_vm6, 1.0, %v7404_v53  ;;  %v4913_v14 = vsel %vm3211_vm7, 1.0, %v7404_v53 }
 0x285   : > { %v5007_v52 = vsel %vm3626_vm8, 1.0, %v7404_v53  ;;  %v5149_v21 = vpack.c.bf16 %v4822_v59, %v4822_v59  ;;  %v3307_v56 = vsub.f32 1.0, %v4913_v14  ;;  %v2262_v50 = vadd.f32 %v6946_v46, %v6854_v35  ;;  %v7443_v35 = vld [vmem:[#allocation25_spill] sm:$0xff] }
 0x286   : > { %v5206_v48 = vpack.c.bf16 %v5007_v52, %v5007_v52  ;;  %v3595_v1 = vadd.f32 %v3563_v29, %v3338_v30  ;;  %v5176_v5 = vpack.c.bf16 %v4913_v14, %v4913_v14  ;;  %v3180_v7 = vadd.f32 %v3148_v18, %v7066_v44  ;;  %v7445_v18 = vld [vmem:[#allocation27_spill] sm:$0xff]  ;;  %v7446_v14 = vld [vmem:[#allocation28_spill] sm:$0xff] }
 0x287   : > { %v2895_v47 = vsub.f32 1.0, %v4822_v59  ;;  %4886 = vst.msk [vmem:[%s6081_s12 + $0xf4] sm:$0xf] %vm2641_vm4, %v5149_v21  ;;  %v3339_v27 = vmul.f32 %v3307_v56, %v3179_v40  ;;  %v2736_v55 = vmul.f32 0.5, %v2704_v22  ;;  %v2705_v9 = vsub.f32 %v2030_v49, %v7442_v2 }
 0x288   : > { %5071 = vst.msk [vmem:[%s6081_s12 + $0x1d8] sm:$0xf] %vm2641_vm4, %v5206_v48  ;;  %vm3627_vm9 = vcmp.ge.f32.partialorder %v3595_v1, 1.0  ;;  %v2926_v43 = vmul.f32 %v2894_v61, %v2766_v63  ;;  %4977 = vst.msk [vmem:[%s6081_s12 + $0x160] sm:$0xf] %vm2641_vm4, %v5176_v5  ;;  %vm3212_vm10 = vcmp.ge.f32.partialorder %v3180_v7, 1.0  ;;  %v3117_v11 = vsub.f32 %v7443_v35, %v7098_v45 }
 0x289   : > { %v5008_v44 = vsel %vm3627_vm9, 1.0, %v7404_v53  ;;  %v3532_v60 = vsub.f32 %v2259_v32, %v3339_v27  ;;  %v4914_v38 = vsel %vm3212_vm10, 1.0, %v7404_v53  ;;  %v2768_v51 = vadd.f32 %v2736_v55, %v7441_v12  ;;  %v7447_v55 = vld [vmem:[#allocation29_spill] sm:$0xff] }
 0x28a   : > { %v5207_v31 = vpack.c.bf16 %v5008_v44, %v5008_v44  ;;  %v3308_v16 = vsub.f32 1.0, %v4914_v38  ;;  %v5177_v41 = vpack.c.bf16 %v4914_v38, %v4914_v38  ;;  %v2737_v42 = vmul.f32 0.5, %v2705_v9 }
 0x28b   : > { %v2927_v63 = vmul.f32 %v2895_v47, %v2767_v19  ;;  %v3564_v8 = vmul.f32 0.5, %v3532_v60  ;;  %vm2800_vm11 = vcmp.ge.f32.partialorder %v2768_v51, 1.0  ;;  %v3149_v37 = vmul.f32 0.5, %v3117_v11  ;;  %v7448_v11 = vld [vmem:[#allocation30_spill] sm:$0xff] }
 0x28c   : > { %5072 = vst.msk [vmem:[%s6081_s12 + $0x1dc] sm:$0xf] %vm2641_vm4, %v5207_v31  ;;  %v3340_v26 = vmul.f32 %v3308_v16, %v3180_v7  ;;  %4978 = vst.msk [vmem:[%s6081_s12 + $0x164] sm:$0xf] %vm2641_vm4, %v5177_v41  ;;  %v4823_v28 = vsel %vm2800_vm11, 1.0, %v7404_v53  ;;  %v2769_v39 = vadd.f32 %v2737_v42, %v7442_v2  ;;  %v3118_v24 = vsub.f32 %v7444_v54, %v7109_v36 }
 0x28d   : > { %v3596_v13 = vadd.f32 %v3564_v8, %v3339_v27  ;;  %v5150_v0 = vpack.c.bf16 %v4823_v28, %v4823_v28  ;;  %v2267_v25 = vadd.f32 %v6946_v46, %v6889_v23  ;;  %v3181_v34 = vadd.f32 %v3149_v37, %v7098_v45 }
 0x28e   : > { %v3533_v17 = vsub.f32 %v2262_v50, %v3340_v26  ;;  %v2896_v30 = vsub.f32 1.0, %v4823_v28  ;;  %vm2801_vm12 = vcmp.ge.f32.partialorder %v2769_v39, 1.0  ;;  %v3150_v57 = vmul.f32 0.5, %v3118_v24 }
 0x28f   : > { %vm3628_vm13 = vcmp.ge.f32.partialorder %v3596_v13, 1.0  ;;  %4887 = vst.msk [vmem:[%s6081_s12 + $0xf8] sm:$0xf] %vm2641_vm4, %v5150_v0  ;;  %v4824_v58 = vsel %vm2801_vm12, 1.0, %v7404_v53  ;;  %vm3213_vm14 = vcmp.ge.f32.partialorder %v3181_v34, 1.0  ;;  %v2270_v10 = vadd.f32 %v6946_v46, %v6901_v6 }
 0x290   : > { %v5009_v19 = vsel %vm3628_vm13, 1.0, %v7404_v53  ;;  %v3565_v23 = vmul.f32 0.5, %v3533_v17  ;;  %v2897_v32 = vsub.f32 1.0, %v4824_v58  ;;  %v5151_v45 = vpack.c.bf16 %v4824_v58, %v4824_v58 }
 0x291   : > { %v5208_v40 = vpack.c.bf16 %v5009_v19, %v5009_v19  ;;  %v4915_v3 = vsel %vm3213_vm14, 1.0, %v7404_v53  ;;  %v3182_v33 = vadd.f32 %v3150_v57, %v7109_v36  ;;  %v3119_v12 = vsub.f32 %v7445_v18, %v2926_v43 }
 0x292   : > { %v3597_v22 = vadd.f32 %v3565_v23, %v3340_v26  ;;  %v2928_v61 = vmul.f32 %v2896_v30, %v2768_v51  ;;  %4888 = vst.msk [vmem:[%s6081_s12 + $0xfc] sm:$0xf] %vm2641_vm4, %v5151_v45  ;;  %v3309_v49 = vsub.f32 1.0, %v4915_v3  ;;  %v5178_v29 = vpack.c.bf16 %v4915_v3, %v4915_v3 }
 0x293   : > { %5073 = vst.msk [vmem:[%s6081_s12 + $0x1e0] sm:$0xf] %vm2641_vm4, %v5208_v40  ;;  %v2929_v6 = vmul.f32 %v2897_v32, %v2769_v39  ;;  %vm3214_vm15 = vcmp.ge.f32.partialorder %v3182_v33, 1.0  ;;  %v3151_v59 = vmul.f32 0.5, %v3119_v12  ;;  %v3120_v52 = vsub.f32 %v7446_v14, %v2927_v63 }
 0x294   : > { %vm3629_vm0 = vcmp.ge.f32.partialorder %v3597_v22, 1.0  ;;  %v3341_v21 = vmul.f32 %v3309_v49, %v3181_v34  ;;  %4979 = vst.msk [vmem:[%s6081_s12 + $0x168] sm:$0xf] %vm2641_vm4, %v5178_v29  ;;  %v4916_v36 = vsel %vm3214_vm15, 1.0, %v7404_v53  ;;  %v2275_v56 = vadd.f32 %v6946_v46, %v6923_v62 }
 0x295   : > { %v5010_v50 = vsel %vm3629_vm0, 1.0, %v7404_v53  ;;  %v3310_v48 = vsub.f32 1.0, %v4916_v36  ;;  %v5179_v1 = vpack.c.bf16 %v4916_v36, %v4916_v36  ;;  %v3183_v5 = vadd.f32 %v3151_v59, %v2926_v43 }
 0x296   : > { %v5209_v7 = vpack.c.bf16 %v5010_v50, %v5010_v50  ;;  %v3534_v47 = vsub.f32 %v2267_v25, %v3341_v21  ;;  %v3152_v27 = vmul.f32 0.5, %v3120_v52  ;;  %v3121_v2 = vsub.f32 %v7447_v55, %v2928_v61  ;;  %v3911_v55 = vld [vmem:[%s6081_s12 + $0x30] sm:$0xff] (%p5574_p6)  }
 0x297   : > { %v3342_v9 = vmul.f32 %v3310_v48, %v3182_v33  ;;  %4980 = vst.msk [vmem:[%s6081_s12 + $0x16c] sm:$0xf] %vm2641_vm4, %v5179_v1  ;;  %vm3215_vm1 = vcmp.ge.f32.partialorder %v3183_v5, 1.0  ;;  %v2278_v35 = vadd.f32 %v6946_v46, %v6938_v15  ;;  %v3122_v44 = vsub.f32 %v7448_v11, %v2929_v6  ;;  %v3887_v1 = vld [vmem:[%s6081_s12] sm:$0xff] (%p5574_p6)   ;;  %3912 = vst [vmem:[%s7227_s25 + $0x30] sm:$0xff] (%p5574_p6), %v3911_v55   ;;  %v3927_v11 = vld [vmem:[%s6081_s12 + $0x50] sm:$0xff] (%p5574_p6)  }
 0x298   : > { %5074 = vst.msk [vmem:[%s6081_s12 + $0x1e4] sm:$0xf] %vm2641_vm4, %v5209_v7  ;;  %v3566_v62 = vmul.f32 0.5, %v3534_v47  ;;  %v4917_v43 = vsel %vm3215_vm1, 1.0, %v7404_v53  ;;  %v3184_v60 = vadd.f32 %v3152_v27, %v2927_v63  ;;  %v3153_v38 = vmul.f32 0.5, %v3121_v2  ;;  %v3899_v7 = vld [vmem:[%s6081_s12 + $0x18] sm:$0xff] (%p5574_p6)   ;;  %3888 = vst [vmem:[%s7227_s25] sm:$0xff] (%p5574_p6), %v3887_v1  }
 0x299   : > { %v3535_v51 = vsub.f32 %v2270_v10, %v3342_v9  ;;  %v3311_v31 = vsub.f32 1.0, %v4917_v43  ;;  %v5180_v16 = vpack.c.bf16 %v4917_v43, %v4917_v43  ;;  %v3154_v41 = vmul.f32 0.5, %v3122_v44  ;;  %v3903_v47 = vld [vmem:[%s6081_s12 + $0x20] sm:$0xff] (%p5574_p6)   ;;  %v3907_v27 = vld [vmem:[%s6081_s12 + $0x28] sm:$0xff] (%p5574_p6)   ;;  %3900 = vst [vmem:[%s7227_s25 + $0x18] sm:$0xff] (%p5574_p6), %v3899_v7   ;;  %v3915_v2 = vld [vmem:[%s6081_s12 + $0x38] sm:$0xff] (%p5574_p6)  }
 0x29a   : > { %v3598_v42 = vadd.f32 %v3566_v62, %v3341_v21  ;;  %vm3216_vm2 = vcmp.ge.f32.partialorder %v3184_v60, 1.0  ;;  %v2283_v8 = vadd.f32 %v6946_v46, %v6966_v4  ;;  %v3185_v15 = vadd.f32 %v3153_v38, %v2928_v61  ;;  %3904 = vst [vmem:[%s7227_s25 + $0x20] sm:$0xff] (%p5574_p6), %v3903_v47   ;;  %3908 = vst [vmem:[%s7227_s25 + $0x28] sm:$0xff] (%p5574_p6), %v3907_v27   ;;  %v3931_v44 = vld [vmem:[%s6081_s12 + $0x58] sm:$0xff] (%p5574_p6)   ;;  %v3935_v62 = vld [vmem:[%s6081_s12 + $0x60] sm:$0xff] (%p5574_p6)  }
 0x29b   : > { %v3567_v37 = vmul.f32 0.5, %v3535_v51  ;;  %v3343_v26 = vmul.f32 %v3311_v31, %v3183_v5  ;;  %4981 = vst.msk [vmem:[%s6081_s12 + $0x170] sm:$0xf] %vm2641_vm4, %v5180_v16  ;;  %v4918_v28 = vsel %vm3216_vm2, 1.0, %v7404_v53  ;;  %v3186_v39 = vadd.f32 %v3154_v41, %v2929_v6  ;;  %v3891_v5 = vld [vmem:[%s6081_s12 + $0x8] sm:$0xff] (%p5574_p6)   ;;  %3916 = vst [vmem:[%s7227_s25 + $0x38] sm:$0xff] (%p5574_p6), %v3915_v2  }
 0x29c   : > { %vm3630_vm3 = vcmp.ge.f32.partialorder %v3598_v42, 1.0  ;;  %v3312_v63 = vsub.f32 1.0, %v4918_v28  ;;  %v5181_v54 = vpack.c.bf16 %v4918_v28, %v4918_v28  ;;  %vm3217_vm5 = vcmp.ge.f32.partialorder %v3185_v15, 1.0  ;;  %3892 = vst [vmem:[%s7227_s25 + $0x8] sm:$0xff] (%p5574_p6), %v3891_v5   ;;  %3928 = vst [vmem:[%s7227_s25 + $0x50] sm:$0xff] (%p5574_p6), %v3927_v11   ;;  %v3939_v43 = vld [vmem:[%s6081_s12 + $0x68] sm:$0xff] (%p5574_p6)  }
 0x29d   : > { %v5011_v24 = vsel %vm3630_vm3, 1.0, %v7404_v53  ;;  %v3599_v13 = vadd.f32 %v3567_v37, %v3342_v9  ;;  %v3536_v0 = vsub.f32 %v2275_v56, %v3343_v26  ;;  %v4919_v4 = vsel %vm3217_vm5, 1.0, %v7404_v53  ;;  %v3919_v9 = vld [vmem:[%s6081_s12 + $0x40] sm:$0xff] (%p5574_p6)   ;;  %3932 = vst [vmem:[%s7227_s25 + $0x58] sm:$0xff] (%p5574_p6), %v3931_v44   ;;  %3936 = vst [vmem:[%s7227_s25 + $0x60] sm:$0xff] (%p5574_p6), %v3935_v62   ;;  %v3947_v38 = vld [vmem:[%s6081_s12 + $0x78] sm:$0xff] (%p5574_p6)  }
 0x29e   : > { %v5210_v25 = vpack.c.bf16 %v5011_v24, %v5011_v24  ;;  %v3344_v34 = vmul.f32 %v3312_v63, %v3184_v60  ;;  %4982 = vst.msk [vmem:[%s6081_s12 + $0x174] sm:$0xf] %vm2641_vm4, %v5181_v54  ;;  %v3313_v17 = vsub.f32 1.0, %v4919_v4  ;;  %v5182_v30 = vpack.c.bf16 %v4919_v4, %v4919_v4  ;;  %3920 = vst [vmem:[%s7227_s25 + $0x40] sm:$0xff] (%p5574_p6), %v3919_v9   ;;  %v3943_v60 = vld [vmem:[%s6081_s12 + $0x70] sm:$0xff] (%p5574_p6)   ;;  %v3951_v51 = vld [vmem:[%s6081_s12 + $0x80] sm:$0xff] (%p5574_p6)  }
 0x29f   : > { %vm3631_vm6 = vcmp.ge.f32.partialorder %v3599_v13, 1.0  ;;  %v3568_v57 = vmul.f32 0.5, %v3536_v0  ;;  %vm3218_vm7 = vcmp.ge.f32.partialorder %v3186_v39, 1.0  ;;  %v2286_v12 = vadd.f32 %v6946_v46, %v6976_v20  ;;  %3940 = vst [vmem:[%s7227_s25 + $0x68] sm:$0xff] (%p5574_p6), %v3939_v43   ;;  %3944 = vst [vmem:[%s7227_s25 + $0x70] sm:$0xff] (%p5574_p6), %v3943_v60   ;;  %v3955_v31 = vld [vmem:[%s6081_s12 + $0x88] sm:$0xff] (%p5574_p6)  }
 0x2a0   : > { %5075 = vst.msk [vmem:[%s6081_s12 + $0x1e8] sm:$0xf] %vm2641_vm4, %v5210_v25  ;;  %v5012_v58 = vsel %vm3631_vm6, 1.0, %v7404_v53  ;;  %v3537_v10 = vsub.f32 %v2278_v35, %v3344_v34  ;;  %v3345_v19 = vmul.f32 %v3313_v17, %v3185_v15  ;;  %4983 = vst.msk [vmem:[%s6081_s12 + $0x178] sm:$0xf] %vm2641_vm4, %v5182_v30  ;;  %v4920_v23 = vsel %vm3218_vm7, 1.0, %v7404_v53 }
 0x2a1   : > { %v5211_v32 = vpack.c.bf16 %v5012_v58, %v5012_v58  ;;  %v3600_v45 = vadd.f32 %v3568_v57, %v3343_v26  ;;  %v3314_v40 = vsub.f32 1.0, %v4920_v23  ;;  %v5183_v3 = vpack.c.bf16 %v4920_v23, %v4920_v23  ;;  %v3923_v35 = vld [vmem:[%s6081_s12 + $0x48] sm:$0xff] (%p5574_p6)   ;;  %3948 = vst [vmem:[%s7227_s25 + $0x78] sm:$0xff] (%p5574_p6), %v3947_v38   ;;  %3952 = vst [vmem:[%s7227_s25 + $0x100] sm:$0xff] (%p5574_p6), %v3951_v51   ;;  %v3959_v16 = vld [vmem:[%s6081_s12 + $0x90] sm:$0xff] (%p5574_p6)  }
 0x2a2   : > { %v3569_v33 = vmul.f32 0.5, %v3537_v10  ;;  %v3538_v18 = vsub.f32 %v2283_v8, %v3345_v19  ;;  %3924 = vst [vmem:[%s7227_s25 + $0x48] sm:$0xff] (%p5574_p6), %v3923_v35   ;;  %3956 = vst [vmem:[%s7227_s25 + $0x108] sm:$0xff] (%p5574_p6), %v3955_v31   ;;  %v3963_v41 = vld [vmem:[%s6081_s12 + $0x98] sm:$0xff] (%p5574_p6)   ;;  %v3967_v42 = vld [vmem:[%s6081_s12 + $0xa0] sm:$0xff] (%p5574_p6)  }
 0x2a3   : > { %5076 = vst.msk [vmem:[%s6081_s12 + $0x1ec] sm:$0xf] %vm2641_vm4, %v5211_v32  ;;  %vm3632_vm8 = vcmp.ge.f32.partialorder %v3600_v45, 1.0  ;;  %v3346_v22 = vmul.f32 %v3314_v40, %v3186_v39  ;;  %4984 = vst.msk [vmem:[%s6081_s12 + $0x17c] sm:$0xf] %vm2641_vm4, %v5183_v3  ;;  %v3971_v8 = vld [vmem:[%s6081_s12 + $0xa8] sm:$0xff] (%p5574_p6)  }
 0x2a4   : > { %v5013_v61 = vsel %vm3632_vm8, 1.0, %v7404_v53  ;;  %v3601_v49 = vadd.f32 %v3569_v33, %v3344_v34  ;;  %v3570_v29 = vmul.f32 0.5, %v3538_v18  ;;  %3960 = vst [vmem:[%s7227_s25 + $0x110] sm:$0xff] (%p5574_p6), %v3959_v16   ;;  %3964 = vst [vmem:[%s7227_s25 + $0x118] sm:$0xff] (%p5574_p6), %v3963_v41   ;;  %v3975_v15 = vld [vmem:[%s6081_s12 + $0xb0] sm:$0xff] (%p5574_p6)   ;;  %v3979_v37 = vld [vmem:[%s6081_s12 + $0xb8] sm:$0xff] (%p5574_p6)  }
 0x2a5   : > { %v5212_v6 = vpack.c.bf16 %v5013_v61, %v5013_v61  ;;  %v3539_v59 = vsub.f32 %v2286_v12, %v3346_v22  ;;  %3968 = vst [vmem:[%s7227_s25 + $0x120] sm:$0xff] (%p5574_p6), %v3967_v42   ;;  %3972 = vst [vmem:[%s7227_s25 + $0x128] sm:$0xff] (%p5574_p6), %v3971_v8   ;;  %v3983_v26 = vld [vmem:[%s6081_s12 + $0xc0] sm:$0xff] (%p5574_p6)   ;;  %v3987_v28 = vld [vmem:[%s6081_s12 + $0xc8] sm:$0xff] (%p5574_p6)  }
 0x2a6   : > { %vm3633_vm9 = vcmp.ge.f32.partialorder %v3601_v49, 1.0  ;;  %v3602_v14 = vadd.f32 %v3570_v29, %v3345_v19  ;;  %3976 = vst [vmem:[%s7227_s25 + $0x130] sm:$0xff] (%p5574_p6), %v3975_v15   ;;  %3980 = vst [vmem:[%s7227_s25 + $0x138] sm:$0xff] (%p5574_p6), %v3979_v37   ;;  %v3991_v39 = vld [vmem:[%s6081_s12 + $0xd0] sm:$0xff] (%p5574_p6)   ;;  %v3995_v63 = vld [vmem:[%s6081_s12 + $0xd8] sm:$0xff] (%p5574_p6)  }
 0x2a7   : > { %5077 = vst.msk [vmem:[%s6081_s12 + $0x1f0] sm:$0xf] %vm2641_vm4, %v5212_v6  ;;  %v5014_v52 = vsel %vm3633_vm9, 1.0, %v7404_v53  ;;  %v3571_v21 = vmul.f32 0.5, %v3539_v59  ;;  %3984 = vst [vmem:[%s7227_s25 + $0x140] sm:$0xff] (%p5574_p6), %v3983_v26   ;;  %v3999_v54 = vld [vmem:[%s6081_s12 + $0xe0] sm:$0xff] (%p5574_p6)  }
 0x2a8   : > { %v5213_v46 = vpack.c.bf16 %v5014_v52, %v5014_v52  ;;  %vm3634_vm10 = vcmp.ge.f32.partialorder %v3602_v14, 1.0  ;;  %3988 = vst [vmem:[%s7227_s25 + $0x148] sm:$0xff] (%p5574_p6), %v3987_v28   ;;  %3992 = vst [vmem:[%s7227_s25 + $0x150] sm:$0xff] (%p5574_p6), %v3991_v39   ;;  %v4003_v24 = vld [vmem:[%s6081_s12 + $0xe8] sm:$0xff] (%p5574_p6)   ;;  %v4007_v13 = vld [vmem:[%s6081_s12 + $0xf0] sm:$0xff] (%p5574_p6)  }
 0x2a9   : > { %v5015_v20 = vsel %vm3634_vm10, 1.0, %v7404_v53  ;;  %v3603_v36 = vadd.f32 %v3571_v21, %v3346_v22  ;;  %3867 = sbr.rel (!%p5574_p6) target bundleno = 702 (0x2be), region = 74  ;;  %3996 = vst [vmem:[%s7227_s25 + $0x158] sm:$0xff] (%p5574_p6), %v3995_v63   ;;  %4000 = vst [vmem:[%s7227_s25 + $0x160] sm:$0xff] (%p5574_p6), %v3999_v54   ;;  %v4011_v0 = vld [vmem:[%s6081_s12 + $0xf8] sm:$0xff] (%p5574_p6)   ;;  %v4015_v4 = vld [vmem:[%s6081_s12 + $0x100] sm:$0xff] (%p5574_p6)  }
 0x2aa   : > { %5078 = vst.msk [vmem:[%s6081_s12 + $0x1f4] sm:$0xf] %vm2641_vm4, %v5213_v46  ;;  %v5214_v56 = vpack.c.bf16 %v5015_v20, %v5015_v20  ;;  %4004 = vst [vmem:[%s7227_s25 + $0x168] sm:$0xff] (%p5574_p6), %v4003_v24   ;;  %v4019_v25 = vld [vmem:[%s6081_s12 + $0x108] sm:$0xff] (%p5574_p6)   ;;  %v4023_v34 = vld [vmem:[%s6081_s12 + $0x110] sm:$0xff] (%p5574_p6)  }
 0x2ab   : > { %vm3635_vm11 = vcmp.ge.f32.partialorder %v3603_v36, 1.0  ;;  %4008 = vst [vmem:[%s7227_s25 + $0x170] sm:$0xff] (%p5574_p6), %v4007_v13   ;;  %4012 = vst [vmem:[%s7227_s25 + $0x178] sm:$0xff] (%p5574_p6), %v4011_v0   ;;  %v4027_v17 = vld [vmem:[%s6081_s12 + $0x118] sm:$0xff] (%p5574_p6)   ;;  %v4031_v30 = vld [vmem:[%s6081_s12 + $0x120] sm:$0xff] (%p5574_p6)  }
 0x2ac   : > { %5079 = vst.msk [vmem:[%s6081_s12 + $0x1f8] sm:$0xf] %vm2641_vm4, %v5214_v56  ;;  %v5016_v50 = vsel %vm3635_vm11, 1.0, %v7404_v53  ;;  %v3895_v53 = vld [vmem:[%s6081_s12 + $0x10] sm:$0xff] (%p5574_p6)   ;;  %4016 = vst [vmem:[%s7227_s25 + $0x200] sm:$0xff] (%p5574_p6), %v4015_v4   ;;  %v4035_v57 = vld [vmem:[%s6081_s12 + $0x128] sm:$0xff] (%p5574_p6)  }
 0x2ad   : > { %v5215_v48 = vpack.c.bf16 %v5016_v50, %v5016_v50  ;;  %3896 = vst [vmem:[%s7227_s25 + $0x10] sm:$0xff] (%p5574_p6), %v3895_v53   ;;  %4020 = vst [vmem:[%s7227_s25 + $0x208] sm:$0xff] (%p5574_p6), %v4019_v25   ;;  %v4039_v58 = vld [vmem:[%s6081_s12 + $0x130] sm:$0xff] (%p5574_p6)   ;;  %v4043_v10 = vld [vmem:[%s6081_s12 + $0x138] sm:$0xff] (%p5574_p6)  }
 0x2ae   : > { %4024 = vst [vmem:[%s7227_s25 + $0x210] sm:$0xff] (%p5574_p6), %v4023_v34   ;;  %4028 = vst [vmem:[%s7227_s25 + $0x218] sm:$0xff] (%p5574_p6), %v4027_v17   ;;  %v4047_v19 = vld [vmem:[%s6081_s12 + $0x140] sm:$0xff] (%p5574_p6)   ;;  %v4051_v23 = vld [vmem:[%s6081_s12 + $0x148] sm:$0xff] (%p5574_p6)  }
 0x2af   : > { %5080 = vst.msk [vmem:[%s6081_s12 + $0x1fc] sm:$0xf] %vm2641_vm4, %v5215_v48  ;;  %4032 = vst [vmem:[%s7227_s25 + $0x220] sm:$0xff] (%p5574_p6), %v4031_v30   ;;  %v4055_v32 = vld [vmem:[%s6081_s12 + $0x150] sm:$0xff] (%p5574_p6)   ;;  %v4059_v45 = vld [vmem:[%s6081_s12 + $0x158] sm:$0xff] (%p5574_p6)  }
 0x2b0   : > { %4036 = vst [vmem:[%s7227_s25 + $0x228] sm:$0xff] %v4035_v57   ;;  %4040 = vst [vmem:[%s7227_s25 + $0x230] sm:$0xff] %v4039_v58   ;;  %v4063_v40 = vld [vmem:[%s6081_s12 + $0x160] sm:$0xff]   ;;  %v4067_v3 = vld [vmem:[%s6081_s12 + $0x168] sm:$0xff]  }
 0x2b1   : > { %4044 = vst [vmem:[%s7227_s25 + $0x238] sm:$0xff] %v4043_v10   ;;  %4048 = vst [vmem:[%s7227_s25 + $0x240] sm:$0xff] %v4047_v19   ;;  %v4071_v33 = vld [vmem:[%s6081_s12 + $0x170] sm:$0xff]   ;;  %v4075_v18 = vld [vmem:[%s6081_s12 + $0x178] sm:$0xff]  }
 0x2b2   : > { %4052 = vst [vmem:[%s7227_s25 + $0x248] sm:$0xff] %v4051_v23   ;;  %4056 = vst [vmem:[%s7227_s25 + $0x250] sm:$0xff] %v4055_v32   ;;  %v4079_v12 = vld [vmem:[%s6081_s12 + $0x180] sm:$0xff]   ;;  %v4083_v22 = vld [vmem:[%s6081_s12 + $0x188] sm:$0xff]  }
 0x2b3   : > { %4060 = vst [vmem:[%s7227_s25 + $0x258] sm:$0xff] %v4059_v45   ;;  %4064 = vst [vmem:[%s7227_s25 + $0x260] sm:$0xff] %v4063_v40   ;;  %v4087_v61 = vld [vmem:[%s6081_s12 + $0x190] sm:$0xff]   ;;  %v4091_v49 = vld [vmem:[%s6081_s12 + $0x198] sm:$0xff]  }
 0x2b4   : > { %4068 = vst [vmem:[%s7227_s25 + $0x268] sm:$0xff] %v4067_v3   ;;  %4072 = vst [vmem:[%s7227_s25 + $0x270] sm:$0xff] %v4071_v33   ;;  %v4095_v29 = vld [vmem:[%s6081_s12 + $0x1a0] sm:$0xff]   ;;  %v4099_v6 = vld [vmem:[%s6081_s12 + $0x1a8] sm:$0xff]  }
 0x2b5   : > { %4076 = vst [vmem:[%s7227_s25 + $0x278] sm:$0xff] %v4075_v18   ;;  %4080 = vst [vmem:[%s7227_s25 + $0x300] sm:$0xff] %v4079_v12   ;;  %v4103_v59 = vld [vmem:[%s6081_s12 + $0x1b0] sm:$0xff]   ;;  %v4107_v14 = vld [vmem:[%s6081_s12 + $0x1b8] sm:$0xff]  }
 0x2b6   : > { %4084 = vst [vmem:[%s7227_s25 + $0x308] sm:$0xff] %v4083_v22   ;;  %4088 = vst [vmem:[%s7227_s25 + $0x310] sm:$0xff] %v4087_v61   ;;  %v4111_v52 = vld [vmem:[%s6081_s12 + $0x1c0] sm:$0xff]   ;;  %v4115_v21 = vld [vmem:[%s6081_s12 + $0x1c8] sm:$0xff]  }
 0x2b7   : > { %4092 = vst [vmem:[%s7227_s25 + $0x318] sm:$0xff] %v4091_v49   ;;  %4096 = vst [vmem:[%s7227_s25 + $0x320] sm:$0xff] %v4095_v29   ;;  %v4119_v46 = vld [vmem:[%s6081_s12 + $0x1d0] sm:$0xff]   ;;  %v4123_v20 = vld [vmem:[%s6081_s12 + $0x1d8] sm:$0xff]  }
 0x2b8   : > { %4100 = vst [vmem:[%s7227_s25 + $0x328] sm:$0xff] %v4099_v6   ;;  %4104 = vst [vmem:[%s7227_s25 + $0x330] sm:$0xff] %v4103_v59   ;;  %v4127_v36 = vld [vmem:[%s6081_s12 + $0x1e0] sm:$0xff]   ;;  %v4131_v56 = vld [vmem:[%s6081_s12 + $0x1e8] sm:$0xff]  }
 0x2b9   : > { %4108 = vst [vmem:[%s7227_s25 + $0x338] sm:$0xff] %v4107_v14   ;;  %4112 = vst [vmem:[%s7227_s25 + $0x340] sm:$0xff] %v4111_v52   ;;  %v4135_v50 = vld [vmem:[%s6081_s12 + $0x1f0] sm:$0xff]   ;;  %v4139_v48 = vld [vmem:[%s6081_s12 + $0x1f8] sm:$0xff]  }
 0x2ba   : > { %4116 = vst [vmem:[%s7227_s25 + $0x348] sm:$0xff] %v4115_v21   ;;  %4120 = vst [vmem:[%s7227_s25 + $0x350] sm:$0xff] %v4119_v46  }
 0x2bb   : > { %4124 = vst [vmem:[%s7227_s25 + $0x358] sm:$0xff] %v4123_v20   ;;  %4128 = vst [vmem:[%s7227_s25 + $0x360] sm:$0xff] %v4127_v36  }
 0x2bc   : > { %4132 = vst [vmem:[%s7227_s25 + $0x368] sm:$0xff] %v4131_v56   ;;  %4136 = vst [vmem:[%s7227_s25 + $0x370] sm:$0xff] %v4135_v50  }
 0x2bd   : > { %4140 = vst [vmem:[%s7227_s25 + $0x378] sm:$0xff] %v4139_v48  }
 0x2be PF: > { %s13_s16 = sadd.s32 1, %s5514_s16   ;;  %s7449_s12 = smov %s5502_s13 }
 0x2bf   : > { %p10_p11 = scmp.ge.s32.totalorder %s13_s16, 4   ;;  %s7450_s13 = smov %s5579_s22 }
 0x2c0   : > { %s7451_s14 = smov %s5510_s15  ;;  %s7452_s15 = smov %s7454_s17 }
 0x2c1   :  { %12 = sbr.rel (!%p10_p11) target bundleno = 3 (0x3), region = 155 }

</bundles_post_ra>
